<compile_context>
chip_gen: v5e
topology: v5e:2x2
jax: 0.10.0
libtpu: 0.0.40
codegen_flags: <defaults>
</compile_context>

<pallas_src>
import functools
import math

import jax
import jax.numpy as jnp
from jax.experimental import pallas as pl
from jax.experimental.pallas import tpu as pltpu


_INV_SQRT2 = 1.0 / math.sqrt(2.0)
_BN_EPS = 1e-5


def _gelu(x, approximate=False):
    if approximate:
        # tanh approximation: transcendental goes to the (idle) EUP slot, but
        # numerics differ slightly from nn.GELU()'s exact default.
        return jax.nn.gelu(x, approximate=True)
    return 0.5 * x * (1.0 + jax.lax.erf(x * _INV_SQRT2))


# ---------------------------------------------------------------------------
# Kernel
# ---------------------------------------------------------------------------
def proj_layer_kernel(x_ref, w1_ref, b1_ref, w2_ref, b2_ref, w3_ref, b3_ref,
                      o_ref, *, gelu_approx=False):
    # x arrives in its original dtype; cast to the weight compute dtype in
    # VMEM (cheap VPU cast) instead of a separate wrapper-side XLA cast op.
    x = x_ref[...].astype(w1_ref.dtype)

    # linear1 (+ folded bn1) -> dropout (identity in eval) -> GELU
    h = jnp.dot(x, w1_ref[...], preferred_element_type=jnp.float32)
    h = _gelu(h + b1_ref[...], gelu_approx)

    # linear2 (+ folded bn2) -> dropout (identity) -> GELU
    h = jnp.dot(h.astype(w2_ref.dtype), w2_ref[...],
                preferred_element_type=jnp.float32)
    h = _gelu(h + b2_ref[...], gelu_approx)

    # proj (+ folded bn3): output width is 1, so use a VPU multiply + lane
    # reduction (XLU) instead of a 1-column MXU matmul, and store the result
    # lane-dense as a (1, tb) row (unmasked full-lane vst).
    out = jnp.sum(h * w3_ref[...], axis=-1)            # (tb,)
    out = out.reshape(1, -1) + b3_ref[...]              # (1, tb)
    o_ref[...] = out.astype(o_ref.dtype)


# ---------------------------------------------------------------------------
# Wrapper
# ---------------------------------------------------------------------------
def _vmem_capacity_bytes():
    try:
        cap = getattr(pltpu.get_tpu_info(), "vmem_capacity_bytes", None)
        if cap:
            return int(cap)
    except Exception:
        pass
    return 64 * 2**20  # conservative default (v7x-sized VMEM)


def _pick_tb(batch, in_dim, hidden, h2, x_itemsize, tile_budget_bytes):
    """Largest lane-aligned batch tile fitting the VMEM tile budget while
    keeping >= 2 grid steps (so v7x's 2 TensorCores both get work)."""
    def tile_bytes(tb):
        return (2 * tb * in_dim * x_itemsize   # x tile, double buffered
                + tb * (hidden + h2) * 4       # f32 intermediates
                + 2 * tb * 4)                  # (1, tb) out tile, double buffered

    for cand in (8192, 4096, 2048, 1024, 512, 256, 128):
        if (batch % cand == 0 and batch // cand >= 2
                and tile_bytes(cand) <= tile_budget_bytes):
            return cand
    return batch  # single full-extent block (small / awkward batch fallback)


def proj_layer_forward(x, folded_params, *, tb=None, out_dtype=None,
                       gelu_approx=False):
    (w1, b1, w2, b2, w3_row, b3) = folded_params
    B, in_dim = x.shape
    hidden = w1.shape[1]
    h2 = w2.shape[1]

    out_dtype = x.dtype if out_dtype is None else out_dtype
    x_itemsize = jnp.dtype(x.dtype).itemsize

    # Generation-aware VMEM ceiling: ~3/4 of physical VMEM (≈48 MiB on v7x's
    # 64 MiB, ≈96 MiB on v5e/v6e's 128 MiB), leaving compiler scratch headroom.
    vmem_cap = _vmem_capacity_bytes()
    gen_cap = max(32 * 2**20, min(vmem_cap * 3 // 4, vmem_cap - (16 << 20)))

    param_bytes = sum(int(p.size) * jnp.dtype(p.dtype).itemsize
                      for p in folded_params)

    if tb is None:
        tile_budget = max(0, gen_cap // 2 - 2 * param_bytes)
        tb = _pick_tb(B, in_dim, hidden, h2, x_itemsize, tile_budget)
    assert B % tb == 0, "batch must be divisible by the batch tile"
    assert tb == B or tb % 128 == 0, (
        "batch tile must be a multiple of 128 (lane-dense output block) or "
        "cover the whole batch")

    grid = (B // tb,)

    est = (2 * tb * in_dim * x_itemsize      # x tile, double buffered
           + 2 * param_bytes                 # params (worst case double buffered)
           + 2 * tb * 4                      # (1, tb) output tile, double buffered
           + tb * (hidden + h2 + 128) * 4)   # f32 intermediates + slack
    vmem_limit = int(min(gen_cap, max(32 * 2**20, 2 * est)))

    cost = pl.CostEstimate(
        flops=2 * B * (in_dim * hidden + hidden * h2 + h2),
        transcendentals=B * (hidden + h2),
        bytes_accessed=int(x.size) * x_itemsize + param_bytes + B * 4,
    )

    kernel = functools.partial(proj_layer_kernel, gelu_approx=gelu_approx)

    def build(buffered_params):
        if buffered_params:
            def param_spec(p):
                # Constant-index resident block: a single VMEM buffer suffices.
                return pl.BlockSpec(p.shape, lambda i: (0, 0),
                                    pipeline_mode=pl.Buffered(1))
        else:
            def param_spec(p):
                return pl.BlockSpec(p.shape, lambda i: (0, 0))

        return pl.pallas_call(
            kernel,
            out_shape=jax.ShapeDtypeStruct((1, B), out_dtype),
            grid=grid,
            in_specs=[pl.BlockSpec((tb, in_dim), lambda i: (i, 0))]
                     + [param_spec(p) for p in folded_params],
            out_specs=pl.BlockSpec((1, tb), lambda i: (0, i)),
            compiler_params=pltpu.CompilerParams(
                dimension_semantics=("parallel",),
                vmem_limit_bytes=vmem_limit,
            ),
            cost_estimate=cost,
        )

    try:
        out_row = build(buffered_params=True)(x, *folded_params)
    except Exception:
        # Fallback for jax versions without BlockSpec(pipeline_mode=...):
        # params are simply double buffered (tiny extra VMEM, same numerics).
        out_row = build(buffered_params=False)(x, *folded_params)

    # Lane-dense (1, B) kernel output -> module's (B, 1) (metadata-only reshape).
    return out_row.reshape(B, 1)


# ---------------------------------------------------------------------------
# Parameter construction (torch-equivalent init) and BN folding
# ---------------------------------------------------------------------------
def init_raw_params(key, in_dim, hidden_dim):
    """Raw ProjLayer parameters (torch layouts) with eval-mode BN stats."""
    h2 = hidden_dim // 2
    keys = jax.random.split(key, 6)

    def xavier_normal(k, fan_out, fan_in):
        std = math.sqrt(2.0 / (fan_in + fan_out))
        return std * jax.random.normal(k, (fan_out, fan_in), jnp.float32)

    def linear_bias(k, fan_in, fan_out):
        bound = 1.0 / math.sqrt(fan_in)
        return jax.random.uniform(k, (fan_out,), jnp.float32, -bound, bound)

    def bn_params(c):
        return dict(gamma=jnp.ones((c,), jnp.float32),
                    beta=jnp.zeros((c,), jnp.float32),
                    mean=jnp.zeros((c,), jnp.float32),
                    var=jnp.ones((c,), jnp.float32))

    return dict(
        w1=xavier_normal(keys[0], hidden_dim, in_dim),
        b1=linear_bias(keys[1], in_dim, hidden_dim),
        w2=xavier_normal(keys[2], h2, hidden_dim),
        b2=linear_bias(keys[3], hidden_dim, h2),
        w3=xavier_normal(keys[4], 1, h2),
        b3=linear_bias(keys[5], h2, 1),
        bn1=bn_params(hidden_dim), bn2=bn_params(h2), bn3=bn_params(1),
    )


def fold_params(raw, *, param_dtype=jnp.bfloat16, eps=_BN_EPS):
    """Fold eval-mode BatchNorm into the preceding Linear: W'=W*s, b'=b*s+t."""
    def fold(w_torch, b, bn):
        s = bn["gamma"] / jnp.sqrt(bn["var"] + eps)
        t = bn["beta"] - bn["mean"] * s
        w_f = (w_torch * s[:, None]).T         # (in, out), scaled per out-feature
        b_f = b * s + t
        return w_f, b_f

    w1f, b1f = fold(raw["w1"], raw["b1"], raw["bn1"])
    w2f, b2f = fold(raw["w2"], raw["b2"], raw["bn2"])
    w3f, b3f = fold(raw["w3"], raw["b3"], raw["bn3"])

    return (
        w1f.astype(param_dtype), b1f.reshape(1, -1).astype(jnp.float32),
        w2f.astype(param_dtype), b2f.reshape(1, -1).astype(jnp.float32),
        w3f.T.astype(jnp.float32),             # (1, h2) row; tiny, stays f32 (VPU path)
        b3f.reshape(1, 1).astype(jnp.float32),
    )


def proj_layer_reference(x, raw, eps=_BN_EPS):
    """Unfolded eval-mode reference: Linear -> BN -> (Dropout=id) -> GELU."""
    def bn(h, p):
        return (h - p["mean"]) / jnp.sqrt(p["var"] + eps) * p["gamma"] + p["beta"]

    h = x @ raw["w1"].T + raw["b1"]
    h = _gelu(bn(h, raw["bn1"]))
    h = h @ raw["w2"].T + raw["b2"]
    h = _gelu(bn(h, raw["bn2"]))
    h = h @ raw["w3"].T + raw["b3"]
    return bn(h, raw["bn3"])


# ---------------------------------------------------------------------------
if __name__ == "__main__":
    key = jax.random.PRNGKey(0)
    kx, kp = jax.random.split(key)

    B, in_dim, hidden_dim = 256, 32, 32
    x = jax.random.normal(kx, (B, in_dim), jnp.float32)

    raw = init_raw_params(kp, in_dim, hidden_dim)
    ref = proj_layer_reference(x, raw)

    # f32 path: exact-semantics check (tb=128 -> 2 pipelined "parallel" steps).
    out_f32 = proj_layer_forward(x, fold_params(raw, param_dtype=jnp.float32),
                                 tb=128)
    jax.block_until_ready(out_f32)
    assert out_f32.shape == (B, 1)
    assert jnp.allclose(out_f32, ref, atol=1e-5, rtol=1e-5)

    # bf16 fast path: bf16 weights + in-kernel x cast, f32 MXU accumulation
    # and f32 GELU/epilogue.  (Auto tile -> tb=128, 2 grid steps.)
    out_bf16 = proj_layer_forward(x, fold_params(raw, param_dtype=jnp.bfloat16))
    jax.block_until_ready(out_bf16)
    assert out_bf16.shape == (B, 1)
    assert jnp.allclose(out_bf16.astype(jnp.float32), ref, atol=1e-1, rtol=5e-2)

    # Small-batch fallback: single full-extent block (tb == B).
    xs = x[:8]
    out_small = proj_layer_forward(xs, fold_params(raw, param_dtype=jnp.float32))
    jax.block_until_ready(out_small)
    assert out_small.shape == (8, 1)
    assert jnp.allclose(out_small, ref[:8], atol=1e-5, rtol=1e-5)

    print("KERNEL_OK")
</pallas_src>

<mosaic_0001>
module attributes {stable_mosaic.version = 11 : i64} {
  func.func @proj_layer_kernel(%arg0: i32, %arg1: memref<128x32xf32, #tpu.memory_space<vmem>>, %arg2: memref<32x32xf32, #tpu.memory_space<vmem>>, %arg3: memref<1x32xf32, #tpu.memory_space<vmem>>, %arg4: memref<32x16xf32, #tpu.memory_space<vmem>>, %arg5: memref<1x16xf32, #tpu.memory_space<vmem>>, %arg6: memref<1x16xf32, #tpu.memory_space<vmem>>, %arg7: memref<1x1xf32, #tpu.memory_space<vmem>>, %arg8: memref<1x128xf32, #tpu.memory_space<vmem>>) attributes {dimension_semantics = [#tpu.dimension_semantics<parallel>], iteration_bounds = array<i64: 2>, scalar_prefetch = 0 : i64, scratch_operands = 0 : i64, tpu.core_type = #tpu.core_type<tc>, window_params = [{transform_indices = @transform_0, window_bounds = array<i64: 128, 32>}, {pipeline_mode = #tpu.pipeline_mode<synchronous>, transform_indices = @transform_1, window_bounds = array<i64: 32, 32>}, {pipeline_mode = #tpu.pipeline_mode<synchronous>, transform_indices = @transform_2, window_bounds = array<i64: 1, 32>}, {pipeline_mode = #tpu.pipeline_mode<synchronous>, transform_indices = @transform_3, window_bounds = array<i64: 32, 16>}, {pipeline_mode = #tpu.pipeline_mode<synchronous>, transform_indices = @transform_4, window_bounds = array<i64: 1, 16>}, {pipeline_mode = #tpu.pipeline_mode<synchronous>, transform_indices = @transform_5, window_bounds = array<i64: 1, 16>}, {pipeline_mode = #tpu.pipeline_mode<synchronous>, transform_indices = @transform_6, window_bounds = array<i64: 1, 1>}, {transform_indices = @transform_7, window_bounds = array<i64: 1, 128>}]} {
    %c0 = arith.constant 0 : index
    %c0_0 = arith.constant 0 : index
    %0 = vector.load %arg1[%c0, %c0_0] : memref<128x32xf32, #tpu.memory_space<vmem>>, vector<128x32xf32>
    %c0_1 = arith.constant 0 : index
    %c0_2 = arith.constant 0 : index
    %1 = vector.load %arg2[%c0_1, %c0_2] : memref<32x32xf32, #tpu.memory_space<vmem>>, vector<32x32xf32>
    %cst = arith.constant dense<0.000000e+00> : vector<128x32xf32>
    %2 = tpu.matmul %0, %1, %cst {dimension_numbers = #tpu.dot_dimension_numbers<[1], [0], [0], [1], [0, 0, 1, 1], [], []>} : vector<128x32xf32>, vector<32x32xf32>, vector<128x32xf32> -> vector<128x32xf32>
    %c0_3 = arith.constant 0 : index
    %c0_4 = arith.constant 0 : index
    %3 = vector.load %arg3[%c0_3, %c0_4] : memref<1x32xf32, #tpu.memory_space<vmem>>, vector<1x32xf32>
    %4 = vector.broadcast %3 : vector<1x32xf32> to vector<128x32xf32>
    %5 = arith.addf %2, %4 : vector<128x32xf32>
    %cst_5 = arith.constant 5.000000e-01 : f32
    %6 = vector.broadcast %cst_5 : f32 to vector<128x32xf32>
    %7 = arith.mulf %6, %5 : vector<128x32xf32>
    %cst_6 = arith.constant 0.707106769 : f32
    %8 = vector.broadcast %cst_6 : f32 to vector<128x32xf32>
    %9 = arith.mulf %5, %8 : vector<128x32xf32>
    %10 = math.erf %9 : vector<128x32xf32>
    %cst_7 = arith.constant 1.000000e+00 : f32
    %11 = vector.broadcast %cst_7 : f32 to vector<128x32xf32>
    %12 = arith.addf %11, %10 : vector<128x32xf32>
    %13 = arith.mulf %7, %12 : vector<128x32xf32>
    %c0_8 = arith.constant 0 : index
    %c0_9 = arith.constant 0 : index
    %14 = vector.load %arg4[%c0_8, %c0_9] : memref<32x16xf32, #tpu.memory_space<vmem>>, vector<32x16xf32>
    %cst_10 = arith.constant dense<0.000000e+00> : vector<128x16xf32>
    %15 = tpu.matmul %13, %14, %cst_10 {dimension_numbers = #tpu.dot_dimension_numbers<[1], [0], [0], [1], [0, 0, 1, 1], [], []>} : vector<128x32xf32>, vector<32x16xf32>, vector<128x16xf32> -> vector<128x16xf32>
    %c0_11 = arith.constant 0 : index
    %c0_12 = arith.constant 0 : index
    %16 = vector.load %arg5[%c0_11, %c0_12] : memref<1x16xf32, #tpu.memory_space<vmem>>, vector<1x16xf32>
    %17 = vector.broadcast %16 : vector<1x16xf32> to vector<128x16xf32>
    %18 = arith.addf %15, %17 : vector<128x16xf32>
    %cst_13 = arith.constant 5.000000e-01 : f32
    %19 = vector.broadcast %cst_13 : f32 to vector<128x16xf32>
    %20 = arith.mulf %19, %18 : vector<128x16xf32>
    %cst_14 = arith.constant 0.707106769 : f32
    %21 = vector.broadcast %cst_14 : f32 to vector<128x16xf32>
    %22 = arith.mulf %18, %21 : vector<128x16xf32>
    %23 = math.erf %22 : vector<128x16xf32>
    %cst_15 = arith.constant 1.000000e+00 : f32
    %24 = vector.broadcast %cst_15 : f32 to vector<128x16xf32>
    %25 = arith.addf %24, %23 : vector<128x16xf32>
    %26 = arith.mulf %20, %25 : vector<128x16xf32>
    %c0_16 = arith.constant 0 : index
    %c0_17 = arith.constant 0 : index
    %27 = vector.load %arg6[%c0_16, %c0_17] : memref<1x16xf32, #tpu.memory_space<vmem>>, vector<1x16xf32>
    %28 = vector.broadcast %27 : vector<1x16xf32> to vector<128x16xf32>
    %29 = arith.mulf %26, %28 : vector<128x16xf32>
    %cst_18 = arith.constant dense<0.000000e+00> : vector<128xf32>
    %30 = vector.multi_reduction <add>, %29, %cst_18 [1] : vector<128x16xf32> to vector<128xf32>
    %31 = vector.shape_cast %30 : vector<128xf32> to vector<1x128xf32>
    %c0_19 = arith.constant 0 : index
    %c0_20 = arith.constant 0 : index
    %32 = vector.load %arg7[%c0_19, %c0_20] : memref<1x1xf32, #tpu.memory_space<vmem>>, vector<1x1xf32>
    %33 = vector.broadcast %32 : vector<1x1xf32> to vector<1x128xf32>
    %34 = arith.addf %31, %33 : vector<1x128xf32>
    %c0_21 = arith.constant 0 : index
    %c0_22 = arith.constant 0 : index
    %35 = vector.load %arg8[%c0_21, %c0_22] : memref<1x128xf32, #tpu.memory_space<vmem>>, vector<1x128xf32>
    tpu.vector_store %arg8[%c0_21, %c0_22], %34 {strides = array<i32>} : memref<1x128xf32, #tpu.memory_space<vmem>>, vector<1x128xf32>,
    return
  }
  func.func @transform_0(%arg0: i32) -> (i32, i32) {
    %c0_i32 = arith.constant 0 : i32
    %c0_i32_0 = arith.constant 0 : i32
    return %arg0, %c0_i32 : i32, i32
  }
  func.func @transform_1(%arg0: i32) -> (i32, i32) {
    %c0_i32 = arith.constant 0 : i32
    %c0_i32_0 = arith.constant 0 : i32
    %c0_i32_1 = arith.constant 0 : i32
    return %c0_i32, %c0_i32_0 : i32, i32
  }
  func.func @transform_2(%arg0: i32) -> (i32, i32) {
    %c0_i32 = arith.constant 0 : i32
    %c0_i32_0 = arith.constant 0 : i32
    %c0_i32_1 = arith.constant 0 : i32
    return %c0_i32, %c0_i32_0 : i32, i32
  }
  func.func @transform_3(%arg0: i32) -> (i32, i32) {
    %c0_i32 = arith.constant 0 : i32
    %c0_i32_0 = arith.constant 0 : i32
    %c0_i32_1 = arith.constant 0 : i32
    return %c0_i32, %c0_i32_0 : i32, i32
  }
  func.func @transform_4(%arg0: i32) -> (i32, i32) {
    %c0_i32 = arith.constant 0 : i32
    %c0_i32_0 = arith.constant 0 : i32
    %c0_i32_1 = arith.constant 0 : i32
    return %c0_i32, %c0_i32_0 : i32, i32
  }
  func.func @transform_5(%arg0: i32) -> (i32, i32) {
    %c0_i32 = arith.constant 0 : i32
    %c0_i32_0 = arith.constant 0 : i32
    %c0_i32_1 = arith.constant 0 : i32
    return %c0_i32, %c0_i32_0 : i32, i32
  }
  func.func @transform_6(%arg0: i32) -> (i32, i32) {
    %c0_i32 = arith.constant 0 : i32
    %c0_i32_0 = arith.constant 0 : i32
    %c0_i32_1 = arith.constant 0 : i32
    return %c0_i32, %c0_i32_0 : i32, i32
  }
  func.func @transform_7(%arg0: i32) -> (i32, i32) {
    %c0_i32 = arith.constant 0 : i32
    %c0_i32_0 = arith.constant 0 : i32
    return %c0_i32, %arg0 : i32, i32
  }
}

module attributes {stable_mosaic.version = 11 : i64} {
  func.func @proj_layer_kernel(%arg0: i32, %arg1: memref<128x32xf32, #tpu.memory_space<vmem>>, %arg2: memref<32x32xf32, #tpu.memory_space<vmem>>, %arg3: memref<1x32xf32, #tpu.memory_space<vmem>>, %arg4: memref<32x16xf32, #tpu.memory_space<vmem>>, %arg5: memref<1x16xf32, #tpu.memory_space<vmem>>, %arg6: memref<1x16xf32, #tpu.memory_space<vmem>>, %arg7: memref<1x1xf32, #tpu.memory_space<vmem>>, %arg8: memref<1x128xf32, #tpu.memory_space<vmem>>) attributes {dimension_semantics = [#tpu.dimension_semantics<parallel>], iteration_bounds = array<i64: 2>, scalar_prefetch = 0 : i64, scratch_operands = 0 : i64, tpu.core_type = #tpu.core_type<tc>, window_params = [{transform_indices = @transform_0, window_bounds = array<i64: 128, 32>}, {pipeline_mode = #tpu.pipeline_mode<synchronous>, transform_indices = @transform_1, window_bounds = array<i64: 32, 32>}, {pipeline_mode = #tpu.pipeline_mode<synchronous>, transform_indices = @transform_2, window_bounds = array<i64: 1, 32>}, {pipeline_mode = #tpu.pipeline_mode<synchronous>, transform_indices = @transform_3, window_bounds = array<i64: 32, 16>}, {pipeline_mode = #tpu.pipeline_mode<synchronous>, transform_indices = @transform_4, window_bounds = array<i64: 1, 16>}, {pipeline_mode = #tpu.pipeline_mode<synchronous>, transform_indices = @transform_5, window_bounds = array<i64: 1, 16>}, {pipeline_mode = #tpu.pipeline_mode<synchronous>, transform_indices = @transform_6, window_bounds = array<i64: 1, 1>}, {transform_indices = @transform_7, window_bounds = array<i64: 1, 128>}]} {
    %c0 = arith.constant 0 : index
    %c0_0 = arith.constant 0 : index
    %0 = vector.load %arg1[%c0, %c0_0] : memref<128x32xf32, #tpu.memory_space<vmem>>, vector<128x32xf32>
    %c0_1 = arith.constant 0 : index
    %c0_2 = arith.constant 0 : index
    %1 = vector.load %arg2[%c0_1, %c0_2] : memref<32x32xf32, #tpu.memory_space<vmem>>, vector<32x32xf32>
    %cst = arith.constant dense<0.000000e+00> : vector<128x32xf32>
    %2 = tpu.matmul %0, %1, %cst {dimension_numbers = #tpu.dot_dimension_numbers<[1], [0], [0], [1], [0, 0, 1, 1], [], []>} : vector<128x32xf32>, vector<32x32xf32>, vector<128x32xf32> -> vector<128x32xf32>
    %c0_3 = arith.constant 0 : index
    %c0_4 = arith.constant 0 : index
    %3 = vector.load %arg3[%c0_3, %c0_4] : memref<1x32xf32, #tpu.memory_space<vmem>>, vector<1x32xf32>
    %4 = vector.broadcast %3 : vector<1x32xf32> to vector<128x32xf32>
    %5 = arith.addf %2, %4 : vector<128x32xf32>
    %cst_5 = arith.constant 5.000000e-01 : f32
    %6 = vector.broadcast %cst_5 : f32 to vector<128x32xf32>
    %7 = arith.mulf %6, %5 : vector<128x32xf32>
    %cst_6 = arith.constant 0.707106769 : f32
    %8 = vector.broadcast %cst_6 : f32 to vector<128x32xf32>
    %9 = arith.mulf %5, %8 : vector<128x32xf32>
    %10 = math.erf %9 : vector<128x32xf32>
    %cst_7 = arith.constant 1.000000e+00 : f32
    %11 = vector.broadcast %cst_7 : f32 to vector<128x32xf32>
    %12 = arith.addf %11, %10 : vector<128x32xf32>
    %13 = arith.mulf %7, %12 : vector<128x32xf32>
    %c0_8 = arith.constant 0 : index
    %c0_9 = arith.constant 0 : index
    %14 = vector.load %arg4[%c0_8, %c0_9] : memref<32x16xf32, #tpu.memory_space<vmem>>, vector<32x16xf32>
    %cst_10 = arith.constant dense<0.000000e+00> : vector<128x16xf32>
    %15 = tpu.matmul %13, %14, %cst_10 {dimension_numbers = #tpu.dot_dimension_numbers<[1], [0], [0], [1], [0, 0, 1, 1], [], []>} : vector<128x32xf32>, vector<32x16xf32>, vector<128x16xf32> -> vector<128x16xf32>
    %c0_11 = arith.constant 0 : index
    %c0_12 = arith.constant 0 : index
    %16 = vector.load %arg5[%c0_11, %c0_12] : memref<1x16xf32, #tpu.memory_space<vmem>>, vector<1x16xf32>
    %17 = vector.broadcast %16 : vector<1x16xf32> to vector<128x16xf32>
    %18 = arith.addf %15, %17 : vector<128x16xf32>
    %cst_13 = arith.constant 5.000000e-01 : f32
    %19 = vector.broadcast %cst_13 : f32 to vector<128x16xf32>
    %20 = arith.mulf %19, %18 : vector<128x16xf32>
    %cst_14 = arith.constant 0.707106769 : f32
    %21 = vector.broadcast %cst_14 : f32 to vector<128x16xf32>
    %22 = arith.mulf %18, %21 : vector<128x16xf32>
    %23 = math.erf %22 : vector<128x16xf32>
    %cst_15 = arith.constant 1.000000e+00 : f32
    %24 = vector.broadcast %cst_15 : f32 to vector<128x16xf32>
    %25 = arith.addf %24, %23 : vector<128x16xf32>
    %26 = arith.mulf %20, %25 : vector<128x16xf32>
    %c0_16 = arith.constant 0 : index
    %c0_17 = arith.constant 0 : index
    %27 = vector.load %arg6[%c0_16, %c0_17] : memref<1x16xf32, #tpu.memory_space<vmem>>, vector<1x16xf32>
    %28 = vector.broadcast %27 : vector<1x16xf32> to vector<128x16xf32>
    %29 = arith.mulf %26, %28 : vector<128x16xf32>
    %cst_18 = arith.constant dense<0.000000e+00> : vector<128xf32>
    %30 = vector.multi_reduction <add>, %29, %cst_18 [1] : vector<128x16xf32> to vector<128xf32>
    %31 = vector.shape_cast %30 : vector<128xf32> to vector<1x128xf32>
    %c0_19 = arith.constant 0 : index
    %c0_20 = arith.constant 0 : index
    %32 = vector.load %arg7[%c0_19, %c0_20] : memref<1x1xf32, #tpu.memory_space<vmem>>, vector<1x1xf32>
    %33 = vector.broadcast %32 : vector<1x1xf32> to vector<1x128xf32>
    %34 = arith.addf %31, %33 : vector<1x128xf32>
    %c0_21 = arith.constant 0 : index
    %c0_22 = arith.constant 0 : index
    %35 = vector.load %arg8[%c0_21, %c0_22] : memref<1x128xf32, #tpu.memory_space<vmem>>, vector<1x128xf32>
    tpu.vector_store %arg8[%c0_21, %c0_22], %34 {strides = array<i32>} : memref<1x128xf32, #tpu.memory_space<vmem>>, vector<1x128xf32>,
    return
  }
  func.func @transform_0(%arg0: i32) -> (i32, i32) {
    %c0_i32 = arith.constant 0 : i32
    %c0_i32_0 = arith.constant 0 : i32
    return %arg0, %c0_i32 : i32, i32
  }
  func.func @transform_1(%arg0: i32) -> (i32, i32) {
    %c0_i32 = arith.constant 0 : i32
    %c0_i32_0 = arith.constant 0 : i32
    %c0_i32_1 = arith.constant 0 : i32
    return %c0_i32, %c0_i32_0 : i32, i32
  }
  func.func @transform_2(%arg0: i32) -> (i32, i32) {
    %c0_i32 = arith.constant 0 : i32
    %c0_i32_0 = arith.constant 0 : i32
    %c0_i32_1 = arith.constant 0 : i32
    return %c0_i32, %c0_i32_0 : i32, i32
  }
  func.func @transform_3(%arg0: i32) -> (i32, i32) {
    %c0_i32 = arith.constant 0 : i32
    %c0_i32_0 = arith.constant 0 : i32
    %c0_i32_1 = arith.constant 0 : i32
    return %c0_i32, %c0_i32_0 : i32, i32
  }
  func.func @transform_4(%arg0: i32) -> (i32, i32) {
    %c0_i32 = arith.constant 0 : i32
    %c0_i32_0 = arith.constant 0 : i32
    %c0_i32_1 = arith.constant 0 : i32
    return %c0_i32, %c0_i32_0 : i32, i32
  }
  func.func @transform_5(%arg0: i32) -> (i32, i32) {
    %c0_i32 = arith.constant 0 : i32
    %c0_i32_0 = arith.constant 0 : i32
    %c0_i32_1 = arith.constant 0 : i32
    return %c0_i32, %c0_i32_0 : i32, i32
  }
  func.func @transform_6(%arg0: i32) -> (i32, i32) {
    %c0_i32 = arith.constant 0 : i32
    %c0_i32_0 = arith.constant 0 : i32
    %c0_i32_1 = arith.constant 0 : i32
    return %c0_i32, %c0_i32_0 : i32, i32
  }
  func.func @transform_7(%arg0: i32) -> (i32, i32) {
    %c0_i32 = arith.constant 0 : i32
    %c0_i32_0 = arith.constant 0 : i32
    return %c0_i32, %arg0 : i32, i32
  }
}

</mosaic_0001>

<bundles_post_ra>
// kernel: tpu_custom_call.1
= control target key start
LH: loop header
LB: loop body
LE: loop exit
PB: predicated region body
PF: predicated region fallthrough
CT: control target
= control target key end

     0   :  { %s4494_s0 = inlined_call_operand.vmem [shape: f32[256,32], index: 0, kind: input, shape index: {}]   ;;  %s4495_s1 = inlined_call_operand.vmem [shape: f32[32,32], index: 1, kind: input, shape index: {}]   ;;  %s4496_s2 = inlined_call_operand.vmem [shape: f32[1,32], index: 2, kind: input, shape index: {}]   ;;  %s4497_s3 = inlined_call_operand.vmem [shape: f32[32,16], index: 3, kind: input, shape index: {}]   ;;  %s4498_s4 = inlined_call_operand.vmem [shape: f32[1,16], index: 4, kind: input, shape index: {}]   ;;  %s4499_s5 = inlined_call_operand.vmem [shape: f32[1,16], index: 5, kind: input, shape index: {}]   ;;  %s4500_s6 = inlined_call_operand.<no memory space> [shape: f32[1,1], index: 6, kind: input, shape index: {}]   ;;  %s4501_s7 = inlined_call_operand.hbm [shape: f32[1,256], index: 7, kind: output, shape index: {}]  }
   0x1   :  { %v12_v0 = vstv %s4500_s6 }
   0x2   :  { %13 = vst [vmem:[#allocation2] sm:$0x1] %v12_v0 }
   0x3   :  { %14 = vsyncpa [#allocation4], 0 }
   0x4   :  { %16 = vsyncpa [#allocation4 + $0x1], 0  ;;  %s2486_s26 = smov 0   ;;  %s2488_s27 = smov 0  }
   0x5   :  { %s2490_s28 = smov 0   ;;  %s2492_s29 = smov 0  }
   0x6 LB: > { %s2507_s6 = sadd.s32 4294967295, %s2440_s29   ;;  %s2188_s30 = sadd.s32 4294967294, %s2440_s29   ;;  %s2440_s29 = sphi %s2492_s29, %s4611_s29   ;;  %s2436_s28 = sphi %s2490_s28, %s4610_s28   ;;  %s2432_s27 = sphi %s2488_s27, %s4609_s27   ;;  %s2428_s26 = sphi %s2486_s26, %s4608_s26  }
   0x7   : > { %s2511_s8 = sadd.s32 1, %s2440_s29   ;;  %s181_s9 = sadd.s32 1, %s2436_s28 }
   0x8   : > { %s178_s10 = ssub.s32 %s2440_s29, %s2511_s8  ;;  %p191_p0 = scmp.ne.s32.totalorder %s2436_s28, %s2432_s27 }
   0x9   : > { %p179_p1 = scmp.eq.s32.totalorder %s178_s10, 0  ;;  %p192_p2 = scmp.eq.s32.totalorder %s2507_s6, 1 }
   0xa   : > { %p197_p3 = scmp.ne.s32.totalorder %s2432_s27, %s2428_s26  ;;  %p198_p4 = scmp.eq.s32.totalorder %s2188_s30, 1 }
   0xb   : > { %s2522_s11 = scalar_select %p179_p1, %s2436_s28, %s181_s9  }
   0xc   : > { %p2524_p5 = por %p192_p2, %p191_p0  ;;  %p2528_p6 = por %p198_p4, %p197_p3 }
   0xd   : > { %p2191_p7 = scmp.ge.s32.totalorder %s2440_s29, 1  ;;  %p243_p8 = scmp.lt.s32.totalorder %s2440_s29, 3 }
   0xf   : > { %p244_p9 = pnand %p2191_p7, %p243_p8 }
  0x10   : > { %s2192_s18 = sshll.u32 (!%p244_p9), %s2507_s6, 4  ;;  %s272_s15 = sand.u32 (!%p244_p9), 1, %s2432_s27  }
  0x11   : > { %247 = sbr.rel (%p244_p9) target bundleno = 749 (0x2ed), region = 48  ;;  %p275_p10 = scmp.lt.s32.totalorder (!%p244_p9), %s2192_s18, 31 }
  0x12   : > { %s273_s19 = scalar_lea.vmem (!%p244_p9), [#allocation3], %s272_s15  ;;  %s2121_s21 = scalar_lea.sflag (!%p244_p9), [#allocation4], %s272_s15 }
  0x13   : > { %s2131_s20 = sshll.u32 (!%p244_p9), %s273_s19, 4  ;;  %s2132_s20 = int_to_ptr.vmem [resolvable:$true] %s2131_s20 }
  0x16   : > { %v299_v1 = vld [vmem:[%s4495_s1 + $0x18] sm:$0xff]  ;;  %v298_v2 = vld [vmem:[%s4495_s1 + $0x10] sm:$0xff]  ;;  %v297_v3 = vld [vmem:[%s4495_s1 + $0x8] sm:$0xff]  ;;  %s4613_s18 = smov (!%p275_p10, %s2192_s18), 31  ;;  %vm304_vm0 = vcmask 261120  }
  0x17   : > { %365 = vmatpush.msra.mxu0 %v299_v1  ;;  %2260 = vmatpush.msra.mxu2 %v299_v1  ;;  %v296_v4 = vld [vmem:[%s4495_s1] sm:$0xff]  ;;  %s2193_s23 = sshll.u32 %s4613_s18, 3  ;;  %s2129_s18 = scalar_lea.hbm %s4501_s7, %s2507_s6 }
  0x18   : > { %s2550_s30 = scalar_lea.vmem %s4494_s0, %s2193_s23  ;;  %v2587_v21 = vld [vmem:[%s4496_s2] ss:$0 sm:$0xff]  ;;  %s2133_s6 = sshll.u32 %s2129_s18, 4  ;;  %s2134_s6 = int_to_ptr.hbm [resolvable:$true] %s2133_s6 }
  0x19   : > { %366 = vmatpush.msra.mxu0 %v298_v2  ;;  %2261 = vmatpush.msra.mxu2 %v298_v2  ;;  %v280_v5 = vld [vmem:[%s2550_s30] sm:$0xff]  ;;  %v281_v7 = vld [vmem:[%s2550_s30 + $0x8] sm:$0xff]  ;;  %v282_v9 = vld [vmem:[%s2550_s30 + $0x10] sm:$0xff]  ;;  %s2392_s22 = sshra.s32 %s2134_s6, 4  ;;  %s2393_s22 = int_to_ptr.hbm [resolvable:$true] %s2392_s22 }
  0x1a   : > { %v288_v6 = vld [vmem:[%s2550_s30 + $0x40] sm:$0xff]  ;;  %v289_v8 = vld [vmem:[%s2550_s30 + $0x48] sm:$0xff]  ;;  %v290_v10 = vld [vmem:[%s2550_s30 + $0x50] sm:$0xff]  ;;  %s2394_s23 = scalar_lea.hbm %s2393_s22, 1  ;;  %p2399_p0 = scmp.lt.s32.totalorder %s2393_s22, %s4501_s7 }
  0x1b   : > { %367 = vmatpush.msra.mxu0 %v297_v3  ;;  %2262 = vmatpush.msra.mxu2 %v297_v3  ;;  %v283_v11 = vld [vmem:[%s2550_s30 + $0x18] sm:$0xff]  ;;  %v284_v13 = vld [vmem:[%s2550_s30 + $0x20] sm:$0xff]  ;;  %v285_v15 = vld [vmem:[%s2550_s30 + $0x28] sm:$0xff]  ;;  %p2395_p11 = scmp.ne.s32.totalorder %s2393_s22, %s2394_s23 }
  0x1c   : > { %v291_v12 = vld [vmem:[%s2550_s30 + $0x58] sm:$0xff]  ;;  %v292_v14 = vld [vmem:[%s2550_s30 + $0x60] sm:$0xff]  ;;  %v293_v16 = vld [vmem:[%s2550_s30 + $0x68] sm:$0xff] }
  0x1d   : > { %368 = vmatpush.msra.mxu0 %v296_v4  ;;  %2263 = vmatpush.msra.mxu2 %v296_v4  ;;  %v286_v17 = vld [vmem:[%s2550_s30 + $0x30] sm:$0xff]  ;;  %v287_v19 = vld [vmem:[%s2550_s30 + $0x38] sm:$0xff]  ;;  %p2396_p12 = pnand %p2395_p11, %p2524_p5 }
  0x1e   : > { %2194 = vmatmul.msk.f32.vlgmr.msra.gmra.mxu0 %vm304_vm0, %v280_v5  ;;  %2202 = vmatmul.msk.f32.vlgmr.msra.gmra.mxu2 %vm304_vm0, %v288_v6  ;;  %v294_v18 = vld [vmem:[%s2550_s30 + $0x70] sm:$0xff]  ;;  %v295_v20 = vld [vmem:[%s2550_s30 + $0x78] sm:$0xff]  ;;  %s2398_s30 = scalar_lea.hbm %s4501_s7, 2 }
  0x1f   : > { %p2397_p13 = pneg %p2396_p12  ;;  %p2400_p1 = scmp.lt.s32.totalorder %s2398_s30, %s2394_s23 }
  0x21   : > { %p2401_p2 = por %p2400_p1, %p2399_p0 }
  0x23   : > { %p2402_p3 = pnand %p2401_p2, %p2397_p13 }
  0x26   : > { %2195 = vmatmul.msk.f32.gmra.mxu0 %vm304_vm0, %v281_v7  ;;  %2203 = vmatmul.msk.f32.gmra.mxu2 %vm304_vm0, %v289_v8 }
  0x2e   : > { %2196 = vmatmul.msk.f32.gmra.mxu0 %vm304_vm0, %v282_v9  ;;  %2204 = vmatmul.msk.f32.gmra.mxu2 %vm304_vm0, %v290_v10 }
  0x36   : > { %2197 = vmatmul.msk.f32.gmra.mxu0 %vm304_vm0, %v283_v11  ;;  %2205 = vmatmul.msk.f32.gmra.mxu2 %vm304_vm0, %v291_v12 }
  0x3e   : > { %2198 = vmatmul.msk.f32.gmra.mxu0 %vm304_vm0, %v284_v13  ;;  %2206 = vmatmul.msk.f32.gmra.mxu2 %vm304_vm0, %v292_v14 }
  0x46   : > { %2199 = vmatmul.msk.f32.gmra.mxu0 %vm304_vm0, %v285_v15  ;;  %2207 = vmatmul.msk.f32.gmra.mxu2 %vm304_vm0, %v293_v16 }
  0x4e   : > { %2200 = vmatmul.msk.f32.gmra.mxu0 %vm304_vm0, %v286_v17  ;;  %2208 = vmatmul.msk.f32.gmra.mxu2 %vm304_vm0, %v294_v18 }
  0x56   : > { %2201 = vmatmul.msk.f32.gmra.mxu0 %vm304_vm0, %v287_v19  ;;  %2209 = vmatmul.msk.f32.gmra.mxu2 %vm304_vm0, %v295_v20 }
  0x9b   : > { %v370_v22 = vpop.f32.mrf.mxu0 }
  0x9c   : > { %v2590_v23 = vadd.f32 %v2587_v21, %v370_v22 }
  0x9e   : > { %v2593_v24 = vmul.f32 0.70710677, %v2590_v23 }
  0xa0   : > { %v450_v25 = vmul.f32 %v2593_v24, %v2593_v24 }
  0xa1   : > { %v394_v26 = vpop.f32.mrf.mxu2 }
  0xa2   : > { %v2597_v27 = vmin.f32 %v450_v25, 16.0  ;;  %v2600_v28 = vadd.f32 %v2587_v21, %v394_v26 }
  0xa3   : > { %v373_v29 = vpop.f32.mrf.mxu0 }
  0xa4   : > { %v463_v30 = vmul.f32 3.8918573e-05, %v2597_v27  ;;  %v2604_v31 = vadd.f32 %v2587_v21, %v373_v29  ;;  %v2607_v32 = vmul.f32 0.70710677, %v2600_v28  ;;  %v452_v33 = vmul.f32 2.1237322e-06, %v2597_v27 }
  0xa6   : > { %v464_v34 = vadd.f32 0.001143296, %v463_v30  ;;  %v770_v35 = vmul.f32 %v2607_v32, %v2607_v32  ;;  %v2613_v36 = vmul.f32 0.70710677, %v2604_v31  ;;  %v453_v41 = vadd.f32 0.00028619796, %v452_v33 }
  0xa8   : > { %v465_v37 = vmul.f32 %v464_v34, %v2597_v27  ;;  %v2616_v38 = vmin.f32 %v770_v35, 16.0  ;;  %v490_v39 = vmul.f32 %v2613_v36, %v2613_v36  ;;  %v454_v50 = vmul.f32 %v453_v41, %v2597_v27 }
  0xa9   : > { %v397_v40 = vpop.f32.mrf.mxu2 }
  0xaa   : > { %v466_v42 = vadd.f32 0.014752088, %v465_v37  ;;  %v2621_v43 = vadd.f32 %v2587_v21, %v397_v40  ;;  %v772_v44 = vmul.f32 2.1237322e-06, %v2616_v38  ;;  %v783_v45 = vmul.f32 3.8918573e-05, %v2616_v38 }
  0xab   : > { %v2625_v46 = vmin.f32 %v490_v39, 16.0  ;;  %v455_v61 = vadd.f32 0.0036580483, %v454_v50  ;;  %v376_v63 = vpop.f32.mrf.mxu0 }
  0xac   : > { %v467_v47 = vmul.f32 %v466_v42, %v2597_v27  ;;  %v2629_v48 = vmul.f32 0.70710677, %v2621_v43  ;;  %v784_v49 = vadd.f32 0.001143296, %v783_v45  ;;  %v773_v54 = vadd.f32 0.00028619796, %v772_v44 }
  0xad   : > { %v503_v52 = vmul.f32 3.8918573e-05, %v2625_v46  ;;  %v492_v57 = vmul.f32 2.1237322e-06, %v2625_v46  ;;  %v2645_v8 = vadd.f32 %v2587_v21, %v376_v63  ;;  %v456_v9 = vmul.f32 %v455_v61, %v2597_v27 }
  0xae   : > { %v468_v51 = vadd.f32 0.112945676, %v467_v47  ;;  %v810_v53 = vmul.f32 %v2629_v48, %v2629_v48  ;;  %v785_v55 = vmul.f32 %v784_v49, %v2616_v38  ;;  %v774_v0 = vmul.f32 %v773_v54, %v2616_v38 }
  0xaf   : > { %v504_v58 = vadd.f32 0.001143296, %v503_v52  ;;  %v493_v4 = vadd.f32 0.00028619796, %v492_v57  ;;  %v2654_v16 = vmul.f32 0.70710677, %v2645_v8 }
  0xb0   : > { %v469_v56 = vmul.f32 %v468_v51, %v2597_v27  ;;  %v2638_v59 = vmin.f32 %v810_v53, 16.0  ;;  %v786_v60 = vadd.f32 0.014752088, %v785_v55  ;;  %v775_v11 = vadd.f32 0.0036580483, %v774_v0 }
  0xb1   : > { %v505_v62 = vmul.f32 %v504_v58, %v2625_v46  ;;  %v494_v13 = vmul.f32 %v493_v4, %v2625_v46  ;;  %v457_v17 = vadd.f32 0.05243302, %v456_v9  ;;  %v530_v33 = vmul.f32 %v2654_v16, %v2654_v16  ;;  %v400_v39 = vpop.f32.mrf.mxu2 }
  0xb2   : > { %v787_v1 = vmul.f32 %v786_v60, %v2616_v38  ;;  %v823_v2 = vmul.f32 3.8918573e-05, %v2638_v59  ;;  %v470_v3 = vadd.f32 0.4994258, %v469_v56  ;;  %v776_v19 = vmul.f32 %v775_v11, %v2616_v38 }
  0xb3   : > { %v506_v5 = vadd.f32 0.014752088, %v505_v62  ;;  %v812_v20 = vmul.f32 2.1237322e-06, %v2638_v59  ;;  %v495_v25 = vadd.f32 0.0036580483, %v494_v13  ;;  %v458_v34 = vmul.f32 %v457_v17, %v2597_v27  ;;  %v379_v13 = vpop.f32.mrf.mxu0 }
  0xb4   : > { %v788_v6 = vadd.f32 0.112945676, %v787_v1  ;;  %v824_v7 = vadd.f32 0.001143296, %v823_v2  ;;  %v471_v12 = vmul.f32 %v470_v3, %v2597_v27  ;;  %v777_v35 = vadd.f32 0.05243302, %v776_v19 }
  0xb5   : > { %v507_v10 = vmul.f32 %v506_v5, %v2625_v46  ;;  %v496_v40 = vmul.f32 %v495_v25, %v2625_v46  ;;  %v813_v41 = vadd.f32 0.00028619796, %v812_v20  ;;  %v2668_v45 = vmin.f32 %v530_v33, 16.0 }
  0xb6   : > { %v825_v14 = vmul.f32 %v824_v7, %v2638_v59  ;;  %v789_v15 = vmul.f32 %v788_v6, %v2616_v38  ;;  %v2658_v22 = vadd.f32 1.0, %v471_v12  ;;  %v459_v47 = vadd.f32 0.18741608, %v458_v34 }
  0xb7   : > { %v508_v18 = vadd.f32 0.112945676, %v507_v10  ;;  %v2671_v49 = vadd.f32 %v2587_v21, %v400_v39  ;;  %v778_v50 = vmul.f32 %v777_v35, %v2616_v38  ;;  %v497_v52 = vadd.f32 0.05243302, %v496_v40 }
  0xb8   : > { %v826_v26 = vadd.f32 0.014752088, %v825_v14  ;;  %v790_v29 = vadd.f32 0.4994258, %v789_v15  ;;  %2312 = vrcp.f32 %v2658_v22  ;;  %v814_v53 = vmul.f32 %v813_v41, %v2638_v59 }
  0xb9   : > { %v509_v30 = vmul.f32 %v508_v18, %v2625_v46  ;;  %v543_v56 = vmul.f32 3.8918573e-05, %v2668_v45  ;;  %v460_v58 = vmul.f32 %v459_v47, %v2597_v27  ;;  %v532_v60 = vmul.f32 2.1237322e-06, %v2668_v45  ;;  %v403_v18 = vpop.f32.mrf.mxu2 }
  0xba   : > { %v827_v37 = vmul.f32 %v826_v26, %v2638_v59  ;;  %v791_v42 = vmul.f32 %v790_v29, %v2616_v38  ;;  %v2684_v61 = vmul.f32 0.70710677, %v2671_v49  ;;  %v779_v62 = vadd.f32 0.18741608, %v778_v50 }
  0xbb   : > { %v510_v44 = vadd.f32 0.4994258, %v509_v30  ;;  %v2688_v0 = vmul.f32 0.5, %v2590_v23  ;;  %v498_v1 = vmul.f32 %v497_v52, %v2625_v46  ;;  %v815_v2 = vadd.f32 0.0036580483, %v814_v53 }
  0xbc   : > { %v828_v51 = vadd.f32 0.112945676, %v827_v37  ;;  %v2675_v54 = vadd.f32 1.0, %v791_v42  ;;  %v544_v4 = vadd.f32 0.001143296, %v543_v56  ;;  %v2697_v6 = vmul.f32 0.5, %v2600_v28 }
  0xbd   : > { %v511_v55 = vmul.f32 %v510_v44, %v2625_v46  ;;  %v461_v5 = vadd.f32 1.1283791, %v460_v58  ;;  %v533_v7 = vadd.f32 0.00028619796, %v532_v60  ;;  %v850_v23 = vmul.f32 %v2684_v61, %v2684_v61 }
  0xbe   : > { %v2679_v57 = vpop.eup %2312  ;;  %v829_v63 = vmul.f32 %v828_v51, %v2638_v59  ;;  %2314 = vrcp.f32 %v2675_v54  ;;  %v780_v9 = vmul.f32 %v779_v62, %v2616_v38  ;;  %v2703_v10 = vmul.f32 0.5, %v2604_v31 }
  0xbf   : > { %v474_v3 = vmul.f32 %v2679_v57, %v2658_v22  ;;  %v2694_v27 = vadd.f32 1.0, %v511_v55  ;;  %v545_v12 = vmul.f32 %v544_v4, %v2668_v45  ;;  %v484_v14 = vand.u32 2147483648, %v2658_v22 }
  0xc0   : > { %v830_v11 = vadd.f32 0.4994258, %v829_v63  ;;  %v499_v15 = vadd.f32 0.18741608, %v498_v1  ;;  %v2708_v17 = vmul.f32 0.5, %v2621_v43  ;;  %v816_v28 = vmul.f32 %v815_v2, %v2638_v59 }
  0xc1   : > { %v475_v19 = vsub.f32 1.0, %v474_v3  ;;  %2316 = vrcp.f32 %v2694_v27  ;;  %v2713_v38 = vmul.f32 0.5, %v2645_v8  ;;  %v2715_v31 = vmin.f32 %v850_v23, 16.0 }
  0xc2   : > { %v2718_v20 = vmul.f32 %v461_v5, %v2593_v24  ;;  %v534_v25 = vmul.f32 %v533_v7, %v2668_v45  ;;  %v546_v26 = vadd.f32 0.014752088, %v545_v12  ;;  %v2722_v43 = vadd.f32 %v2587_v21, %v379_v13 }
  0xc3   : > { %v482_v30 = vand.u32 2147483647, %v2658_v22  ;;  %v781_v33 = vadd.f32 1.1283791, %v780_v9  ;;  %v831_v34 = vmul.f32 %v830_v11, %v2638_v59  ;;  %v2729_v8 = vadd.f32 %v2587_v21, %v403_v18 }
  0xc4   : > { %v2724_v29 = vpop.eup %2314  ;;  %v2731_v35 = vor.u32 1.1754944e-38, %v484_v14  ;;  %v500_v24 = vmul.f32 %v499_v15, %v2625_v46  ;;  %v817_v37 = vadd.f32 0.05243302, %v816_v28  ;;  %v547_v39 = vmul.f32 %v546_v26, %v2668_v45  ;;  %v382_v14 = vpop.f32.mrf.mxu0 }
  0xc5   : > { %v476_v40 = vmul.f32 %v2679_v57, %v475_v19  ;;  %vm478_vm1 = vweird.f32 %v2658_v22  ;;  %vm479_vm2 = vweird.f32 %v2679_v57  ;;  %v804_v41 = vand.u32 2147483648, %v2675_v54 }
  0xc6   : > { %v863_v42 = vmul.f32 3.8918573e-05, %v2715_v31  ;;  %v794_v44 = vmul.f32 %v2724_v29, %v2675_v54  ;;  %v535_v47 = vadd.f32 0.0036580483, %v534_v25  ;;  %v548_v50 = vadd.f32 0.112945676, %v547_v39  ;;  %vm2791_vm4 = vmor %vm478_vm1, %vm479_vm2 }
  0xc7   : > { %v2743_v46 = vmul.f32 0.70710677, %v2722_v43  ;;  %v2745_v51 = vpop.eup %2316  ;;  %v2748_v52 = vmul.f32 %v781_v33, %v2607_v32  ;;  %v2750_v53 = vadd.f32 1.0, %v831_v34  ;;  %v2753_v56 = vmul.f32 0.70710677, %v2729_v8 }
  0xc8   : > { %v864_v55 = vadd.f32 0.001143296, %v863_v42  ;;  %v802_v58 = vand.u32 2147483647, %v2675_v54  ;;  %v501_v60 = vadd.f32 1.1283791, %v500_v24  ;;  %v818_v62 = vmul.f32 %v817_v37, %v2638_v59 }
  0xc9   : > { %v852_v63 = vmul.f32 2.1237322e-06, %v2715_v31  ;;  %v477_v1 = vadd.f32 %v2679_v57, %v476_v40  ;;  %vm2759_vm3 = vcmp.eq.f32.partialorder %v482_v30, 8.507059e+37  ;;  %v2763_v32 = vor.u32 1.1754944e-38, %v804_v41 }
  0xca   : > { %v549_v3 = vmul.f32 %v548_v50, %v2668_v45  ;;  %v865_v4 = vmul.f32 %v864_v55, %v2715_v31  ;;  %v795_v5 = vsub.f32 1.0, %v794_v44  ;;  %v514_v7 = vmul.f32 %v2745_v51, %v2694_v27 }
  0xcb   : > { %v536_v23 = vmul.f32 %v535_v47, %v2668_v45  ;;  %v570_v9 = vmul.f32 %v2743_v46, %v2743_v46  ;;  %2318 = vrcp.f32 %v2750_v53  ;;  %v890_v13 = vmul.f32 %v2753_v56, %v2753_v56 }
  0xcc   : > { %v550_v11 = vadd.f32 0.4994258, %v549_v3  ;;  %v866_v12 = vadd.f32 0.014752088, %v865_v4  ;;  %v2776_v15 = vmul.f32 %v501_v60, %v2613_v36  ;;  %v819_v28 = vadd.f32 0.18741608, %v818_v62 }
  0xcd   : > { %v853_v18 = vadd.f32 0.00028619796, %v852_v63  ;;  %v2778_v19 = vmin.f32 %v570_v9, 16.0  ;;  %v522_v25 = vand.u32 2147483647, %v2694_v27  ;;  %v2782_v26 = vmul.f32 0.5, %v2671_v49 }
  0xce   : > { %v867_v30 = vmul.f32 %v866_v12, %v2715_v31  ;;  %v2785_v33 = vmin.f32 %v890_v13, 16.0  ;;  %vm798_vm5 = vweird.f32 %v2675_v54  ;;  %v551_v34 = vmul.f32 %v550_v11, %v2668_v45 }
  0xcf   : > { %v572_v24 = vmul.f32 2.1237322e-06, %v2778_v19  ;;  %v583_v49 = vmul.f32 3.8918573e-05, %v2778_v19  ;;  %v2800_v37 = vadd.f32 %v2587_v21, %v382_v14  ;;  %v481_v39 = vsel %vm2791_vm4, %v2679_v57, %v477_v1 }
  0xd0   : > { %v796_v22 = vmul.f32 %v2724_v29, %v795_v5  ;;  %v515_v40 = vsub.f32 1.0, %v514_v7  ;;  %v537_v41 = vadd.f32 0.05243302, %v536_v23  ;;  %v854_v42 = vmul.f32 %v853_v18, %v2715_v31  ;;  %v1125_v18 = vld [vmem:[%s4497_s3 + $0x18] sm:$0xff] }
  0xd1   : > { %v573_v44 = vadd.f32 0.00028619796, %v572_v24  ;;  %v584_v47 = vadd.f32 0.001143296, %v583_v49  ;;  %v903_v50 = vmul.f32 3.8918573e-05, %v2785_v33  ;;  %v2808_v55 = vpop.eup %2318  ;;  %vm799_vm6 = vweird.f32 %v2724_v29  ;;  %1190 = vmatpush.msra.mxu1 %v1125_v18  ;;  %2264 = vmatpush.msra.mxu3 %v1125_v18  ;;  %v406_v18 = vpop.f32.mrf.mxu2 }
  0xd2   : > { %v524_v60 = vand.u32 2147483648, %v2694_v27  ;;  %v868_v62 = vadd.f32 0.112945676, %v867_v30  ;;  %v892_v63 = vmul.f32 2.1237322e-06, %v2785_v33  ;;  %v486_v57 = vsel %vm2759_vm3, %v2731_v35, %v481_v39  ;;  %vm2850_vm10 = vmor %vm798_vm5, %vm799_vm6  ;;  %v1124_v30 = vld [vmem:[%s4497_s3 + $0x10] sm:$0xff] }
  0xd3   : > { %vm2816_vm7 = vcmp.eq.f32.partialorder %v802_v58, 8.507059e+37  ;;  %vm518_vm8 = vweird.f32 %v2694_v27  ;;  %v820_v3 = vmul.f32 %v819_v28, %v2638_v59  ;;  %v2822_v4 = vadd.f32 1.0, %v551_v34  ;;  %1191 = vmatpush.msra.mxu1 %v1124_v30  ;;  %2265 = vmatpush.msra.mxu3 %v1124_v30 }
  0xd4   : > { %v2825_v5 = vmul.f32 0.70710677, %v2800_v37  ;;  %v797_v7 = vadd.f32 %v2724_v29, %v796_v22  ;;  %v538_v23 = vmul.f32 %v537_v41, %v2668_v45  ;;  %v574_v2 = vmul.f32 %v573_v44, %v2778_v19 }
  0xd5   : > { %v585_v35 = vmul.f32 %v584_v47, %v2778_v19  ;;  %v516_v58 = vmul.f32 %v2745_v51, %v515_v40  ;;  %v834_v9 = vmul.f32 %v2808_v55, %v2750_v53  ;;  %v855_v11 = vadd.f32 0.0036580483, %v854_v42 }
  0xd6   : > { %v904_v59 = vadd.f32 0.001143296, %v903_v50  ;;  %v525_v12 = vor.u32 1.1754944e-38, %v524_v60  ;;  %v869_v13 = vmul.f32 %v868_v62, %v2715_v31  ;;  %v893_v28 = vadd.f32 0.00028619796, %v892_v63 }
  0xd7   : > { %v586_v14 = vadd.f32 0.014752088, %v585_v35  ;;  %vm2838_vm9 = vcmp.eq.f32.partialorder %v522_v25, 8.507059e+37  ;;  %v821_v36 = vadd.f32 1.1283791, %v820_v3  ;;  %2320 = vrcp.f32 %v2822_v4 }
  0xd8   : > { %v905_v34 = vmul.f32 %v904_v59, %v2785_v33  ;;  %v610_v24 = vmul.f32 %v2825_v5, %v2825_v5  ;;  %vm519_vm11 = vweird.f32 %v2745_v51  ;;  %v844_v25 = vand.u32 2147483648, %v2750_v53 }
  0xd9   : > { %v575_v39 = vadd.f32 0.0036580483, %v574_v2  ;;  %v587_v22 = vmul.f32 %v586_v14, %v2778_v19  ;;  %v801_v40 = vsel %vm2850_vm10, %v2724_v29, %v797_v7  ;;  %v517_v41 = vadd.f32 %v2745_v51, %v516_v58  ;;  %vm2876_vm12 = vmor %vm518_vm8, %vm519_vm11 }
  0xda   : > { %v835_v42 = vsub.f32 1.0, %v834_v9  ;;  %v539_v44 = vadd.f32 0.18741608, %v538_v23  ;;  %v856_v54 = vmul.f32 %v855_v11, %v2715_v31  ;;  %v870_v47 = vadd.f32 0.4994258, %v869_v13 }
  0xdb   : > { %v894_v50 = vmul.f32 %v893_v28, %v2785_v33  ;;  %v906_v60 = vadd.f32 0.014752088, %v905_v34  ;;  %v2864_v62 = vmul.f32 %v486_v57, %v2718_v20  ;;  %v842_v63 = vand.u32 2147483647, %v2750_v53 }
  0xdc   : > { %v588_v3 = vadd.f32 0.112945676, %v587_v22  ;;  %v2867_v2 = vmin.f32 %v610_v24, 16.0  ;;  %v806_v29 = vsel %vm2816_vm7, %v2763_v32, %v801_v40  ;;  %v2881_v20 = vmul.f32 %v821_v36, %v2629_v48 }
  0xdd   : > { %vm838_vm13 = vweird.f32 %v2750_v53  ;;  %v576_v57 = vmul.f32 %v575_v39, %v2778_v19  ;;  %v2885_v23 = vpop.eup %2320  ;;  %v521_v32 = vsel %vm2876_vm12, %v2745_v51, %v517_v41  ;;  %v836_v1 = vmul.f32 %v2808_v55, %v835_v42 }
  0xde   : > { %v845_v27 = vor.u32 1.1754944e-38, %v844_v25  ;;  %v907_v35 = vmul.f32 %v906_v60, %v2785_v33  ;;  %v540_v58 = vmul.f32 %v539_v44, %v2668_v45  ;;  %v857_v9 = vadd.f32 0.05243302, %v856_v54 }
  0xdf   : > { %v871_v48 = vmul.f32 %v870_v47, %v2715_v31  ;;  %v895_v11 = vadd.f32 0.0036580483, %v894_v50  ;;  %v2895_v59 = vmul.f32 %v806_v29, %v2748_v52  ;;  %vm2897_vm14 = vcmp.eq.f32.partialorder %v842_v63, 8.507059e+37  ;;  %v1123_v63 = vld [vmem:[%s4497_s3 + $0x8] sm:$0xff] }
  0xe0   : > { %v589_v51 = vmul.f32 %v588_v3, %v2778_v19  ;;  %v908_v14 = vadd.f32 0.112945676, %v907_v35  ;;  %v623_v28 = vmul.f32 3.8918573e-05, %v2867_v2  ;;  %v526_v45 = vsel %vm2838_vm9, %v525_v12, %v521_v32  ;;  %1192 = vmatpush.msra.mxu1 %v1123_v63  ;;  %2266 = vmatpush.msra.mxu3 %v1123_v63 }
  0xe1   : > { %vm839_vm15 = vweird.f32 %v2808_v55  ;;  %v554_v36 = vmul.f32 %v2885_v23, %v2822_v4  ;;  %v577_v52 = vadd.f32 0.05243302, %v576_v57  ;;  %v837_v34 = vadd.f32 %v2808_v55, %v836_v1  ;;  %v1122_v1 = vld [vmem:[%s4497_s3] sm:$0xff] }
  0xe2   : > { %v909_v24 = vmul.f32 %v908_v14, %v2785_v33  ;;  %v612_v49 = vmul.f32 2.1237322e-06, %v2867_v2  ;;  %v624_v25 = vadd.f32 0.001143296, %v623_v28  ;;  %v541_v39 = vadd.f32 1.1283791, %v540_v58  ;;  %vm2934_vm1 = vmor %vm838_vm13, %vm839_vm15  ;;  %1193 = vmatpush.msra.mxu1 %v1122_v1  ;;  %2267 = vmatpush.msra.mxu3 %v1122_v1 }
  0xe3   : > { %v858_v22 = vmul.f32 %v857_v9, %v2715_v31  ;;  %v2912_v40 = vadd.f32 1.0, %v871_v48  ;;  %v896_v12 = vmul.f32 %v895_v11, %v2785_v33  ;;  %v2919_v41 = vmul.f32 0.5, %v2722_v43  ;;  %v385_v48 = vpop.f32.mrf.mxu0 }
  0xe4   : > { %v590_v42 = vadd.f32 0.4994258, %v589_v51  ;;  %v2922_v44 = vmul.f32 0.5, %v2729_v8  ;;  %v2925_v54 = vadd.f32 %v2587_v21, %v406_v18  ;;  %v2928_v47 = vmul.f32 %v526_v45, %v2776_v15 }
  0xe5   : > { %v555_v43 = vsub.f32 1.0, %v554_v36  ;;  %v578_v8 = vmul.f32 %v577_v52, %v2778_v19  ;;  %v625_v60 = vmul.f32 %v624_v25, %v2867_v2  ;;  %v841_v15 = vsel %vm2934_vm1, %v2808_v55, %v837_v34  ;;  %v409_v52 = vpop.f32.mrf.mxu2 }
  0xe6   : > { %v562_v3 = vand.u32 2147483647, %v2822_v4  ;;  %v910_v53 = vadd.f32 0.4994258, %v909_v24  ;;  %v613_v29 = vadd.f32 0.00028619796, %v612_v49  ;;  %v2948_v7 = vmul.f32 %v541_v39, %v2654_v16 }
  0xe7   : > { %v859_v57 = vadd.f32 0.18741608, %v858_v22  ;;  %2322 = vrcp.f32 %v2912_v40  ;;  %v897_v32 = vadd.f32 0.05243302, %v896_v12  ;;  %v564_v35 = vand.u32 2147483648, %v2822_v4 }
  0xe8   : > { %v591_v55 = vmul.f32 %v590_v42, %v2778_v19  ;;  %v626_v58 = vadd.f32 0.014752088, %v625_v60  ;;  %v2957_v9 = vmul.f32 0.70710677, %v2925_v54  ;;  %v846_v16 = vsel %vm2897_vm14, %v845_v27, %v841_v15 }
  0xe9   : > { %v556_v11 = vmul.f32 %v2885_v23, %v555_v43  ;;  %v579_v51 = vadd.f32 0.18741608, %v578_v8  ;;  %v2963_v14 = vmul.f32 0.5, %v2800_v37  ;;  %v911_v28 = vmul.f32 %v910_v53, %v2785_v33 }
  0xea   : > { %v614_v18 = vmul.f32 %v613_v29, %v2867_v2  ;;  %v627_v45 = vmul.f32 %v626_v58, %v2867_v2  ;;  %v930_v36 = vmul.f32 %v2957_v9, %v2957_v9  ;;  %vm558_vm2 = vweird.f32 %v2822_v4 }
  0xeb   : > { %v860_v27 = vmul.f32 %v859_v57, %v2715_v31  ;;  %v898_v13 = vmul.f32 %v897_v32, %v2785_v33  ;;  %v2974_v34 = vadd.f32 %v2587_v21, %v385_v48  ;;  %vm2976_vm3 = vcmp.eq.f32.partialorder %v562_v3, 8.507059e+37 }
  0xec   : > { %v565_v24 = vor.u32 1.1754944e-38, %v564_v35  ;;  %v2980_v49 = vadd.f32 1.0, %v591_v55  ;;  %v628_v25 = vadd.f32 0.112945676, %v627_v45  ;;  %v557_v22 = vadd.f32 %v2885_v23, %v556_v11 }
  0xed   : > { %v2982_v39 = vpop.eup %2322  ;;  %vm559_vm4 = vweird.f32 %v2885_v23  ;;  %v580_v31 = vmul.f32 %v579_v51, %v2778_v19  ;;  %v2988_v12 = vadd.f32 %v2587_v21, %v409_v52  ;;  %v2990_v30 = vadd.f32 1.0, %v911_v28  ;;  %v388_v19 = vpop.f32.mrf.mxu0 }
  0xee   : > { %v615_v42 = vadd.f32 0.0036580483, %v614_v18  ;;  %v629_v50 = vmul.f32 %v628_v25, %v2867_v2  ;;  %v2993_v43 = vmin.f32 %v930_v36, 16.0  ;;  %v2996_v8 = vmul.f32 %v846_v16, %v2881_v20  ;;  %vm3003_vm5 = vmor %vm558_vm2, %vm559_vm4 }
  0xef   : > { %v861_v60 = vadd.f32 1.1283791, %v860_v27  ;;  %v899_v63 = vadd.f32 0.18741608, %v898_v13  ;;  %v2999_v15 = vmul.f32 0.70710677, %v2974_v34  ;;  %v874_v3 = vmul.f32 %v2982_v39, %v2912_v40 }
  0xf0   : > { %2324 = vrcp.f32 %v2980_v49  ;;  %v630_v53 = vadd.f32 0.4994258, %v629_v50  ;;  %v932_v20 = vmul.f32 2.1237322e-06, %v2993_v43  ;;  %v561_v29 = vsel %vm3003_vm5, %v2885_v23, %v557_v22 }
  0xf1   : > { %v943_v57 = vmul.f32 3.8918573e-05, %v2993_v43  ;;  %v650_v4 = vmul.f32 %v2999_v15, %v2999_v15  ;;  %v3018_v32 = vmul.f32 0.70710677, %v2988_v12  ;;  %v884_v1 = vand.u32 2147483648, %v2912_v40 }
  0xf2   : > { %v581_v35 = vadd.f32 1.1283791, %v580_v31  ;;  %2326 = vrcp.f32 %v2990_v30  ;;  %v616_v55 = vmul.f32 %v615_v42, %v2867_v2  ;;  %v631_v58 = vmul.f32 %v630_v53, %v2867_v2 }
  0xf3   : > { %v933_v48 = vadd.f32 0.00028619796, %v932_v20  ;;  %v944_v16 = vadd.f32 0.001143296, %v943_v57  ;;  %v3024_v23 = vmin.f32 %v650_v4, 16.0  ;;  %v566_v11 = vsel %vm2976_vm3, %v565_v24, %v561_v29 }
  0xf4   : > { %v3029_v51 = vmul.f32 %v861_v60, %v2684_v61  ;;  %v875_v28 = vsub.f32 1.0, %v874_v3  ;;  %v882_v18 = vand.u32 2147483647, %v2912_v40  ;;  %v900_v45 = vmul.f32 %v899_v63, %v2785_v33 }
  0xf5   : > { %v945_v36 = vmul.f32 %v944_v16, %v2993_v43  ;;  %v652_v52 = vmul.f32 2.1237322e-06, %v3024_v23  ;;  %v970_v27 = vmul.f32 %v3018_v32, %v3018_v32  ;;  %v3039_v25 = vor.u32 1.1754944e-38, %v884_v1 }
  0xf6   : > { %v3037_v13 = vpop.eup %2324  ;;  %v617_v37 = vadd.f32 0.05243302, %v616_v55  ;;  %v3042_v61 = vmul.f32 0.5, %v2925_v54  ;;  %v934_v24 = vmul.f32 %v933_v48, %v2993_v43  ;;  %v3046_v22 = vmul.f32 %v566_v11, %v2948_v7 }
  0xf7   : > { %vm879_vm6 = vweird.f32 %v2982_v39  ;;  %v3050_v33 = vmul.f32 %v581_v35, %v2743_v46  ;;  %v3052_v31 = vadd.f32 1.0, %v631_v58  ;;  %v876_v50 = vmul.f32 %v2982_v39, %v875_v28 }
  0xf8   : > { %v3054_v42 = vpop.eup %2326  ;;  %v604_v60 = vand.u32 2147483648, %v2980_v49  ;;  %v946_v54 = vadd.f32 0.014752088, %v945_v36  ;;  %v663_v63 = vmul.f32 3.8918573e-05, %v3024_v23  ;;  %vm878_vm7 = vweird.f32 %v2912_v40 }
  0xf9   : > { %v594_v7 = vmul.f32 %v3037_v13, %v2980_v49  ;;  %v901_v3 = vadd.f32 1.1283791, %v900_v45  ;;  %v653_v46 = vadd.f32 0.00028619796, %v652_v52  ;;  %v3062_v53 = vmin.f32 %v970_v27, 16.0  ;;  %vm3105_vm10 = vmor %vm878_vm7, %vm879_vm6 }
  0xfa   : > { %v618_v20 = vmul.f32 %v617_v37, %v2867_v2  ;;  %v935_v29 = vadd.f32 0.0036580483, %v934_v24  ;;  %v947_v57 = vmul.f32 %v946_v54, %v2993_v43  ;;  %v664_v4 = vadd.f32 0.001143296, %v663_v63 }
  0xfb   : > { %2328 = vrcp.f32 %v3052_v31  ;;  %v972_v1 = vmul.f32 2.1237322e-06, %v3062_v53  ;;  %v983_v35 = vmul.f32 3.8918573e-05, %v3062_v53  ;;  %v3070_v55 = vadd.f32 %v2587_v21, %v388_v19 }
  0xfc   : > { %v602_v58 = vand.u32 2147483647, %v2980_v49  ;;  %v914_v48 = vmul.f32 %v3054_v42, %v2990_v30  ;;  %v948_v16 = vadd.f32 0.112945676, %v947_v57  ;;  %v665_v11 = vmul.f32 %v664_v4, %v3024_v23 }
  0xfd   : > { %v595_v28 = vsub.f32 1.0, %v594_v7  ;;  %v3076_v45 = vor.u32 1.1754944e-38, %v604_v60  ;;  %v654_v36 = vmul.f32 %v653_v46, %v3024_v23  ;;  %v973_v52 = vadd.f32 0.00028619796, %v972_v1 }
  0xfe   : > { %vm3079_vm8 = vcmp.eq.f32.partialorder %v882_v18, 8.507059e+37  ;;  %v936_v37 = vmul.f32 %v935_v29, %v2993_v43  ;;  %v949_v24 = vmul.f32 %v948_v16, %v2993_v43  ;;  %v666_v54 = vadd.f32 0.014752088, %v665_v11 }
  0xff   : > { %v984_v63 = vadd.f32 0.001143296, %v983_v35  ;;  %v877_v19 = vadd.f32 %v2982_v39, %v876_v50  ;;  %v3087_v57 = vmul.f32 %v901_v3, %v2753_v56  ;;  %v619_v60 = vadd.f32 0.18741608, %v618_v20 }
 0x100   : > { %v3090_v7 = vmul.f32 0.70710677, %v3070_v55  ;;  %vm598_vm9 = vweird.f32 %v2980_v49  ;;  %v915_v18 = vsub.f32 1.0, %v914_v48  ;;  %v950_v46 = vadd.f32 0.4994258, %v949_v24 }
 0x101   : > { %v667_v4 = vmul.f32 %v666_v54, %v3024_v23  ;;  %v985_v29 = vmul.f32 %v984_v63, %v3062_v53  ;;  %v3095_v1 = vpop.eup %2328  ;;  %v596_v35 = vmul.f32 %v3037_v13, %v595_v28  ;;  %v655_v50 = vadd.f32 0.0036580483, %v654_v36 }
 0x102   : > { %v974_v56 = vmul.f32 %v973_v52, %v3062_v53  ;;  %v690_v3 = vmul.f32 %v3090_v7, %v3090_v7  ;;  %v937_v48 = vadd.f32 0.05243302, %v936_v37  ;;  %v951_v16 = vmul.f32 %v950_v46, %v2993_v43 }
 0x103   : > { %v668_v11 = vadd.f32 0.112945676, %v667_v4  ;;  %v986_v24 = vadd.f32 0.014752088, %v985_v29  ;;  %v881_v28 = vsel %vm3105_vm10, %v2982_v39, %v877_v19  ;;  %vm918_vm11 = vweird.f32 %v2990_v30 }
 0x104   : > { %v620_v36 = vmul.f32 %v619_v60, %v2867_v2  ;;  %v3115_v52 = vmin.f32 %v690_v3, 16.0  ;;  %vm3117_vm12 = vcmp.eq.f32.partialorder %v602_v58, 8.507059e+37  ;;  %v916_v37 = vmul.f32 %v3054_v42, %v915_v18 }
 0x105   : > { %v634_v54 = vmul.f32 %v3095_v1, %v3052_v31  ;;  %v669_v63 = vmul.f32 %v668_v11, %v3024_v23  ;;  %v987_v46 = vmul.f32 %v986_v24, %v3062_v53  ;;  %v922_v39 = vand.u32 2147483647, %v2990_v30 }
 0x106   : > { %v3127_v19 = vadd.f32 1.0, %v951_v16  ;;  %v656_v2 = vmul.f32 %v655_v50, %v3024_v23  ;;  %v975_v60 = vadd.f32 0.0036580483, %v974_v56  ;;  %v597_v58 = vadd.f32 %v3037_v13, %v596_v35  ;;  %v412_v56 = vpop.f32.mrf.mxu2 }
 0x107   : > { %vm599_vm13 = vweird.f32 %v3037_v13  ;;  %v938_v18 = vmul.f32 %v937_v48, %v2993_v43  ;;  %v692_v4 = vmul.f32 2.1237322e-06, %v3115_v52  ;;  %v886_v29 = vsel %vm3079_vm8, %v3039_v25, %v881_v28 }
 0x108   : > { %v924_v3 = vand.u32 2147483648, %v2990_v30  ;;  %v621_v20 = vadd.f32 1.1283791, %v620_v36  ;;  %v670_v16 = vadd.f32 0.4994258, %v669_v63  ;;  %v917_v11 = vadd.f32 %v3054_v42, %v916_v37  ;;  %vm3142_vm15 = vmor %vm598_vm9, %vm599_vm13 }
 0x109   : > { %vm919_vm14 = vweird.f32 %v3054_v42  ;;  %v635_v50 = vsub.f32 1.0, %v634_v54  ;;  %v988_v35 = vadd.f32 0.112945676, %v987_v46  ;;  %2330 = vrcp.f32 %v3127_v19 }
 0x10a   : > { %v657_v25 = vadd.f32 0.05243302, %v656_v2  ;;  %v976_v27 = vmul.f32 %v975_v60, %v3062_v53  ;;  %v703_v24 = vmul.f32 3.8918573e-05, %v3115_v52  ;;  %v3150_v28 = vmul.f32 %v886_v29, %v3029_v51  ;;  %vm3164_vm1 = vmor %vm918_vm11, %vm919_vm14 }
 0x10b   : > { %v601_v36 = vsel %vm3142_vm15, %v3037_v13, %v597_v58  ;;  %v939_v37 = vadd.f32 0.18741608, %v938_v18  ;;  %v693_v49 = vadd.f32 0.00028619796, %v692_v4  ;;  %v671_v54 = vmul.f32 %v670_v16, %v3024_v23 }
 0x10c   : > { %v989_v63 = vmul.f32 %v988_v35, %v3062_v53  ;;  %v704_v46 = vadd.f32 0.001143296, %v703_v24  ;;  %v3158_v2 = vadd.f32 %v2587_v21, %v412_v56  ;;  %vm3168_vm2 = vcmp.eq.f32.partialorder %v922_v39, 8.507059e+37 }
 0x10d   : > { %v925_v60 = vor.u32 1.1754944e-38, %v924_v3  ;;  %v3173_v58 = vmul.f32 %v621_v20, %v2825_v5  ;;  %v636_v18 = vmul.f32 %v3095_v1, %v635_v50  ;;  %v606_v4 = vsel %vm3117_vm12, %v3076_v45, %v601_v36 }
 0x10e   : > { %v921_v30 = vsel %vm3164_vm1, %v3054_v42, %v917_v11  ;;  %v658_v29 = vmul.f32 %v657_v25, %v3024_v23  ;;  %v977_v39 = vadd.f32 0.05243302, %v976_v27  ;;  %vm638_vm3 = vweird.f32 %v3052_v31 }
 0x10f   : > { %v642_v3 = vand.u32 2147483647, %v3052_v31  ;;  %v940_v5 = vmul.f32 %v939_v37, %v2993_v43  ;;  %v694_v20 = vmul.f32 %v693_v49, %v3115_v52  ;;  %v3187_v16 = vpop.eup %2330  ;;  %v3189_v50 = vadd.f32 1.0, %v671_v54 }
 0x110   : > { %v990_v45 = vadd.f32 0.4994258, %v989_v63  ;;  %v705_v40 = vmul.f32 %v704_v46, %v3115_v52  ;;  %v3193_v42 = vmul.f32 0.70710677, %v3158_v2  ;;  %v926_v11 = vsel %vm3168_vm2, %v925_v60, %v921_v30 }
 0x111   : > { %v637_v35 = vadd.f32 %v3095_v1, %v636_v18  ;;  %vm639_vm4 = vweird.f32 %v3095_v1  ;;  %v644_v43 = vand.u32 2147483648, %v3052_v31  ;;  %v659_v56 = vadd.f32 0.18741608, %v658_v29 }
 0x112   : > { %v978_v48 = vmul.f32 %v977_v39, %v3062_v53  ;;  %v706_v25 = vadd.f32 0.014752088, %v705_v40  ;;  %v1010_v27 = vmul.f32 %v3193_v42, %v3193_v42  ;;  %v941_v24 = vadd.f32 1.1283791, %v940_v5  ;;  %vm3221_vm5 = vmor %vm638_vm3, %vm639_vm4 }
 0x113   : > { %v954_v36 = vmul.f32 %v3187_v16, %v3127_v19  ;;  %v695_v37 = vadd.f32 0.0036580483, %v694_v20  ;;  %v2210_v49 = vclamps-f32 %v2864_v62, 1.0  ;;  %2332 = vrcp.f32 %v3189_v50 }
 0x114   : > { %v991_v54 = vmul.f32 %v990_v45, %v3062_v53  ;;  %v707_v63 = vmul.f32 %v706_v25, %v3115_v52  ;;  %v3209_v46 = vmin.f32 %v1010_v27, 16.0  ;;  %v3212_v51 = vmul.f32 %v606_v4, %v3050_v33 }
 0x115   : > { %v3215_v13 = vmul.f32 %v926_v11, %v3087_v57  ;;  %vm643_vm6 = vcmp.eq.f32.partialorder %v642_v3, 8.507059e+37  ;;  %v645_v60 = vor.u32 1.1754944e-38, %v644_v43  ;;  %v641_v18 = vsel %vm3221_vm5, %v3095_v1, %v637_v35  ;;  %v391_v57 = vpop.f32.mrf.mxu0 }
 0x116   : > { %v660_v33 = vmul.f32 %v659_v56, %v3024_v23  ;;  %v979_v4 = vadd.f32 0.18741608, %v978_v48  ;;  %v708_v30 = vadd.f32 0.112945676, %v707_v63  ;;  %v955_v29 = vsub.f32 1.0, %v954_v36 }
 0x117   : > { %v1012_v39 = vmul.f32 2.1237322e-06, %v3209_v46  ;;  %v1023_v31 = vmul.f32 3.8918573e-05, %v3209_v46  ;;  %v1090_v5 = vadd.f32 1.0, %v2210_v49  ;;  %v3232_v20 = vmul.f32 %v941_v24, %v2957_v9 }
 0x118   : > { %v3234_v3 = vadd.f32 1.0, %v991_v54  ;;  %v696_v45 = vmul.f32 %v695_v37, %v3115_v52  ;;  %v709_v1 = vmul.f32 %v708_v30, %v3115_v52  ;;  %v646_v40 = vsel %vm643_vm6, %v645_v60, %v641_v18 }
 0x119   : > { %v1024_v23 = vadd.f32 0.001143296, %v1023_v31  ;;  %v1106_v11 = vmul.f32 %v1090_v5, %v2688_v0  ;;  %v3240_v35 = vadd.f32 %v2587_v21, %v391_v57  ;;  %v3242_v43 = vpop.eup %2332  ;;  %vm958_vm7 = vweird.f32 %v3127_v19  ;;  %v415_v31 = vpop.f32.mrf.mxu2 }
 0x11a   : > { %v962_v9 = vand.u32 2147483647, %v3127_v19  ;;  %v964_v56 = vand.u32 2147483648, %v3127_v19  ;;  %v980_v48 = vmul.f32 %v979_v4, %v3062_v53  ;;  %v710_v25 = vadd.f32 0.4994258, %v709_v1 }
 0x11b   : > { %v956_v27 = vmul.f32 %v3187_v16, %v955_v29  ;;  %v661_v24 = vadd.f32 1.1283791, %v660_v33  ;;  %v1013_v36 = vadd.f32 0.00028619796, %v1012_v39  ;;  %v1025_v0 = vmul.f32 %v1024_v23, %v3209_v46  ;;  %2226 = vmatmul.msk.f32.vlgmr.msra.gmra.mxu1 %vm304_vm0, %v1106_v11 }
 0x11c   : > { %2334 = vrcp.f32 %v3234_v3  ;;  %v697_v21 = vadd.f32 0.05243302, %v696_v45  ;;  %v711_v37 = vmul.f32 %v710_v25, %v3115_v52  ;;  %v3254_v49 = vmul.f32 0.70710677, %v3240_v35 }
 0x11d   : > { %v3257_v54 = vmul.f32 %v646_v40, %v3173_v58  ;;  %v674_v53 = vmul.f32 %v3242_v43, %v3189_v50  ;;  %v1026_v63 = vadd.f32 0.014752088, %v1025_v0  ;;  %v2218_v62 = vclamps-f32 %v2895_v59, 1.0 }
 0x11e   : > { %vm3262_vm8 = vcmp.eq.f32.partialorder %v962_v9, 8.507059e+37  ;;  %v965_v18 = vor.u32 1.1754944e-38, %v964_v56  ;;  %v684_v33 = vand.u32 2147483648, %v3189_v50  ;;  %v981_v4 = vadd.f32 1.1283791, %v980_v48 }
 0x11f   : > { %v730_v30 = vmul.f32 %v3254_v49, %v3254_v49  ;;  %v3269_v57 = vadd.f32 1.0, %v711_v37  ;;  %v1014_v58 = vmul.f32 %v1013_v36, %v3209_v46  ;;  %v1027_v29 = vmul.f32 %v1026_v63, %v3209_v46 }
 0x120   : > { %v1098_v39 = vadd.f32 1.0, %v2218_v62  ;;  %v957_v59 = vadd.f32 %v3187_v16, %v956_v27  ;;  %vm959_vm9 = vweird.f32 %v3187_v16  ;;  %v3276_v5 = vmul.f32 %v661_v24, %v2999_v15  ;;  %v2376_v15 = vld [vmem:[%s4496_s2] ss:$0 sm:$0xff] }
 0x121   : > { %v698_v45 = vmul.f32 %v697_v21, %v3115_v52  ;;  %v675_v1 = vsub.f32 1.0, %v674_v53  ;;  %v682_v40 = vand.u32 2147483647, %v3189_v50  ;;  %v1028_v23 = vadd.f32 0.112945676, %v1027_v29  ;;  %vm3297_vm10 = vmor %vm958_vm7, %vm959_vm9 }
 0x122   : > { %v3280_v11 = vmin.f32 %v730_v30, 16.0  ;;  %v3282_v9 = vpop.eup %2334  ;;  %v3284_v56 = vor.u32 1.1754944e-38, %v684_v33  ;;  %v3287_v48 = vmul.f32 %v981_v4, %v3018_v32  ;;  %v1114_v25 = vmul.f32 %v1098_v39, %v2697_v6 }
 0x123   : > { %v3293_v27 = vadd.f32 %v2376_v15, %v415_v31  ;;  %v1004_v36 = vand.u32 2147483648, %v3234_v3  ;;  %2336 = vrcp.f32 %v3269_v57  ;;  %v1015_v32 = vadd.f32 0.0036580483, %v1014_v58 }
 0x124   : > { %v1029_v0 = vmul.f32 %v1028_v23, %v3209_v46  ;;  %v961_v6 = vsel %vm3297_vm10, %v3187_v16, %v957_v59  ;;  %vm678_vm11 = vweird.f32 %v3189_v50  ;;  %v699_v21 = vadd.f32 0.18741608, %v698_v45  ;;  %2234 = vmatmul.msk.f32.vlgmr.msra.gmra.mxu3 %vm304_vm0, %v1114_v25 }
 0x125   : > { %v732_v19 = vmul.f32 2.1237322e-06, %v3280_v11  ;;  %v743_v37 = vmul.f32 3.8918573e-05, %v3280_v11  ;;  %v676_v53 = vmul.f32 %v3242_v43, %v675_v1  ;;  %v994_v63 = vmul.f32 %v3282_v9, %v3234_v3 }
 0x126   : > { %v1030_v62 = vadd.f32 0.4994258, %v1029_v0  ;;  %v3315_v33 = vmul.f32 0.70710677, %v3293_v27  ;;  %v2211_v30 = vclamps-f32 %v2928_v47, 1.0  ;;  %v2219_v58 = vclamps-f32 %v2996_v8, 1.0 }
 0x127   : > { %v733_v4 = vadd.f32 0.00028619796, %v732_v19  ;;  %v744_v16 = vadd.f32 0.001143296, %v743_v37  ;;  %v966_v29 = vsel %vm3262_vm8, %v965_v18, %v961_v6  ;;  %vm679_vm12 = vweird.f32 %v3242_v43 }
 0x128   : > { %v1016_v39 = vmul.f32 %v1015_v32, %v3209_v46  ;;  %v1031_v31 = vmul.f32 %v1030_v62, %v3209_v46  ;;  %vm3324_vm13 = vcmp.eq.f32.partialorder %v682_v40, 8.507059e+37  ;;  %v700_v45 = vmul.f32 %v699_v21, %v3115_v52  ;;  %vm3356_vm14 = vmor %vm678_vm11, %vm679_vm12 }
 0x129   : > { %v745_v1 = vmul.f32 %v744_v16, %v3280_v11  ;;  %v1050_v47 = vmul.f32 %v3315_v33, %v3315_v33  ;;  %v1091_v8 = vadd.f32 1.0, %v2211_v30  ;;  %v3332_v60 = vpop.eup %2336  ;;  %v677_v18 = vadd.f32 %v3242_v43, %v676_v53 }
 0x12a   : > { %v995_v23 = vsub.f32 1.0, %v994_v63  ;;  %v3335_v25 = vadd.f32 1.0, %v1031_v31  ;;  %v1099_v15 = vadd.f32 1.0, %v2219_v58  ;;  %v734_v40 = vmul.f32 %v733_v4, %v3280_v11 }
 0x12b   : > { %v746_v24 = vadd.f32 0.014752088, %v745_v1  ;;  %v3338_v32 = vmin.f32 %v1050_v47, 16.0  ;;  %v1107_v52 = vmul.f32 %v1091_v8, %v2703_v10  ;;  %v1002_v0 = vand.u32 2147483647, %v3234_v3 }
 0x12c   : > { %v3342_v6 = vor.u32 1.1754944e-38, %v1004_v36  ;;  %v1017_v21 = vadd.f32 0.05243302, %v1016_v39  ;;  %2338 = vrcp.f32 %v3335_v25  ;;  %v3346_v19 = vmul.f32 %v966_v29, %v3232_v20 }
 0x12d   : > { %v701_v37 = vadd.f32 1.1283791, %v700_v45  ;;  %v714_v53 = vmul.f32 %v3332_v60, %v3269_v57  ;;  %v747_v63 = vmul.f32 %v746_v24, %v3280_v11  ;;  %2227 = vmatmul.msk.f32.gmra.mxu1 %vm304_vm0, %v1107_v52  ;;  %vm999_vm15 = vweird.f32 %v3282_v9 }
 0x12e   : > { %v1052_v20 = vmul.f32 2.1237322e-06, %v3338_v32  ;;  %v1063_v36 = vmul.f32 3.8918573e-05, %v3338_v32  ;;  %v1115_v62 = vmul.f32 %v1099_v15, %v2708_v17  ;;  %v681_v4 = vsel %vm3356_vm14, %v3242_v43, %v677_v18 }
 0x12f   : > { %v996_v16 = vmul.f32 %v3282_v9, %v995_v23  ;;  %vm998_vm1 = vweird.f32 %v3234_v3  ;;  %v735_v50 = vadd.f32 0.0036580483, %v734_v40  ;;  %v748_v30 = vadd.f32 0.112945676, %v747_v63 }
 0x130   : > { %v1018_v58 = vmul.f32 %v1017_v21, %v3209_v46  ;;  %v1053_v29 = vadd.f32 0.00028619796, %v1052_v20  ;;  %v1064_v39 = vadd.f32 0.001143296, %v1063_v36  ;;  %2235 = vmatmul.msk.f32.gmra.mxu3 %vm304_vm0, %v1115_v62  ;;  %v2212_v31 = vclamps-f32 %v3046_v22, 1.0  ;;  %vm3407_vm3 = vmor %vm998_vm1, %vm999_vm15 }
 0x131   : > { %v3373_v17 = vmul.f32 %v701_v37, %v3090_v7  ;;  %v715_v45 = vsub.f32 1.0, %v714_v53  ;;  %v749_v43 = vmul.f32 %v748_v30, %v3280_v11  ;;  %v2220_v1 = vclamps-f32 %v3150_v28, 1.0 }
 0x132   : > { %v3377_v47 = vpop.eup %2338  ;;  %v686_v8 = vsel %vm3324_vm13, %v3284_v56, %v681_v4  ;;  %v1054_v18 = vmul.f32 %v1053_v29, %v3338_v32  ;;  %v1065_v23 = vmul.f32 %v1064_v39, %v3338_v32  ;;  %v1092_v15 = vadd.f32 1.0, %v2212_v31 }
 0x133   : > { %v997_v22 = vadd.f32 %v3282_v9, %v996_v16  ;;  %vm3385_vm2 = vcmp.eq.f32.partialorder %v1002_v0, 8.507059e+37  ;;  %v1034_v28 = vmul.f32 %v3377_v47, %v3335_v25  ;;  %v736_v40 = vmul.f32 %v735_v50, %v3280_v11 }
 0x134   : > { %v750_v24 = vadd.f32 0.4994258, %v749_v43  ;;  %v1019_v52 = vadd.f32 0.18741608, %v1018_v58  ;;  %v1066_v59 = vadd.f32 0.014752088, %v1065_v23  ;;  %v1108_v56 = vmul.f32 %v1092_v15, %v2713_v38 }
 0x135   : > { %v1100_v21 = vadd.f32 1.0, %v2220_v1  ;;  %v716_v37 = vmul.f32 %v3332_v60, %v715_v45  ;;  %v1055_v63 = vadd.f32 0.0036580483, %v1054_v18  ;;  %v2213_v0 = vclamps-f32 %v3212_v51, 1.0 }
 0x136   : > { %v751_v53 = vmul.f32 %v750_v24, %v3280_v11  ;;  %v1035_v10 = vsub.f32 1.0, %v1034_v28  ;;  %v1067_v20 = vmul.f32 %v1066_v59, %v3338_v32  ;;  %2228 = vmatmul.msk.f32.gmra.mxu1 %vm304_vm0, %v1108_v56  ;;  %v2221_v62 = vclamps-f32 %v3215_v13, 1.0 }
 0x137   : > { %v1116_v36 = vmul.f32 %v1100_v21, %v2782_v26  ;;  %v722_v4 = vand.u32 2147483647, %v3269_v57  ;;  %v737_v38 = vadd.f32 0.05243302, %v736_v40  ;;  %v1093_v50 = vadd.f32 1.0, %v2213_v0 }
 0x138   : > { %v3401_v16 = vadd.f32 1.0, %v751_v53  ;;  %v724_v30 = vand.u32 2147483648, %v3269_v57  ;;  %v1020_v26 = vmul.f32 %v1019_v52, %v3209_v46  ;;  %v1068_v58 = vadd.f32 0.112945676, %v1067_v20  ;;  %v2016_v53 = vld [vmem:[#allocation2] sm:$0x1] }
 0x139   : > { %2236 = vmatmul.msk.f32.gmra.mxu3 %vm304_vm0, %v1116_v36  ;;  %v1101_v13 = vadd.f32 1.0, %v2221_v62  ;;  %v1001_v29 = vsel %vm3407_vm3, %v3282_v9, %v997_v22  ;;  %vm719_vm4 = vweird.f32 %v3332_v60  ;;  %v1056_v3 = vmul.f32 %v1055_v63, %v3338_v32 }
 0x13a   : > { %2340 = vrcp.f32 %v3401_v16  ;;  %v717_v39 = vadd.f32 %v3332_v60, %v716_v37  ;;  %v1036_v31 = vmul.f32 %v3377_v47, %v1035_v10  ;;  %v1069_v46 = vmul.f32 %v1068_v58, %v3338_v32 }
 0x13b   : > { %v2214_v45 = vclamps-f32 %v3257_v54, 1.0  ;;  %v687_v43 = vmul.f32 %v686_v8, %v3276_v5  ;;  %vm718_vm5 = vweird.f32 %v3269_v57  ;;  %v738_v9 = vmul.f32 %v737_v38, %v3280_v11 }
 0x13c   : > { %v1109_v1 = vmul.f32 %v1093_v50, %v2919_v41  ;;  %v1006_v18 = vsel %vm3385_vm2, %v3342_v6, %v1001_v29  ;;  %vm3431_vm6 = vcmp.eq.f32.partialorder %v722_v4, 8.507059e+37  ;;  %v1021_v15 = vadd.f32 1.1283791, %v1020_v26  ;;  %vm3438_vm7 = vmor %vm718_vm5, %vm719_vm4 }
 0x13d   : > { %v1117_v22 = vmul.f32 %v1101_v13, %v2922_v44  ;;  %v725_v57 = vor.u32 1.1754944e-38, %v724_v30  ;;  %v1057_v5 = vadd.f32 0.05243302, %v1056_v3  ;;  %v1070_v41 = vadd.f32 0.4994258, %v1069_v46 }
 0x13e   : > { %v2222_v8 = vclamps-f32 %v3346_v19, 1.0  ;;  %v721_v6 = vsel %vm3438_vm7, %v3332_v60, %v717_v39  ;;  %v1037_v7 = vadd.f32 %v3377_v47, %v1036_v31  ;;  %vm1039_vm8 = vweird.f32 %v3377_v47  ;;  %2229 = vmatmul.msk.f32.gmra.mxu1 %vm304_vm0, %v1109_v1 }
 0x13f   : > { %v1094_v44 = vadd.f32 1.0, %v2214_v45  ;;  %v1042_v40 = vand.u32 2147483647, %v3335_v25  ;;  %v1044_v24 = vand.u32 2147483648, %v3335_v25  ;;  %v739_v52 = vadd.f32 0.18741608, %v738_v9 }
 0x140   : > { %v2341_v28 = vpop.eup %2340  ;;  %v1071_v59 = vmul.f32 %v1070_v41, %v3338_v32  ;;  %v1007_v19 = vmul.f32 %v1006_v18, %v3287_v48  ;;  %vm1038_vm9 = vweird.f32 %v3335_v25  ;;  %v1102_v56 = vadd.f32 1.0, %v2222_v8 }
 0x141   : > { %v754_v60 = vmul.f32 %v2341_v28, %v3401_v16  ;;  %2237 = vmatmul.msk.f32.gmra.mxu3 %vm304_vm0, %v1117_v22  ;;  %v726_v21 = vsel %vm3431_vm6, %v725_v57, %v721_v6  ;;  %v1022_v37 = vmul.f32 %v1021_v15, %v3193_v42  ;;  %vm3461_vm10 = vmor %vm1038_vm9, %vm1039_vm8  ;;  %v1058_v48 = vmul.f32 %v1057_v5, %v3338_v32 }
 0x142   : > { %v1072_v63 = vadd.f32 1.0, %v1071_v59  ;;  %v1041_v25 = vsel %vm3461_vm10, %v3377_v47, %v1037_v7  ;;  %v1110_v10 = vmul.f32 %v1094_v44, %v2963_v14  ;;  %v2215_v20 = vclamps-f32 %v687_v43, 1.0 }
 0x143   : > { %v755_v0 = vsub.f32 1.0, %v754_v60  ;;  %vm1043_vm11 = vcmp.eq.f32.partialorder %v1042_v40, 8.507059e+37  ;;  %v1045_v36 = vor.u32 1.1754944e-38, %v1044_v24  ;;  %v740_v42 = vmul.f32 %v739_v52, %v3280_v11 }
 0x144   : > { %2342 = vrcp.f32 %v1072_v63  ;;  %vm759_vm12 = vweird.f32 %v2341_v28  ;;  %v1118_v4 = vmul.f32 %v1102_v56, %v3042_v61  ;;  %v2223_v38 = vclamps-f32 %v1007_v19, 1.0 }
 0x145   : > { %v756_v62 = vmul.f32 %v2341_v28, %v755_v0  ;;  %v727_v50 = vmul.f32 %v726_v21, %v3373_v17  ;;  %v1046_v51 = vsel %vm1043_vm11, %v1045_v36, %v1041_v25  ;;  %v764_v30 = vand.u32 2147483648, %v3401_v16 }
 0x146   : > { %v1059_v47 = vadd.f32 0.18741608, %v1058_v48  ;;  %vm758_vm13 = vweird.f32 %v3401_v16  ;;  %v762_v14 = vand.u32 2147483647, %v3401_v16  ;;  %2230 = vmatmul.msk.f32.gmra.mxu1 %vm304_vm0, %v1110_v10  ;;  %v1095_v11 = vadd.f32 1.0, %v2215_v20 }
 0x147   : > { %v757_v26 = vadd.f32 %v2341_v28, %v756_v62  ;;  %v423_v58 = vmul.f32 0.5, %v2974_v34  ;;  %vm760_vm14 = vmor %vm758_vm13, %vm759_vm12  ;;  %v1047_v13 = vmul.f32 %v1046_v51, %v1022_v37  ;;  %v741_v61 = vadd.f32 1.1283791, %v740_v42  ;;  %v3496_v48 = vld [vmem:[%s4498_s4] ss:$0 sm:$0xff] }
 0x148   : > { %v1103_v17 = vadd.f32 1.0, %v2223_v38  ;;  %v765_v39 = vor.u32 1.1754944e-38, %v764_v30  ;;  %v1060_v31 = vmul.f32 %v1059_v47, %v3338_v32  ;;  %v2216_v46 = vclamps-f32 %v727_v50, 1.0 }
 0x149   : > { %v761_v29 = vsel %vm760_vm14, %v2341_v28, %v757_v26  ;;  %2238 = vmatmul.msk.f32.gmra.mxu3 %vm304_vm0, %v1118_v4  ;;  %v431_v45 = vmul.f32 0.5, %v2988_v12  ;;  %vm763_vm15 = vcmp.eq.f32.partialorder %v762_v14, 8.507059e+37  ;;  %v1111_v43 = vmul.f32 %v1095_v11, %v423_v58 }
 0x14a   : > { %v2343_v3 = vpop.eup %2342  ;;  %v766_v9 = vsel %vm763_vm15, %v765_v39, %v761_v29  ;;  %v742_v34 = vmul.f32 %v741_v61, %v3254_v49  ;;  %v2224_v23 = vclamps-f32 %v1047_v13, 1.0  ;;  %v1061_v15 = vadd.f32 1.1283791, %v1060_v31 }
 0x14b   : > { %v1074_v16 = vmul.f32 %v2343_v3, %v1072_v63  ;;  %v1119_v18 = vmul.f32 %v1103_v17, %v431_v45  ;;  %v1084_v22 = vand.u32 2147483648, %v1072_v63  ;;  %v1096_v54 = vadd.f32 1.0, %v2216_v46 }
 0x14c   : > { %v767_v57 = vmul.f32 %v766_v9, %v742_v34  ;;  %vm1079_vm1 = vweird.f32 %v2343_v3  ;;  %v1082_v41 = vand.u32 2147483647, %v1072_v63  ;;  %v424_v12 = vmul.f32 0.5, %v3070_v55 }
 0x14d   : > { %v1075_v1 = vsub.f32 1.0, %v1074_v16  ;;  %vm1078_vm2 = vweird.f32 %v1072_v63  ;;  %v1104_v8 = vadd.f32 1.0, %v2224_v23  ;;  %v432_v49 = vmul.f32 0.5, %v3158_v2 }
 0x14e   : > { %2231 = vmatmul.msk.f32.gmra.mxu1 %vm304_vm0, %v1111_v43  ;;  %v1062_v6 = vmul.f32 %v1061_v15, %v3315_v33  ;;  %vm1080_vm3 = vmor %vm1078_vm2, %vm1079_vm1  ;;  %v1085_v7 = vor.u32 1.1754944e-38, %v1084_v22  ;;  %vm1083_vm4 = vcmp.eq.f32.partialorder %v1082_v41, 8.507059e+37  ;;  %v1112_v28 = vmul.f32 %v1096_v54, %v424_v12 }
 0x14f   : > { %v1076_v5 = vmul.f32 %v2343_v3, %v1075_v1  ;;  %v2217_v40 = vclamps-f32 %v767_v57, 1.0  ;;  %v1120_v59 = vmul.f32 %v1104_v8, %v432_v49  ;;  %v425_v60 = vmul.f32 0.5, %v3240_v35 }
 0x150   : > { %v433_v33 = vmul.f32 0.5, %v3293_v27  ;;  %v2442_v37 = vmov 0  }
 0x151   : > { %v1077_v32 = vadd.f32 %v2343_v3, %v1076_v5  ;;  %2239 = vmatmul.msk.f32.gmra.mxu3 %vm304_vm0, %v1119_v18  ;;  %v1097_v55 = vadd.f32 1.0, %v2217_v40  ;;  %2308 = vset.pattern.permute.xlu0 %v2442_v37 }
 0x152   : > { %2019 = vperm.xlu0 %2308, %v2016_v53  }
 0x153   : > { %v1081_v44 = vsel %vm1080_vm3, %v2343_v3, %v1077_v32  ;;  %v1113_v56 = vmul.f32 %v1097_v55, %v425_v60 }
 0x154   : > { %v1086_v24 = vsel %vm1083_vm4, %v1085_v7, %v1081_v44 }
 0x155   : > { %v1087_v52 = vmul.f32 %v1086_v24, %v1062_v6 }
 0x156   : > { %2232 = vmatmul.msk.f32.gmra.mxu1 %vm304_vm0, %v1112_v28 }
 0x157   : > { %v2225_v19 = vclamps-f32 %v1087_v52, 1.0 }
 0x159   : > { %2240 = vmatmul.msk.f32.gmra.mxu3 %vm304_vm0, %v1120_v59  ;;  %v1105_v2 = vadd.f32 1.0, %v2225_v19 }
 0x15b   : > { %v1121_v21 = vmul.f32 %v1105_v2, %v433_v33 }
 0x15e   : > { %2233 = vmatmul.msk.f32.gmra.mxu1 %vm304_vm0, %v1113_v56 }
 0x161   : > { %2241 = vmatmul.msk.f32.gmra.mxu3 %vm304_vm0, %v1121_v21 }
 0x198   : > { %v1195_v35 = vpop.f32.mrf.mxu1 }
 0x199   : > { %v3499_v63 = vadd.f32 %v3496_v48, %v1195_v35 }
 0x19b   : > { %v3502_v27 = vmul.f32 0.70710677, %v3499_v63 }
 0x19d   : > { %v1275_v25 = vmul.f32 %v3502_v27, %v3502_v27 }
 0x19f   : > { %v3506_v0 = vmin.f32 %v1275_v25, 16.0 }
 0x1a1   : > { %v1288_v10 = vmul.f32 3.8918573e-05, %v3506_v0  ;;  %v1277_v36 = vmul.f32 2.1237322e-06, %v3506_v0 }
 0x1a3   : > { %v1289_v20 = vadd.f32 0.001143296, %v1288_v10  ;;  %v1278_v50 = vadd.f32 0.00028619796, %v1277_v36 }
 0x1a5   : > { %v1290_v42 = vmul.f32 %v1289_v20, %v3506_v0  ;;  %v1279_v13 = vmul.f32 %v1278_v50, %v3506_v0 }
 0x1a7   : > { %v1291_v62 = vadd.f32 0.014752088, %v1290_v42  ;;  %v1219_v4 = vpop.f32.mrf.mxu3  ;;  %v1280_v45 = vadd.f32 0.0036580483, %v1279_v13 }
 0x1a8   : > { %v3512_v38 = vadd.f32 %v3496_v48, %v1219_v4 }
 0x1a9   : > { %v1292_v51 = vmul.f32 %v1291_v62, %v3506_v0  ;;  %v1281_v41 = vmul.f32 %v1280_v45, %v3506_v0 }
 0x1aa   : > { %v1198_v30 = vpop.f32.mrf.mxu1  ;;  %v3519_v26 = vmul.f32 0.70710677, %v3512_v38 }
 0x1ab   : > { %v3516_v47 = vadd.f32 %v3496_v48, %v1198_v30  ;;  %v1293_v14 = vadd.f32 0.112945676, %v1292_v51  ;;  %v1282_v28 = vadd.f32 0.05243302, %v1281_v41 }
 0x1ac   : > { %v1595_v58 = vmul.f32 %v3519_v26, %v3519_v26 }
 0x1ad   : > { %v3522_v11 = vmul.f32 0.70710677, %v3516_v47  ;;  %v1294_v61 = vmul.f32 %v1293_v14, %v3506_v0  ;;  %v1283_v37 = vmul.f32 %v1282_v28, %v3506_v0 }
 0x1ae   : > { %v3530_v17 = vmin.f32 %v1595_v58, 16.0 }
 0x1af   : > { %v1315_v29 = vmul.f32 %v3522_v11, %v3522_v11  ;;  %v1295_v3 = vadd.f32 0.4994258, %v1294_v61  ;;  %v1284_v14 = vadd.f32 0.18741608, %v1283_v37 }
 0x1b0   : > { %v1597_v31 = vmul.f32 2.1237322e-06, %v3530_v17  ;;  %v1608_v46 = vmul.f32 3.8918573e-05, %v3530_v17 }
 0x1b1   : > { %v3532_v39 = vmin.f32 %v1315_v29, 16.0  ;;  %v1296_v16 = vmul.f32 %v1295_v3, %v3506_v0 }
 0x1b2   : > { %v1598_v34 = vadd.f32 0.00028619796, %v1597_v31  ;;  %v1609_v15 = vadd.f32 0.001143296, %v1608_v46 }
 0x1b3   : > { %v1317_v43 = vmul.f32 2.1237322e-06, %v3532_v39  ;;  %v1328_v9 = vmul.f32 3.8918573e-05, %v3532_v39  ;;  %v1201_v1 = vpop.f32.mrf.mxu1  ;;  %v1222_v18 = vpop.f32.mrf.mxu3  ;;  %v3539_v23 = vadd.f32 1.0, %v1296_v16 }
 0x1b4   : > { %v3542_v22 = vadd.f32 %v3496_v48, %v1201_v1  ;;  %v1599_v5 = vmul.f32 %v1598_v34, %v3530_v17  ;;  %v3547_v12 = vadd.f32 %v3496_v48, %v1222_v18  ;;  %v1610_v49 = vmul.f32 %v1609_v15, %v3530_v17 }
 0x1b5   : > { %v1318_v54 = vadd.f32 0.00028619796, %v1317_v43  ;;  %v1329_v57 = vadd.f32 0.001143296, %v1328_v9  ;;  %2344 = vrcp.f32 %v3539_v23  ;;  %v1285_v9 = vmul.f32 %v1284_v14, %v3506_v0 }
 0x1b6   : > { %v3554_v6 = vmul.f32 0.70710677, %v3542_v22  ;;  %v1600_v44 = vadd.f32 0.0036580483, %v1599_v5  ;;  %v1611_v40 = vadd.f32 0.014752088, %v1610_v49  ;;  %vm1303_vm5 = vweird.f32 %v3539_v23 }
 0x1b7   : > { %v1319_v32 = vmul.f32 %v1318_v54, %v3532_v39  ;;  %v1330_v8 = vmul.f32 %v1329_v57, %v3532_v39  ;;  %v3559_v52 = vmul.f32 0.70710677, %v3547_v12  ;;  %v1286_v0 = vadd.f32 1.1283791, %v1285_v9 }
 0x1b8   : > { %v1355_v24 = vmul.f32 %v3554_v6, %v3554_v6  ;;  %v1612_v19 = vmul.f32 %v1611_v40, %v3530_v17  ;;  %v1601_v56 = vmul.f32 %v1600_v44, %v3530_v17 }
 0x1b9   : > { %v1331_v7 = vadd.f32 0.014752088, %v1330_v8  ;;  %v1320_v59 = vadd.f32 0.0036580483, %v1319_v32  ;;  %v1635_v2 = vmul.f32 %v3559_v52, %v3559_v52  ;;  %v3596_v8 = vmul.f32 0.5, %v3499_v63 }
 0x1ba   : > { %v3563_v60 = vmin.f32 %v1355_v24, 16.0  ;;  %v1613_v53 = vadd.f32 0.112945676, %v1612_v19  ;;  %v1602_v30 = vadd.f32 0.05243302, %v1601_v56  ;;  %v3614_v56 = vmul.f32 0.5, %v3512_v38 }
 0x1bb   : > { %v1332_v55 = vmul.f32 %v1331_v7, %v3532_v39  ;;  %v3568_v21 = vpop.eup %2344  ;;  %v1321_v10 = vmul.f32 %v1320_v59, %v3532_v39  ;;  %v3575_v36 = vmin.f32 %v1635_v2, 16.0  ;;  %v1204_v43 = vpop.f32.mrf.mxu1 }
 0x1bc   : > { %v1357_v35 = vmul.f32 2.1237322e-06, %v3563_v60  ;;  %v1368_v25 = vmul.f32 3.8918573e-05, %v3563_v60  ;;  %v1614_v42 = vmul.f32 %v1613_v53, %v3530_v17  ;;  %v1299_v50 = vmul.f32 %v3568_v21, %v3539_v23 }
 0x1bd   : > { %v1333_v33 = vadd.f32 0.112945676, %v1332_v55  ;;  %v1322_v13 = vadd.f32 0.05243302, %v1321_v10  ;;  %v1637_v61 = vmul.f32 2.1237322e-06, %v3575_v36  ;;  %v1603_v45 = vmul.f32 %v1602_v30, %v3530_v17 }
 0x1be   : > { %v1358_v62 = vadd.f32 0.00028619796, %v1357_v35  ;;  %v1369_v4 = vadd.f32 0.001143296, %v1368_v25  ;;  %v1615_v29 = vadd.f32 0.4994258, %v1614_v42  ;;  %v3589_v54 = vadd.f32 %v3496_v48, %v1204_v43 }
 0x1bf   : > { %v1334_v20 = vmul.f32 %v1333_v33, %v3532_v39  ;;  %v1300_v31 = vsub.f32 1.0, %v1299_v50  ;;  %v1323_v34 = vmul.f32 %v1322_v13, %v3532_v39  ;;  %v1638_v1 = vadd.f32 0.00028619796, %v1637_v61 }
 0x1c0   : > { %v1370_v58 = vmul.f32 %v1369_v4, %v3563_v60  ;;  %v1359_v3 = vmul.f32 %v1358_v62, %v3563_v60  ;;  %v1616_v18 = vmul.f32 %v1615_v29, %v3530_v17  ;;  %v1604_v41 = vadd.f32 0.18741608, %v1603_v45 }
 0x1c1   : > { %v1335_v51 = vadd.f32 0.4994258, %v1334_v20  ;;  %v1301_v57 = vmul.f32 %v3568_v21, %v1300_v31  ;;  %v1648_v49 = vmul.f32 3.8918573e-05, %v3575_v36  ;;  %vm1304_vm0 = vweird.f32 %v3568_v21  ;;  %v1225_v20 = vpop.f32.mrf.mxu3 }
 0x1c2   : > { %v1371_v16 = vadd.f32 0.014752088, %v1370_v58  ;;  %v1360_v15 = vadd.f32 0.0036580483, %v1359_v3  ;;  %v1324_v7 = vadd.f32 0.18741608, %v1323_v34  ;;  %v1639_v28 = vmul.f32 %v1638_v1, %v3575_v36  ;;  %vm3621_vm6 = vmor %vm1303_vm5, %vm1304_vm0 }
 0x1c3   : > { %v1336_v46 = vmul.f32 %v1335_v51, %v3532_v39  ;;  %v3601_v40 = vadd.f32 1.0, %v1616_v18  ;;  %v1649_v59 = vadd.f32 0.001143296, %v1648_v49  ;;  %v3605_v55 = vmul.f32 0.70710677, %v3589_v54  ;;  %v1207_v61 = vpop.f32.mrf.mxu1 }
 0x1c4   : > { %v1372_v32 = vmul.f32 %v1371_v16, %v3563_v60  ;;  %v1361_v24 = vmul.f32 %v1360_v15, %v3563_v60  ;;  %v1302_v63 = vadd.f32 %v3568_v21, %v1301_v57  ;;  %v1605_v19 = vmul.f32 %v1604_v41, %v3530_v17 }
 0x1c5   : > { %v3592_v5 = vadd.f32 1.0, %v1336_v46  ;;  %v1309_v33 = vand.u32 2147483648, %v3539_v23  ;;  %v1650_v37 = vmul.f32 %v1649_v59, %v3575_v36  ;;  %v1307_v53 = vand.u32 2147483647, %v3539_v23 }
 0x1c6   : > { %v1373_v44 = vadd.f32 0.112945676, %v1372_v32  ;;  %v1325_v35 = vmul.f32 %v1324_v7, %v3532_v39  ;;  %v1640_v10 = vadd.f32 0.0036580483, %v1639_v28  ;;  %v1362_v42 = vadd.f32 0.05243302, %v1361_v24 }
 0x1c7   : > { %2346 = vrcp.f32 %v3592_v5  ;;  %v1651_v38 = vadd.f32 0.014752088, %v1650_v37  ;;  %v1395_v62 = vmul.f32 %v3605_v55, %v3605_v55  ;;  %v1287_v23 = vmul.f32 %v1286_v0, %v3502_v27 }
 0x1c8   : > { %v1374_v2 = vmul.f32 %v1373_v44, %v3563_v60  ;;  %2348 = vrcp.f32 %v3601_v40  ;;  %v1306_v39 = vsel %vm3621_vm6, %v3568_v21, %v1302_v63  ;;  %v3633_v4 = vmul.f32 0.5, %v3516_v47 }
 0x1c9   : > { %v1606_v50 = vadd.f32 1.1283791, %v1605_v19  ;;  %v1310_v51 = vor.u32 1.1754944e-38, %v1309_v33  ;;  %v1652_v30 = vmul.f32 %v1651_v38, %v3575_v36  ;;  %v3636_v14 = vmin.f32 %v1395_v62, 16.0 }
 0x1ca   : > { %v1375_v25 = vadd.f32 0.4994258, %v1374_v2  ;;  %v3639_v58 = vadd.f32 %v3496_v48, %v1225_v20  ;;  %vm1308_vm7 = vcmp.eq.f32.partialorder %v1307_v53, 8.507059e+37  ;;  %v3644_v27 = vmul.f32 0.5, %v3542_v22 }
 0x1cb   : > { %v1641_v47 = vmul.f32 %v1640_v10, %v3575_v36  ;;  %v1311_v29 = vsel %vm1308_vm7, %v1310_v51, %v1306_v39  ;;  %v1326_v3 = vadd.f32 1.1283791, %v1325_v35  ;;  %v1363_v31 = vmul.f32 %v1362_v42, %v3563_v60 }
 0x1cc   : > { %v1376_v21 = vmul.f32 %v1375_v25, %v3563_v60  ;;  %v1653_v46 = vadd.f32 0.112945676, %v1652_v30  ;;  %v1349_v45 = vand.u32 2147483648, %v3592_v5  ;;  %v3651_v16 = vmul.f32 %v1606_v50, %v3519_v26 }
 0x1cd   : > { %v3641_v13 = vpop.eup %2346  ;;  %v3654_v43 = vmul.f32 0.5, %v3547_v12  ;;  %v1397_v22 = vmul.f32 2.1237322e-06, %v3636_v14  ;;  %v3663_v18 = vmul.f32 0.70710677, %v3639_v58  ;;  %v3666_v15 = vadd.f32 %v3496_v48, %v1207_v61 }
 0x1ce   : > { %v3657_v9 = vpop.eup %2348  ;;  %v1339_v34 = vmul.f32 %v3641_v13, %v3592_v5  ;;  %v1654_v1 = vmul.f32 %v1653_v46, %v3575_v36  ;;  %v3668_v26 = vmul.f32 %v1311_v29, %v1287_v23  ;;  %v1347_v12 = vand.u32 2147483647, %v3592_v5  ;;  %v1228_v23 = vpop.f32.mrf.mxu3 }
 0x1cf   : > { %v3671_v57 = vadd.f32 1.0, %v1376_v21  ;;  %v1642_v41 = vadd.f32 0.05243302, %v1641_v47  ;;  %v3674_v32 = vmul.f32 %v1326_v3, %v3522_v11  ;;  %v1627_v0 = vand.u32 2147483647, %v3601_v40 }
 0x1d0   : > { %v1629_v49 = vand.u32 2147483648, %v3601_v40  ;;  %v1364_v7 = vadd.f32 0.18741608, %v1363_v31  ;;  %v1619_v44 = vmul.f32 %v3657_v9, %v3601_v40  ;;  %v1655_v28 = vadd.f32 0.4994258, %v1654_v1 }
 0x1d1   : > { %v1398_v24 = vadd.f32 0.00028619796, %v1397_v22  ;;  %v1408_v59 = vmul.f32 3.8918573e-05, %v3636_v14  ;;  %v1340_v63 = vsub.f32 1.0, %v1339_v34  ;;  %v3681_v19 = vor.u32 1.1754944e-38, %v1349_v45 }
 0x1d2   : > { %v1675_v2 = vmul.f32 %v3663_v18, %v3663_v18  ;;  %v3686_v11 = vmul.f32 0.70710677, %v3666_v15  ;;  %2350 = vrcp.f32 %v3671_v57  ;;  %v1643_v33 = vmul.f32 %v1642_v41, %v3575_v36 }
 0x1d3   : > { %v1656_v37 = vmul.f32 %v1655_v28, %v3575_v36  ;;  %v1409_v53 = vadd.f32 0.001143296, %v1408_v59  ;;  %vm1343_vm8 = vweird.f32 %v3592_v5  ;;  %v3692_v35 = vor.u32 1.1754944e-38, %v1629_v49 }
 0x1d4   : > { %v1365_v25 = vmul.f32 %v1364_v7, %v3563_v60  ;;  %v3695_v10 = vmin.f32 %v1675_v2, 16.0  ;;  %v1435_v20 = vmul.f32 %v3686_v11, %v3686_v11  ;;  %v1620_v17 = vsub.f32 1.0, %v1619_v44 }
 0x1d5   : > { %v3699_v42 = vadd.f32 1.0, %v1656_v37  ;;  %v1399_v38 = vmul.f32 %v1398_v24, %v3636_v14  ;;  %v1410_v62 = vmul.f32 %v1409_v53, %v3636_v14  ;;  %v1341_v39 = vmul.f32 %v3641_v13, %v1340_v63 }
 0x1d6   : > { %v1677_v50 = vmul.f32 2.1237322e-06, %v3695_v10  ;;  %v1688_v51 = vmul.f32 3.8918573e-05, %v3695_v10  ;;  %v3706_v60 = vmin.f32 %v1435_v20, 16.0  ;;  %vm1344_vm9 = vweird.f32 %v3641_v13 }
 0x1d7   : > { %v1644_v30 = vadd.f32 0.18741608, %v1643_v33  ;;  %2352 = vrcp.f32 %v3699_v42  ;;  %v3711_v21 = vmul.f32 0.5, %v3589_v54  ;;  %vm1624_vm10 = vweird.f32 %v3657_v9  ;;  %vm3745_vm12 = vmor %vm1343_vm8, %vm1344_vm9 }
 0x1d8   : > { %v1411_v47 = vadd.f32 0.014752088, %v1410_v62  ;;  %v1678_v61 = vadd.f32 0.00028619796, %v1677_v50  ;;  %v3715_v29 = vadd.f32 %v3496_v48, %v1228_v23  ;;  %v3717_v3 = vpop.eup %2350  ;;  %v1621_v31 = vmul.f32 %v3657_v9, %v1620_v17 }
 0x1d9   : > { %v1400_v46 = vadd.f32 0.0036580483, %v1399_v38  ;;  %v1689_v45 = vadd.f32 0.001143296, %v1688_v51  ;;  %v1437_v22 = vmul.f32 2.1237322e-06, %v3706_v60  ;;  %v1342_v34 = vadd.f32 %v3641_v13, %v1341_v39 }
 0x1da   : > { %vm3722_vm11 = vcmp.eq.f32.partialorder %v1347_v12, 8.507059e+37  ;;  %v1366_v1 = vadd.f32 1.1283791, %v1365_v25  ;;  %v1412_v41 = vmul.f32 %v1411_v47, %v3636_v14  ;;  %v1679_v49 = vmul.f32 %v1678_v61, %v3695_v10 }
 0x1db   : > { %v1645_v7 = vmul.f32 %v1644_v30, %v3575_v36  ;;  %v1690_v44 = vmul.f32 %v1689_v45, %v3695_v10  ;;  %v1438_v28 = vadd.f32 0.00028619796, %v1437_v22  ;;  %v1448_v24 = vmul.f32 3.8918573e-05, %v3706_v60 }
 0x1dc   : > { %v1379_v59 = vmul.f32 %v3717_v3, %v3671_v57  ;;  %v1413_v63 = vadd.f32 0.112945676, %v1412_v41  ;;  %v3734_v12 = vmul.f32 0.5, %v3639_v58  ;;  %v3737_v2 = vmul.f32 0.70710677, %v3715_v29 }
 0x1dd   : > { %v3739_v33 = vpop.eup %2352  ;;  %v1622_v37 = vadd.f32 %v3657_v9, %v1621_v31  ;;  %v1401_v53 = vmul.f32 %v1400_v46, %v3636_v14  ;;  %v1691_v25 = vadd.f32 0.014752088, %v1690_v44  ;;  %v1449_v58 = vadd.f32 0.001143296, %v1448_v24 }
 0x1de   : > { %v1346_v20 = vsel %vm3745_vm12, %v3641_v13, %v1342_v34  ;;  %vm3756_vm13 = vcmp.eq.f32.partialorder %v1627_v0, 8.507059e+37  ;;  %v1387_v5 = vand.u32 2147483647, %v3671_v57  ;;  %v1680_v38 = vadd.f32 0.0036580483, %v1679_v49 }
 0x1df   : > { %v1439_v62 = vmul.f32 %v1438_v28, %v3706_v60  ;;  %v1389_v23 = vand.u32 2147483648, %v3671_v57  ;;  %v1646_v39 = vadd.f32 1.1283791, %v1645_v7  ;;  %v1414_v50 = vmul.f32 %v1413_v63, %v3636_v14 }
 0x1e0   : > { %v1692_v51 = vmul.f32 %v1691_v25, %v3695_v10  ;;  %v1380_v30 = vsub.f32 1.0, %v1379_v59  ;;  %v1659_v13 = vmul.f32 %v3739_v33, %v3699_v42  ;;  %v1450_v0 = vmul.f32 %v1449_v58, %v3706_v60 }
 0x1e1   : > { %v1715_v47 = vmul.f32 %v3737_v2, %v3737_v2  ;;  %vm1623_vm14 = vweird.f32 %v3601_v40  ;;  %v1402_v61 = vadd.f32 0.05243302, %v1401_v53  ;;  %v1415_v31 = vadd.f32 0.4994258, %v1414_v50 }
 0x1e2   : > { %v1693_v46 = vadd.f32 0.112945676, %v1692_v51  ;;  %vm3773_vm15 = vmor %vm1623_vm14, %vm1624_vm10  ;;  %v1681_v22 = vmul.f32 %v1680_v38, %v3695_v10  ;;  %v1440_v34 = vadd.f32 0.0036580483, %v1439_v62  ;;  %v1451_v41 = vadd.f32 0.014752088, %v1450_v0  ;;  %v1210_v0 = vpop.f32.mrf.mxu1 }
 0x1e3   : > { %v3778_v49 = vmin.f32 %v1715_v47, 16.0  ;;  %v1351_v7 = vsel %vm3722_vm11, %v3681_v19, %v1346_v20  ;;  %v1626_v40 = vsel %vm3773_vm15, %v3657_v9, %v1622_v37  ;;  %v1416_v44 = vmul.f32 %v1415_v31, %v3636_v14 }
 0x1e4   : > { %v1694_v28 = vmul.f32 %v1693_v46, %v3695_v10  ;;  %v1660_v24 = vsub.f32 1.0, %v1659_v13  ;;  %v1452_v59 = vmul.f32 %v1451_v41, %v3706_v60  ;;  %v3792_v53 = vmul.f32 %v1366_v1, %v3554_v6 }
 0x1e5   : > { %v1717_v63 = vmul.f32 2.1237322e-06, %v3778_v49  ;;  %v1728_v36 = vmul.f32 3.8918573e-05, %v3778_v49  ;;  %v1381_v19 = vmul.f32 %v3717_v3, %v1380_v30  ;;  %v1403_v54 = vmul.f32 %v1402_v61, %v3636_v14 }
 0x1e6   : > { %v1695_v25 = vadd.f32 0.4994258, %v1694_v28  ;;  %v1682_v9 = vadd.f32 0.05243302, %v1681_v22  ;;  %v1441_v37 = vmul.f32 %v1440_v34, %v3706_v60  ;;  %v1453_v58 = vadd.f32 0.112945676, %v1452_v59  ;;  %v1231_v59 = vpop.f32.mrf.mxu3 }
 0x1e7   : > { %v1729_v20 = vadd.f32 0.001143296, %v1728_v36  ;;  %v3798_v38 = vmul.f32 %v1351_v7, %v3674_v32  ;;  %v1631_v62 = vsel %vm3756_vm13, %v3692_v35, %v1626_v40  ;;  %vm1383_vm1 = vweird.f32 %v3671_v57 }
 0x1e8   : > { %v3804_v6 = vadd.f32 1.0, %v1416_v44  ;;  %vm3806_vm2 = vcmp.eq.f32.partialorder %v1387_v5, 8.507059e+37  ;;  %v1390_v50 = vor.u32 1.1754944e-38, %v1389_v23  ;;  %v3811_v51 = vmul.f32 %v1646_v39, %v3559_v52 }
 0x1e9   : > { %v1661_v30 = vmul.f32 %v3739_v33, %v1660_v24  ;;  %v1718_v32 = vadd.f32 0.00028619796, %v1717_v63  ;;  %vm1384_vm3 = vweird.f32 %v3717_v3  ;;  %v1404_v13 = vadd.f32 0.18741608, %v1403_v54 }
 0x1ea   : > { %v1696_v35 = vmul.f32 %v1695_v25, %v3695_v10  ;;  %v1454_v17 = vmul.f32 %v1453_v58, %v3706_v60  ;;  %v1382_v5 = vadd.f32 %v3717_v3, %v1381_v19  ;;  %v1683_v47 = vmul.f32 %v1682_v9, %v3695_v10  ;;  %vm3834_vm0 = vmor %vm1383_vm1, %vm1384_vm3 }
 0x1eb   : > { %v1442_v61 = vadd.f32 0.05243302, %v1441_v37  ;;  %v1730_v23 = vmul.f32 %v1729_v20, %v3778_v49  ;;  %v1667_v52 = vand.u32 2147483647, %v3699_v42  ;;  %v1669_v39 = vand.u32 2147483648, %v3699_v42 }
 0x1ec   : > { %2354 = vrcp.f32 %v3804_v6  ;;  %v1455_v31 = vadd.f32 0.4994258, %v1454_v17  ;;  %v1662_v46 = vadd.f32 %v3739_v33, %v1661_v30  ;;  %vm1664_vm4 = vweird.f32 %v3739_v33 }
 0x1ed   : > { %v1719_v45 = vmul.f32 %v1718_v32, %v3778_v49  ;;  %v1211_v22 = vadd.f32 %v3496_v48, %v1210_v0  ;;  %v3828_v34 = vmul.f32 %v1631_v62, %v3651_v16  ;;  %vm1663_vm5 = vweird.f32 %v3699_v42 }
 0x1ee   : > { %v1405_v7 = vmul.f32 %v1404_v13, %v3636_v14  ;;  %v3840_v40 = vadd.f32 1.0, %v1696_v35  ;;  %v1386_v44 = vsel %vm3834_vm0, %v3717_v3, %v1382_v5  ;;  %v1684_v16 = vadd.f32 0.18741608, %v1683_v47  ;;  %vm3846_vm6 = vmor %vm1663_vm5, %vm1664_vm4 }
 0x1ef   : > { %v1443_v28 = vmul.f32 %v1442_v61, %v3706_v60  ;;  %v1731_v24 = vadd.f32 0.014752088, %v1730_v23  ;;  %vm3850_vm7 = vcmp.eq.f32.partialorder %v1667_v52, 8.507059e+37  ;;  %v1670_v14 = vor.u32 1.1754944e-38, %v1669_v39 }
 0x1f0   : > { %v3855_v42 = vmul.f32 0.5, %v3666_v15  ;;  %v1456_v36 = vmul.f32 %v1455_v31, %v3706_v60  ;;  %v1666_v3 = vsel %vm3846_vm6, %v3739_v33, %v1662_v46  ;;  %v1720_v19 = vadd.f32 0.0036580483, %v1719_v45 }
 0x1f1   : > { %v1732_v54 = vmul.f32 %v1731_v24, %v3778_v49  ;;  %v3862_v25 = vmul.f32 0.70710677, %v1211_v22  ;;  %v1391_v37 = vsel %vm3806_vm2, %v1390_v50, %v1386_v44  ;;  %v1406_v58 = vadd.f32 1.1283791, %v1405_v7 }
 0x1f2   : > { %v3864_v9 = vpop.eup %2354  ;;  %2356 = vrcp.f32 %v3840_v40  ;;  %v3870_v15 = vadd.f32 %v3496_v48, %v1231_v59  ;;  %v1685_v20 = vmul.f32 %v1684_v16, %v3695_v10  ;;  %v1444_v62 = vadd.f32 0.18741608, %v1443_v28 }
 0x1f3   : > { %v1733_v33 = vadd.f32 0.112945676, %v1732_v54  ;;  %v1475_v30 = vmul.f32 %v3862_v25, %v3862_v25  ;;  %v1671_v32 = vsel %vm3850_vm7, %v1670_v14, %v1666_v3  ;;  %v1429_v13 = vand.u32 2147483648, %v3804_v6 }
 0x1f4   : > { %v3878_v1 = vadd.f32 1.0, %v1456_v36  ;;  %v3881_v50 = vmul.f32 0.5, %v3715_v29  ;;  %v1419_v35 = vmul.f32 %v3864_v9, %v3804_v6  ;;  %v1721_v10 = vmul.f32 %v1720_v19, %v3778_v49  ;;  %v1213_v36 = vpop.f32.mrf.mxu1 }
 0x1f5   : > { %v1734_v17 = vmul.f32 %v1733_v33, %v3778_v49  ;;  %v3887_v0 = vmin.f32 %v1475_v30, 16.0  ;;  %v3890_v5 = vmul.f32 %v1391_v37, %v3792_v53  ;;  %v3893_v47 = vmul.f32 %v1406_v58, %v3605_v55 }
 0x1f6   : > { %v1427_v61 = vand.u32 2147483647, %v3804_v6  ;;  %v3897_v29 = vmul.f32 0.70710677, %v3870_v15  ;;  %v1686_v23 = vadd.f32 1.1283791, %v1685_v20  ;;  %v1445_v52 = vmul.f32 %v1444_v62, %v3706_v60  ;;  %v1234_v62 = vpop.f32.mrf.mxu3 }
 0x1f7   : > { %v1735_v39 = vadd.f32 0.4994258, %v1734_v17  ;;  %v1477_v31 = vmul.f32 2.1237322e-06, %v3887_v0  ;;  %v3904_v45 = vmul.f32 %v1671_v32, %v3811_v51  ;;  %2358 = vrcp.f32 %v3878_v1 }
 0x1f8   : > { %v3901_v46 = vpop.eup %2356  ;;  %v1488_v55 = vmul.f32 3.8918573e-05, %v3887_v0  ;;  %v1755_v53 = vmul.f32 %v3897_v29, %v3897_v29  ;;  %v1420_v41 = vsub.f32 1.0, %v1419_v35  ;;  %v3910_v7 = vor.u32 1.1754944e-38, %v1429_v13 }
 0x1f9   : > { %v1722_v44 = vadd.f32 0.05243302, %v1721_v10  ;;  %v3912_v60 = vmul.f32 0.5, %v1211_v22  ;;  %v1709_v16 = vand.u32 2147483648, %v3840_v40  ;;  %v1736_v28 = vmul.f32 %v1735_v39, %v3778_v49 }
 0x1fa   : > { %v1478_v24 = vadd.f32 0.00028619796, %v1477_v31  ;;  %v1489_v51 = vadd.f32 0.001143296, %v1488_v55  ;;  %vm1423_vm8 = vweird.f32 %v3804_v6  ;;  %v3918_v59 = vmul.f32 %v1686_v23, %v3663_v18 }
 0x1fb   : > { %v1699_v57 = vmul.f32 %v3901_v46, %v3840_v40  ;;  %v1446_v63 = vadd.f32 1.1283791, %v1445_v52  ;;  %v3922_v14 = vmin.f32 %v1755_v53, 16.0  ;;  %v1707_v22 = vand.u32 2147483647, %v3840_v40 }
 0x1fc   : > { %v3925_v3 = vadd.f32 1.0, %v1736_v28  ;;  %v1479_v19 = vmul.f32 %v1478_v24, %v3887_v0  ;;  %v1490_v54 = vmul.f32 %v1489_v51, %v3887_v0  ;;  %v1421_v37 = vmul.f32 %v3864_v9, %v1420_v41 }
 0x1fd   : > { %v1723_v18 = vmul.f32 %v1722_v44, %v3778_v49  ;;  %v1757_v58 = vmul.f32 2.1237322e-06, %v3922_v14  ;;  %v1768_v20 = vmul.f32 3.8918573e-05, %v3922_v14  ;;  %v3933_v33 = vpop.eup %2358  ;;  %vm1424_vm9 = vweird.f32 %v3864_v9 }
 0x1fe   : > { %v3936_v30 = vor.u32 1.1754944e-38, %v1709_v16  ;;  %2360 = vrcp.f32 %v3925_v3  ;;  %v3940_v32 = vadd.f32 %v3496_v48, %v1213_v36  ;;  %vm3942_vm10 = vcmp.eq.f32.partialorder %v1427_v61, 8.507059e+37  ;;  %vm3973_vm13 = vmor %vm1423_vm8, %vm1424_vm9 }
 0x1ff   : > { %v1700_v35 = vsub.f32 1.0, %v1699_v57  ;;  %v3947_v10 = vmul.f32 %v1446_v63, %v3686_v11  ;;  %v1480_v17 = vadd.f32 0.0036580483, %v1479_v19  ;;  %v1491_v23 = vadd.f32 0.014752088, %v1490_v54 }
 0x200   : > { %v1467_v52 = vand.u32 2147483647, %v3878_v1  ;;  %v1758_v39 = vadd.f32 0.00028619796, %v1757_v58  ;;  %v1769_v31 = vadd.f32 0.001143296, %v1768_v20  ;;  %v3951_v55 = vadd.f32 %v3496_v48, %v1234_v62 }
 0x201   : > { %v1422_v53 = vadd.f32 %v3864_v9, %v1421_v37  ;;  %vm1703_vm11 = vweird.f32 %v3840_v40  ;;  %v1459_v61 = vmul.f32 %v3933_v33, %v3878_v1  ;;  %v1724_v41 = vadd.f32 0.18741608, %v1723_v18 }
 0x202   : > { %v1492_v11 = vmul.f32 %v1491_v23, %v3887_v0  ;;  %v1481_v44 = vmul.f32 %v1480_v17, %v3887_v0  ;;  %v1759_v16 = vmul.f32 %v1758_v39, %v3922_v14  ;;  %v1770_v28 = vmul.f32 %v1769_v31, %v3922_v14 }
 0x203   : > { %v3962_v24 = vmul.f32 0.70710677, %v3940_v32  ;;  %v1701_v51 = vmul.f32 %v3901_v46, %v1700_v35  ;;  %vm1704_vm12 = vweird.f32 %v3901_v46  ;;  %v1469_v57 = vand.u32 2147483648, %v3878_v1 }
 0x204   : > { %v1493_v63 = vadd.f32 0.112945676, %v1492_v11  ;;  %v3967_v36 = vpop.eup %2360  ;;  %v1760_v54 = vadd.f32 0.0036580483, %v1759_v16  ;;  %v1771_v37 = vadd.f32 0.014752088, %v1770_v28  ;;  %v1426_v20 = vsel %vm3973_vm13, %v3864_v9, %v1422_v53  ;;  %vm4012_vm1 = vmor %vm1703_vm11, %vm1704_vm12 }
 0x205   : > { %v1515_v18 = vmul.f32 %v3962_v24, %v3962_v24  ;;  %v3980_v58 = vmul.f32 0.70710677, %v3951_v55  ;;  %v1460_v62 = vsub.f32 1.0, %v1459_v61  ;;  %v1725_v35 = vmul.f32 %v1724_v41, %v3778_v49 }
 0x206   : > { %v1494_v6 = vmul.f32 %v1493_v63, %v3887_v0  ;;  %vm3987_vm14 = vcmp.eq.f32.partialorder %v1707_v22, 8.507059e+37  ;;  %v1482_v23 = vadd.f32 0.05243302, %v1481_v44  ;;  %v1772_v39 = vmul.f32 %v1771_v37, %v3922_v14 }
 0x207   : > { %v3992_v31 = vmin.f32 %v1515_v18, 16.0  ;;  %v1795_v11 = vmul.f32 %v3980_v58, %v3980_v58  ;;  %v1702_v16 = vadd.f32 %v3901_v46, %v1701_v51  ;;  %vm1463_vm15 = vweird.f32 %v3878_v1 }
 0x208   : > { %v1470_v9 = vor.u32 1.1754944e-38, %v1469_v57  ;;  %v1739_v49 = vmul.f32 %v3967_v36, %v3925_v3  ;;  %v1495_v22 = vadd.f32 0.4994258, %v1494_v6  ;;  %v1431_v53 = vsel %vm3942_vm10, %v3910_v7, %v1426_v20  ;;  %v1216_v6 = vpop.f32.mrf.mxu1 }
 0x209   : > { %v1761_v61 = vmul.f32 %v1760_v54, %v3922_v14  ;;  %v1773_v41 = vadd.f32 0.112945676, %v1772_v39  ;;  %v1517_v44 = vmul.f32 2.1237322e-06, %v3992_v31  ;;  %v1461_v28 = vmul.f32 %v3933_v33, %v1460_v62 }
 0x20a   : > { %v1726_v63 = vadd.f32 1.1283791, %v1725_v35  ;;  %v1496_v51 = vmul.f32 %v1495_v22, %v3887_v0  ;;  %v1528_v57 = vmul.f32 3.8918573e-05, %v3992_v31  ;;  %v1483_v7 = vmul.f32 %v1482_v23, %v3887_v0 }
 0x20b   : > { %v1774_v13 = vmul.f32 %v1773_v41, %v3922_v14  ;;  %v1518_v54 = vadd.f32 0.00028619796, %v1517_v44  ;;  %v4018_v37 = vmin.f32 %v1795_v11, 16.0  ;;  %v1706_v18 = vsel %vm4012_vm1, %v3901_v46, %v1702_v16 }
 0x20c   : > { %vm4023_vm2 = vcmp.eq.f32.partialorder %v1467_v52, 8.507059e+37  ;;  %v1740_v40 = vsub.f32 1.0, %v1739_v49  ;;  %v4027_v62 = vadd.f32 1.0, %v1496_v51  ;;  %v1529_v35 = vadd.f32 0.001143296, %v1528_v57 }
 0x20d   : > { %v1762_v39 = vadd.f32 0.05243302, %v1761_v61  ;;  %v1775_v23 = vadd.f32 0.4994258, %v1774_v13  ;;  %v1519_v22 = vmul.f32 %v1518_v54, %v3992_v31  ;;  %v1797_v11 = vmul.f32 2.1237322e-06, %v4018_v37 }
 0x20e   : > { %v1462_v41 = vadd.f32 %v3933_v33, %v1461_v28  ;;  %vm1464_vm3 = vweird.f32 %v3933_v33  ;;  %2362 = vrcp.f32 %v4027_v62  ;;  %v4035_v46 = vmul.f32 0.5, %v3870_v15 }
 0x20f   : > { %v4038_v52 = vmul.f32 %v1431_v53, %v3893_v47  ;;  %v4041_v16 = vmul.f32 %v1726_v63, %v3737_v2  ;;  %v1484_v49 = vadd.f32 0.18741608, %v1483_v7  ;;  %v4044_v61 = vadd.f32 %v3496_v48, %v1216_v6  ;;  %vm4054_vm4 = vmor %vm1463_vm15, %vm1464_vm3 }
 0x210   : > { %v1711_v44 = vsel %vm3987_vm14, %v3936_v30, %v1706_v18  ;;  %v1741_v28 = vmul.f32 %v3967_v36, %v1740_v40  ;;  %v1776_v51 = vmul.f32 %v1775_v23, %v3922_v14  ;;  %v1530_v15 = vmul.f32 %v1529_v35, %v3992_v31 }
 0x211   : > { %v1747_v2 = vand.u32 2147483647, %v3925_v3  ;;  %v1763_v48 = vmul.f32 %v1762_v39, %v3922_v14  ;;  %v1520_v53 = vadd.f32 0.0036580483, %v1519_v22  ;;  %v1798_v63 = vadd.f32 0.00028619796, %v1797_v11 }
 0x212   : > { %v1466_v30 = vsel %vm4054_vm4, %v3933_v33, %v1462_v41  ;;  %v4063_v17 = vadd.f32 1.0, %v1776_v51  ;;  %v1531_v57 = vadd.f32 0.014752088, %v1530_v15  ;;  %v1808_v19 = vmul.f32 3.8918573e-05, %v4018_v37 }
 0x213   : > { %v4067_v1 = vmul.f32 %v1711_v44, %v3918_v59  ;;  %v1485_v7 = vmul.f32 %v1484_v49, %v3887_v0  ;;  %v1799_v13 = vmul.f32 %v1798_v63, %v4018_v37  ;;  %v4072_v54 = vmul.f32 0.70710677, %v4044_v61 }
 0x214   : > { %v4074_v18 = vpop.eup %2362  ;;  %v1742_v40 = vadd.f32 %v3967_v36, %v1741_v28  ;;  %vm1744_vm0 = vweird.f32 %v3967_v36  ;;  %v1749_v33 = vand.u32 2147483648, %v3925_v3  ;;  %2364 = vrcp.f32 %v4063_v17 }
 0x215   : > { %v1471_v59 = vsel %vm4023_vm2, %v1470_v9, %v1466_v30  ;;  %v1499_v0 = vmul.f32 %v4074_v18, %v4027_v62  ;;  %v1764_v35 = vadd.f32 0.18741608, %v1763_v48  ;;  %v1532_v6 = vmul.f32 %v1531_v57, %v3992_v31 }
 0x216   : > { %vm1743_vm5 = vweird.f32 %v3925_v3  ;;  %vm4086_vm6 = vcmp.eq.f32.partialorder %v1747_v2, 8.507059e+37  ;;  %v1521_v23 = vmul.f32 %v1520_v53, %v3992_v31  ;;  %v1809_v22 = vadd.f32 0.001143296, %v1808_v19 }
 0x217   : > { %vm4091_vm7 = vmor %vm1743_vm5, %vm1744_vm0  ;;  %v1486_v9 = vadd.f32 1.1283791, %v1485_v7  ;;  %v1533_v20 = vadd.f32 0.112945676, %v1532_v6  ;;  %v1800_v41 = vadd.f32 0.0036580483, %v1799_v13  ;;  %v1555_v49 = vmul.f32 %v4072_v54, %v4072_v54 }
 0x218   : > { %v4098_v44 = vmul.f32 %v1471_v59, %v3947_v10  ;;  %v1746_v3 = vsel %vm4091_vm7, %v3967_v36, %v1742_v40  ;;  %v1750_v28 = vor.u32 1.1754944e-38, %v1749_v33  ;;  %v1810_v51 = vmul.f32 %v1809_v22, %v4018_v37 }
 0x219   : > { %v1500_v15 = vsub.f32 1.0, %v1499_v0  ;;  %v1765_v47 = vmul.f32 %v1764_v35, %v3922_v14  ;;  %v1534_v2 = vmul.f32 %v1533_v20, %v3992_v31  ;;  %v4106_v48 = vmin.f32 %v1555_v49, 16.0  ;;  %v1237_v35 = vpop.f32.mrf.mxu3 }
 0x21a   : > { %v4108_v53 = vpop.eup %2364  ;;  %v1522_v63 = vadd.f32 0.05243302, %v1521_v23  ;;  %v4111_v10 = vmul.f32 0.5, %v3951_v55  ;;  %v1811_v30 = vadd.f32 0.014752088, %v1810_v51  ;;  %v2242_v57 = vclamps-f32 %v3668_v26, 1.0 }
 0x21b   : > { %v1751_v36 = vsel %vm4086_vm6, %v1750_v28, %v1746_v3  ;;  %v4117_v19 = vmul.f32 %v1486_v9, %v3862_v25  ;;  %v1507_v14 = vand.u32 2147483647, %v4027_v62  ;;  %v1801_v7 = vmul.f32 %v1800_v41, %v4018_v37 }
 0x21c   : > { %v1509_v13 = vand.u32 2147483648, %v4027_v62  ;;  %v1535_v40 = vadd.f32 0.4994258, %v1534_v2  ;;  %v1812_v33 = vmul.f32 %v1811_v30, %v4018_v37  ;;  %v1557_v55 = vmul.f32 2.1237322e-06, %v4106_v48 }
 0x21d   : > { %v1501_v59 = vmul.f32 %v4074_v18, %v1500_v15  ;;  %v1766_v26 = vadd.f32 1.1283791, %v1765_v47  ;;  %v1779_v0 = vmul.f32 %v4108_v53, %v4063_v17  ;;  %v1568_v25 = vmul.f32 3.8918573e-05, %v4106_v48 }
 0x21e   : > { %v1523_v6 = vmul.f32 %v1522_v63, %v3992_v31  ;;  %v1536_v39 = vmul.f32 %v1535_v40, %v3992_v31  ;;  %v1813_v23 = vadd.f32 0.112945676, %v1812_v33  ;;  %v1915_v22 = vadd.f32 1.0, %v2242_v57  ;;  %v4151_v57 = vld [vmem:[%s4499_s5] ss:$0 sm:$0xff] }
 0x21f   : > { %v4131_v11 = vmul.f32 %v1751_v36, %v4041_v16  ;;  %vm1503_vm8 = vweird.f32 %v4027_v62  ;;  %v1802_v9 = vadd.f32 0.05243302, %v1801_v7  ;;  %v1558_v20 = vadd.f32 0.00028619796, %v1557_v55  ;;  %v2377_v36 = vld [vmem:[%s4498_s4] ss:$0 sm:$0xff] }
 0x220   : > { %vm4134_vm9 = vcmp.eq.f32.partialorder %v1507_v14, 8.507059e+37  ;;  %v1510_v49 = vor.u32 1.1754944e-38, %v1509_v13  ;;  %v4138_v3 = vadd.f32 1.0, %v1536_v39  ;;  %v1814_v28 = vmul.f32 %v1813_v23, %v4018_v37 }
 0x221   : > { %v1569_v51 = vadd.f32 0.001143296, %v1568_v25  ;;  %v1502_v15 = vadd.f32 %v4074_v18, %v1501_v59  ;;  %vm1504_vm10 = vweird.f32 %v4074_v18  ;;  %v1780_v16 = vsub.f32 1.0, %v1779_v0 }
 0x222   : > { %v1559_v47 = vmul.f32 %v1558_v20, %v4106_v48  ;;  %v4145_v2 = vmul.f32 %v1766_v26, %v3897_v29  ;;  %v1524_v63 = vadd.f32 0.18741608, %v1523_v6  ;;  %v1931_v30 = vmul.f32 %v1915_v22, %v3596_v8  ;;  %vm4162_vm11 = vmor %vm1503_vm8, %vm1504_vm10 }
 0x223   : > { %v4156_v14 = vadd.f32 %v2377_v36, %v1237_v35  ;;  %2366 = vrcp.f32 %v4138_v3  ;;  %v1803_v7 = vmul.f32 %v1802_v9, %v4018_v37  ;;  %v1815_v29 = vadd.f32 0.4994258, %v1814_v28  ;;  %v1240_v9 = vpop.f32.mrf.mxu3 }
 0x224   : > { %v1560_v13 = vadd.f32 0.0036580483, %v1559_v47  ;;  %vm1783_vm12 = vweird.f32 %v4063_v17  ;;  %v1787_v40 = vand.u32 2147483647, %v4063_v17  ;;  %v1570_v33 = vmul.f32 %v1569_v51, %v4106_v48 }
 0x225   : > { %vm1967_vm13 = vcmask 130048   ;;  %v1506_v55 = vsel %vm4162_vm11, %v4074_v18, %v1502_v15  ;;  %v1781_v59 = vmul.f32 %v4108_v53, %v1780_v16  ;;  %v1816_v26 = vmul.f32 %v1815_v29, %v4018_v37 }
 0x226   : > { %v1561_v62 = vmul.f32 %v1560_v13, %v4106_v48  ;;  %v1571_v0 = vadd.f32 0.014752088, %v1570_v33  ;;  %v1951_v25 = vmul.f32 %v4151_v57, %v1931_v30  ;;  %v4177_v35 = vmul.f32 0.70710677, %v4156_v14 }
 0x227   : > { %v2243_v6 = vclamps-f32 %v3798_v38, 1.0  ;;  %v1789_v39 = vand.u32 2147483648, %v4063_v17  ;;  %v1525_v23 = vmul.f32 %v1524_v63, %v3992_v31  ;;  %v1804_v22 = vadd.f32 0.18741608, %v1803_v7 }
 0x228   : > { %v4182_v18 = vadd.f32 1.0, %v1816_v26  ;;  %v1572_v20 = vmul.f32 %v1571_v0, %v4106_v48  ;;  %v1968_v28 = vsel %vm1967_vm13, %v1951_v25, 0.0  ;;  %v1835_v51 = vmul.f32 %v4177_v35, %v4177_v35 }
 0x229   : > { %v1916_v15 = vadd.f32 1.0, %v2243_v6  ;;  %v4188_v16 = vpop.eup %2366  ;;  %v1511_v38 = vsel %vm4134_vm9, %v1510_v49, %v1506_v55  ;;  %v1782_v47 = vadd.f32 %v4108_v53, %v1781_v59  ;;  %vm1784_vm14 = vweird.f32 %v4108_v53  ;;  %1969 = vadd.xlane.f32.xlu0 %v1968_v28 }
 0x22a   : > { %2368 = vrcp.f32 %v4182_v18  ;;  %vm4195_vm15 = vcmp.eq.f32.partialorder %v1787_v40, 8.507059e+37  ;;  %v1562_v63 = vadd.f32 0.05243302, %v1561_v62  ;;  %v1573_v30 = vadd.f32 0.112945676, %v1572_v20  ;;  %vm4209_vm1 = vmor %vm1783_vm12, %vm1784_vm14 }
 0x22b   : > { %v4199_v7 = vadd.f32 %v2377_v36, %v1240_v9  ;;  %v1790_v29 = vor.u32 1.1754944e-38, %v1789_v39  ;;  %v1526_v13 = vadd.f32 1.1283791, %v1525_v23  ;;  %v4201_v8 = vmin.f32 %v1835_v51, 16.0 }
 0x22c   : > { %v1932_v41 = vmul.f32 %v1916_v15, %v3633_v4  ;;  %v4205_v49 = vmul.f32 %v1511_v38, %v4117_v19  ;;  %v1539_v33 = vmul.f32 %v4188_v16, %v4138_v3  ;;  %v1805_v36 = vmul.f32 %v1804_v22, %v4018_v37 }
 0x22d   : > { %v1574_v55 = vmul.f32 %v1573_v30, %v4106_v48  ;;  %v1786_v4 = vsel %vm4209_vm1, %v4108_v53, %v1782_v47  ;;  %v1837_v19 = vmul.f32 2.1237322e-06, %v4201_v8  ;;  %v1848_v59 = vmul.f32 3.8918573e-05, %v4201_v8 }
 0x22e   : > { %v1952_v17 = vmul.f32 %v4151_v57, %v1932_v41  ;;  %v1563_v26 = vmul.f32 %v1562_v63, %v4106_v48  ;;  %v4225_v0 = vmul.f32 0.70710677, %v4199_v7  ;;  %v2250_v37 = vclamps-f32 %v3828_v34, 1.0 }
 0x22f   : > { %v1575_v62 = vadd.f32 0.4994258, %v1574_v55  ;;  %v1549_v6 = vand.u32 2147483648, %v4138_v3  ;;  %v1838_v39 = vadd.f32 0.00028619796, %v1837_v19  ;;  %v1791_v22 = vsel %vm4195_vm15, %v1790_v29, %v1786_v4 }
 0x230   : > { %v4228_v25 = vpop.eup %2368  ;;  %v1849_v53 = vadd.f32 0.001143296, %v1848_v59  ;;  %v1971_v23 = vsel %vm1967_vm13, %v1952_v17, 0.0  ;;  %v1540_v9 = vsub.f32 1.0, %v1539_v33  ;;  %v1806_v20 = vadd.f32 1.1283791, %v1805_v36 }
 0x231   : > { %v1576_v28 = vmul.f32 %v1575_v62, %v4106_v48  ;;  %1972 = vadd.xlane.f32.xlu1 %v1971_v23  ;;  %v1819_v51 = vmul.f32 %v4228_v25, %v4182_v18  ;;  %v1839_v34 = vmul.f32 %v1838_v39, %v4201_v8  ;;  %v1875_v38 = vmul.f32 %v4225_v0, %v4225_v0 }
 0x232   : > { %v1850_v15 = vmul.f32 %v1849_v53, %v4201_v8  ;;  %v1547_v47 = vand.u32 2147483647, %v4138_v3  ;;  %v1564_v63 = vadd.f32 0.18741608, %v1563_v26  ;;  %v1923_v30 = vadd.f32 1.0, %v2250_v37 }
 0x233   : > { %v4242_v31 = vadd.f32 1.0, %v1576_v28  ;;  %v4245_v29 = vmul.f32 %v1526_v13, %v3962_v24  ;;  %v1840_v41 = vadd.f32 0.0036580483, %v1839_v34  ;;  %v4247_v33 = vmin.f32 %v1875_v38, 16.0 }
 0x234   : > { %v1851_v40 = vadd.f32 0.014752088, %v1850_v15  ;;  %v4250_v36 = vmul.f32 %v1791_v22, %v4145_v2  ;;  %v1541_v55 = vmul.f32 %v4188_v16, %v1540_v9  ;;  %v4253_v4 = vor.u32 1.1754944e-38, %v1549_v6 }
 0x235   : > { %2370 = vrcp.f32 %v4242_v31  ;;  %v4257_v19 = vmul.f32 %v1806_v20, %v3980_v58  ;;  %v1820_v59 = vsub.f32 1.0, %v1819_v51  ;;  %v1877_v13 = vmul.f32 2.1237322e-06, %v4247_v33 }
 0x236   : > { %v1852_v24 = vmul.f32 %v1851_v40, %v4201_v8  ;;  %v1827_v17 = vand.u32 2147483647, %v4182_v18  ;;  %v1841_v26 = vmul.f32 %v1840_v41, %v4201_v8  ;;  %v1888_v2 = vmul.f32 3.8918573e-05, %v4247_v33 }
 0x237   : > { %v1939_v62 = vmul.f32 %v1923_v30, %v3614_v56  ;;  %vm1544_vm2 = vweird.f32 %v4188_v16  ;;  %v1829_v37 = vand.u32 2147483648, %v4182_v18  ;;  %v1565_v58 = vmul.f32 %v1564_v63, %v4106_v48 }
 0x238   : > { %v1853_v6 = vadd.f32 0.112945676, %v1852_v24  ;;  %v2244_v39 = vclamps-f32 %v3890_v5, 1.0  ;;  %v4270_v53 = vadd.f32 %v4188_v16, %v1541_v55  ;;  %vm1823_vm3 = vweird.f32 %v4182_v18 }
 0x239   : > { %v1878_v23 = vadd.f32 0.00028619796, %v1877_v13  ;;  %v1889_v22 = vadd.f32 0.001143296, %v1888_v2  ;;  %v1959_v9 = vmul.f32 %v4151_v57, %v1939_v62  ;;  %vm1543_vm4 = vweird.f32 %v4138_v3 }
 0x23a   : > { %v1821_v56 = vmul.f32 %v4228_v25, %v1820_v59  ;;  %vm1824_vm0 = vweird.f32 %v4228_v25  ;;  %v1854_v48 = vmul.f32 %v1853_v6, %v4201_v8  ;;  %v1917_v20 = vadd.f32 1.0, %v2244_v39  ;;  %vm4320_vm8 = vmor %vm1543_vm4, %vm1544_vm2 }
 0x23b   : > { %v4278_v28 = vpop.eup %2370  ;;  %v1842_v5 = vadd.f32 0.05243302, %v1841_v26  ;;  %v1879_v51 = vmul.f32 %v1878_v23, %v4247_v33  ;;  %v1890_v34 = vmul.f32 %v1889_v22, %v4247_v33  ;;  %v1992_v15 = vsel %vm1967_vm13, %v1959_v9, 0.0  ;;  %vm4310_vm7 = vmor %vm1823_vm3, %vm1824_vm0 }
 0x23c   : > { %v1579_v38 = vmul.f32 %v4278_v28, %v4242_v31  ;;  %v1587_v63 = vand.u32 2147483647, %v4242_v31  ;;  %v1589_v30 = vand.u32 2147483648, %v4242_v31  ;;  %v1855_v41 = vadd.f32 0.4994258, %v1854_v48  ;;  %1993 = vadd.xlane.f32.xlu2 %v1992_v15 }
 0x23d   : > { %vm4287_vm5 = vcmp.eq.f32.partialorder %v1827_v17, 8.507059e+37  ;;  %v1880_v55 = vadd.f32 0.0036580483, %v1879_v51  ;;  %v1891_v59 = vadd.f32 0.014752088, %v1890_v34  ;;  %v1933_v24 = vmul.f32 %v1917_v20, %v3644_v27 }
 0x23e   : > { %v2245_v13 = vclamps-f32 %v4038_v52, 1.0  ;;  %v1822_v26 = vadd.f32 %v4228_v25, %v1821_v56  ;;  %v1580_v2 = vsub.f32 1.0, %v1579_v38  ;;  %v1856_v62 = vmul.f32 %v1855_v41, %v4201_v8 }
 0x23f   : > { %v2251_v6 = vclamps-f32 %v3904_v45, 1.0  ;;  %v1843_v39 = vmul.f32 %v1842_v5, %v4201_v8  ;;  %v1892_v17 = vmul.f32 %v1891_v59, %v4247_v33  ;;  %v1953_v23 = vmul.f32 %v4151_v57, %v1933_v24 }
 0x240   : > { %v1918_v22 = vadd.f32 1.0, %v2245_v13  ;;  %v1581_v9 = vmul.f32 %v4278_v28, %v1580_v2  ;;  %v4300_v48 = vadd.f32 1.0, %v1856_v62  ;;  %v1881_v27 = vmul.f32 %v1880_v55, %v4247_v33 }
 0x241   : > { %v1924_v52 = vadd.f32 1.0, %v2251_v6  ;;  %vm1584_vm6 = vweird.f32 %v4278_v28  ;;  %v1893_v56 = vadd.f32 0.112945676, %v1892_v17  ;;  %v1974_v20 = vsel %vm1967_vm13, %v1953_v23, 0.0 }
 0x242   : > { %v1934_v45 = vmul.f32 %v1918_v22, %v3711_v21  ;;  %v1830_v51 = vor.u32 1.1754944e-38, %v1829_v37  ;;  %v1566_v34 = vadd.f32 1.1283791, %v1565_v58  ;;  %v1582_v15 = vadd.f32 %v4278_v28, %v1581_v9  ;;  %1975 = vadd.xlane.f32.xlu1 %v1974_v20 }
 0x243   : > { %2372 = vrcp.f32 %v4300_v48  ;;  %v1826_v18 = vsel %vm4310_vm7, %v4228_v25, %v1822_v26  ;;  %vm1583_vm9 = vweird.f32 %v4242_v31  ;;  %v1844_v37 = vadd.f32 0.18741608, %v1843_v39 }
 0x244   : > { %v1894_v58 = vmul.f32 %v1893_v56, %v4247_v33  ;;  %vm4331_vm10 = vmor %vm1583_vm9, %vm1584_vm6  ;;  %v1882_v41 = vadd.f32 0.05243302, %v1881_v27  ;;  %v1954_v55 = vmul.f32 %v4151_v57, %v1934_v45  ;;  %v1940_v59 = vmul.f32 %v1924_v52, %v3654_v43 }
 0x245   : > { %v2252_v24 = vclamps-f32 %v4067_v1, 1.0  ;;  %v1546_v25 = vsel %vm4320_vm8, %v4188_v16, %v4270_v53  ;;  %vm4344_vm11 = vcmp.eq.f32.partialorder %v1547_v47, 8.507059e+37  ;;  %v1586_v13 = vsel %vm4331_vm10, %v4278_v28, %v1582_v15 }
 0x246   : > { %vm1588_vm12 = vcmp.eq.f32.partialorder %v1587_v63, 8.507059e+37  ;;  %v1590_v26 = vor.u32 1.1754944e-38, %v1589_v30  ;;  %v1831_v43 = vsel %vm4287_vm5, %v1830_v51, %v1826_v18  ;;  %v1895_v1 = vadd.f32 0.4994258, %v1894_v58 }
 0x247   : > { %v1977_v2 = vsel %vm1967_vm13, %v1954_v55, 0.0  ;;  %v1960_v16 = vmul.f32 %v4151_v57, %v1940_v59  ;;  %v1845_v3 = vmul.f32 %v1844_v37, %v4201_v8  ;;  %v1925_v47 = vadd.f32 1.0, %v2252_v24 }
 0x248   : > { %1978 = vadd.xlane.f32.xlu2 %v1977_v2  ;;  %v2253_v53 = vclamps-f32 %v4131_v11, 1.0  ;;  %v2246_v62 = vclamps-f32 %v4098_v44, 1.0  ;;  %v1567_v28 = vmul.f32 %v1566_v34, %v4072_v54  ;;  %v1591_v63 = vsel %vm1588_vm12, %v1590_v26, %v1586_v13 }
 0x249   : > { %v2373_v6 = vpop.eup %2372  ;;  %v1883_v30 = vmul.f32 %v1882_v41, %v4247_v33  ;;  %v1896_v40 = vmul.f32 %v1895_v1, %v4247_v33  ;;  %v1995_v17 = vsel %vm1967_vm13, %v1960_v16, 0.0  ;;  %v1941_v8 = vmul.f32 %v1925_v47, %v3734_v12 }
 0x24a   : > { %v1859_v39 = vmul.f32 %v2373_v6, %v4300_v48  ;;  %v2247_v23 = vclamps-f32 %v4205_v49, 1.0  ;;  %v1832_v11 = vmul.f32 %v1831_v43, %v4257_v19  ;;  %1996 = vadd.xlane.f32.xlu1 %v1995_v17  ;;  %v1926_v44 = vadd.f32 1.0, %v2253_v53 }
 0x24b   : > { %v4366_v22 = vadd.f32 1.0, %v1896_v40  ;;  %v1919_v54 = vadd.f32 1.0, %v2246_v62  ;;  %v1846_v9 = vadd.f32 1.1283791, %v1845_v3  ;;  %v1867_v52 = vand.u32 2147483647, %v4300_v48 }
 0x24c   : > { %v1860_v27 = vsub.f32 1.0, %v1859_v39  ;;  %v1961_v56 = vmul.f32 %v4151_v57, %v1941_v8  ;;  %v1592_v20 = vmul.f32 %v1591_v63, %v1567_v28  ;;  %v1869_v45 = vand.u32 2147483648, %v4300_v48 }
 0x24d   : > { %v1884_v5 = vadd.f32 0.18741608, %v1883_v30  ;;  %2374 = vrcp.f32 %v4366_v22  ;;  %vm1864_vm14 = vweird.f32 %v2373_v6  ;;  %v1942_v49 = vmul.f32 %v1926_v44, %v3881_v50 }
 0x24e   : > { %v1861_v12 = vmul.f32 %v2373_v6, %v1860_v27  ;;  %v1920_v19 = vadd.f32 1.0, %v2247_v23  ;;  %v1551_v51 = vsel %vm4344_vm11, %v4253_v4, %v1546_v25  ;;  %v1998_v34 = vsel %vm1967_vm13, %v1961_v56, 0.0 }
 0x24f   : > { %v1935_v15 = vmul.f32 %v1919_v54, %v3855_v42  ;;  %v2254_v21 = vclamps-f32 %v4250_v36, 1.0  ;;  %v1847_v18 = vmul.f32 %v1846_v9, %v4177_v35  ;;  %vm1863_vm15 = vweird.f32 %v4300_v48 }
 0x250   : > { %v1862_v37 = vadd.f32 %v2373_v6, %v1861_v12  ;;  %1999 = vadd.xlane.f32.xlu2 %v1998_v34  ;;  %v1962_v58 = vmul.f32 %v4151_v57, %v1942_v49  ;;  %vm1865_vm1 = vmor %vm1863_vm15, %vm1864_vm14  ;;  %v1870_v50 = vor.u32 1.1754944e-38, %v1869_v45  ;;  %v1885_v38 = vmul.f32 %v1884_v5, %v4247_v33 }
 0x251   : > { %v2249_v41 = vclamps-f32 %v1592_v20, 1.0  ;;  %v2255_v4 = vclamps-f32 %v1832_v11, 1.0  ;;  %vm1868_vm2 = vcmp.eq.f32.partialorder %v1867_v52, 8.507059e+37  ;;  %v1936_v36 = vmul.f32 %v1920_v19, %v3912_v60 }
 0x252   : > { %v1866_v55 = vsel %vm1865_vm1, %v2373_v6, %v1862_v37  ;;  %v2001_v42 = vsel %vm1967_vm13, %v1962_v58, 0.0  ;;  %v1552_v35 = vmul.f32 %v1551_v51, %v4245_v29  ;;  %v1955_v48 = vmul.f32 %v4151_v57, %v1935_v15 }
 0x253   : > { %v2375_v59 = vpop.eup %2374  ;;  %v1871_v24 = vsel %vm1868_vm2, %v1870_v50, %v1866_v55  ;;  %2002 = vadd.xlane.f32.xlu1 %v2001_v42  ;;  %v1927_v25 = vadd.f32 1.0, %v2254_v21  ;;  %v1250_v31 = vmul.f32 0.5, %v4044_v61  ;;  %v1922_v26 = vadd.f32 1.0, %v2249_v41  ;;  %v2020_v41 = vpop.permute.xlu0 %2019 }
 0x254   : > { %v1872_v13 = vmul.f32 %v1871_v24, %v1847_v18  ;;  %v1899_v33 = vmul.f32 %v2375_v59, %v4366_v22  ;;  %v1257_v43 = vmul.f32 0.5, %v4156_v14  ;;  %v1886_v1 = vadd.f32 1.1283791, %v1885_v38 }
 0x255   : > { %v1907_v2 = vand.u32 2147483647, %v4366_v22  ;;  %v1928_v60 = vadd.f32 1.0, %v2255_v4  ;;  %v1909_v29 = vand.u32 2147483648, %v4366_v22  ;;  %v1956_v3 = vmul.f32 %v4151_v57, %v1936_v36 }
 0x256   : > { %v1900_v16 = vsub.f32 1.0, %v1899_v33  ;;  %v2256_v47 = vclamps-f32 %v1872_v13, 1.0  ;;  %v1980_v53 = vsel %vm1967_vm13, %v1955_v48, 0.0  ;;  %v1943_v61 = vmul.f32 %v1927_v25, %v4035_v46 }
 0x257   : > { %v2248_v62 = vclamps-f32 %v1552_v35, 1.0  ;;  %v1944_v6 = vmul.f32 %v1928_v60, %v4111_v10  ;;  %vm1904_vm3 = vweird.f32 %v2375_v59  ;;  %v1938_v14 = vmul.f32 %v1922_v26, %v1250_v31 }
 0x258   : > { %v1901_v28 = vmul.f32 %v2375_v59, %v1900_v16  ;;  %1981 = vadd.xlane.f32.xlu2 %v1980_v53  ;;  %v1929_v63 = vadd.f32 1.0, %v2256_v47  ;;  %v1887_v30 = vmul.f32 %v1886_v1, %v4225_v0  ;;  %vm1903_vm4 = vweird.f32 %v4366_v22 }
 0x259   : > { %v1964_v40 = vmul.f32 %v4151_v57, %v1944_v6  ;;  %v1983_v17 = vsel %vm1967_vm13, %v1956_v3, 0.0  ;;  %vm1905_vm0 = vmor %vm1903_vm4, %vm1904_vm3  ;;  %v1910_v46 = vor.u32 1.1754944e-38, %v1909_v29  ;;  %v1963_v10 = vmul.f32 %v4151_v57, %v1943_v61 }
 0x25a   : > { %v1902_v39 = vadd.f32 %v2375_v59, %v1901_v28  ;;  %v1945_v8 = vmul.f32 %v1929_v63, %v1257_v43  ;;  %v1921_v23 = vadd.f32 1.0, %v2248_v62  ;;  %vm1908_vm5 = vcmp.eq.f32.partialorder %v1907_v2, 8.507059e+37 }
 0x25b   : > { %1984 = vadd.xlane.f32.xlu1 %v1983_v17  ;;  %v2007_v11 = vsel %vm1967_vm13, %v1964_v40, 0.0  ;;  %v1958_v0 = vmul.f32 %v4151_v57, %v1938_v14  ;;  %v1249_v9 = vmul.f32 0.5, %v3940_v32  ;;  %v2004_v56 = vsel %vm1967_vm13, %v1963_v10, 0.0 }
 0x25c   : > { %v1906_v44 = vsel %vm1905_vm0, %v2375_v59, %v1902_v39  ;;  %v1965_v54 = vmul.f32 %v4151_v57, %v1945_v8  ;;  %v1258_v12 = vmul.f32 0.5, %v4199_v7  ;;  %v2055_v55 = vlaneseq }
 0x25d   : > { %v1911_v22 = vsel %vm1908_vm5, %v1910_v46, %v1906_v44  ;;  %v1937_v20 = vmul.f32 %v1921_v23, %v1249_v9  ;;  %v1989_v45 = vsel %vm1967_vm13, %v1958_v0, 0.0  ;;  %vm2064_vm6 = vcmask 195712  }
 0x25e   : > { %v1912_v27 = vmul.f32 %v1911_v22, %v1887_v30  ;;  %v2010_v52 = vsel %vm1967_vm13, %v1965_v54, 0.0  ;;  %v4415_v36 = vand.u32 127, %v2055_v55  ;;  %vm2068_vm7 = vcmask 261312  }
 0x25f   : > { %v1957_v19 = vmul.f32 %v4151_v57, %v1937_v20  ;;  %vm2072_vm8 = vcmask 326912   ;;  %vm2076_vm9 = vcmask 392512   ;;  %vm2080_vm10 = vcmask 458112  }
 0x260   : > { %2005 = vadd.xlane.f32.xlu2 %v2004_v56  ;;  %v2257_v5 = vclamps-f32 %v1912_v27, 1.0  ;;  %v2058_v35 = vadd.s32 4294967288, %v4415_v36  ;;  %v2062_v31 = vadd.s32 4294967280, %v4415_v36  ;;  %v2066_v33 = vadd.s32 4294967272, %v4415_v36 }
 0x261   : > { %v1986_v34 = vsel %vm1967_vm13, %v1957_v19, 0.0  ;;  %v2086_v43 = vadd.s32 4294967232, %v4415_v36  ;;  %v2070_v1 = vadd.s32 4294967264, %v4415_v36  ;;  %v2074_v3 = vadd.s32 4294967256, %v4415_v36 }
 0x262   : > { %v1930_v49 = vadd.f32 1.0, %v2257_v5  ;;  %v2090_v62 = vadd.s32 4294967224, %v4415_v36  ;;  %v2094_v28 = vadd.s32 4294967216, %v4415_v36  ;;  %v2082_v14 = vadd.s32 4294967240, %v4415_v36 }
 0x263   : > { %1990 = vadd.xlane.f32.xlu1 %v1989_v45  ;;  %v2098_v30 = vadd.s32 4294967208, %v4415_v36  ;;  %v2078_v39 = vadd.s32 4294967248, %v4415_v36  ;;  %v2102_v44 = vadd.s32 4294967200, %v4415_v36  ;;  %vm2084_vm11 = vcmask 523712  }
 0x264   : > { %v1946_v51 = vmul.f32 %v1930_v49, %v1258_v12  ;;  %vm2088_vm12 = vcmask 589312   ;;  %v2106_v12 = vadd.s32 4294967192, %v4415_v36  ;;  %vm2092_vm14 = vcmask 654912  }
 0x265   : > { %vm2096_vm15 = vcmask 720512   ;;  %vm2100_vm1 = vcmask 786112   ;;  %vm2104_vm2 = vcmask 851712   ;;  %vm2108_vm3 = vcmask 917312  }
 0x266   : > { %v1966_v32 = vmul.f32 %v4151_v57, %v1946_v51  ;;  %v4413_v57 = vperm.slane %v2020_v41, 0  ;;  %vm2112_vm4 = vcmask 982912   ;;  %vm2116_vm0 = vcmask 1048512  }
 0x268   : > { %1987 = vadd.xlane.f32.xlu2 %v1986_v34  ;;  %v2013_v15 = vsel %vm1967_vm13, %v1966_v32, 0.0  ;;  %vm2060_vm13 = vcmask 130112  }
 0x269   : > { %2014 = vadd.xlane.f32.xlu0 %v2013_v15  ;;  %v2114_v15 = vadd.s32 4294967176, %v4415_v36 }
 0x26b   : > { %2008 = vadd.xlane.f32.xlu1 %v2007_v11 }
 0x270   : > { %2011 = vadd.xlane.f32.xlu2 %v2010_v52 }
 0x29c   : > { %v1970_v59 = vpop.xlane.xlu0 %1969 }
 0x29d   : > { %v2023_v25 = vadd.f32 %v4413_v57, %v1970_v59 }
 0x29f   : > { %v2057_v53 = vperm.slane %v2023_v25, %v4415_v36 }
 0x2a4   : > { %v1973_v21 = vpop.xlane.xlu1 %1972 }
 0x2a5   : > { %v2024_v24 = vadd.f32 %v4413_v57, %v1973_v21 }
 0x2a7   : > { %v2059_v16 = vperm.slane %v2024_v24, %v2058_v35 }
 0x2a9   : > { %v2061_v17 = vsel %vm2060_vm13, %v2059_v16, %v2057_v53 }
 0x2af   : > { %v1994_v18 = vpop.xlane.xlu2 %1993 }
 0x2b0   : > { %v2031_v29 = vadd.f32 %v4413_v57, %v1994_v18 }
 0x2b2   : > { %v2087_v8 = vperm.slane %v2031_v29, %v2086_v43 }
 0x2b5   : > { %v1976_v37 = vpop.xlane.xlu1 %1975 }
 0x2b6   : > { %v2025_v13 = vadd.f32 %v4413_v57, %v1976_v37 }
 0x2b8   : > { %v2063_v61 = vperm.slane %v2025_v13, %v2062_v31 }
 0x2ba   : > { %v2065_v23 = vsel %vm2064_vm6, %v2063_v61, %v2061_v17 }
 0x2bb   : > { %v1979_v58 = vpop.xlane.xlu2 %1978 }
 0x2bc   : > { %v2026_v26 = vadd.f32 %v4413_v57, %v1979_v58  ;;  %v2110_v58 = vadd.s32 4294967184, %v4415_v36 }
 0x2bd   : > { %v1997_v7 = vpop.xlane.xlu1 %1996 }
 0x2be   : > { %v2067_v6 = vperm.slane %v2026_v26, %v2066_v33  ;;  %v2032_v11 = vadd.f32 %v4413_v57, %v1997_v7 }
 0x2c0   : > { %v2069_v54 = vsel %vm2068_vm7, %v2067_v6, %v2065_v23  ;;  %v2091_v19 = vperm.slane %v2032_v11, %v2090_v62 }
 0x2c3   : > { %v2000_v50 = vpop.xlane.xlu2 %1999 }
 0x2c4   : > { %v2033_v22 = vadd.f32 %v4413_v57, %v2000_v50 }
 0x2c6   : > { %v2003_v38 = vpop.xlane.xlu1 %2002  ;;  %v2095_v18 = vperm.slane %v2033_v22, %v2094_v28 }
 0x2c7   : > { %v2034_v45 = vadd.f32 %v4413_v57, %v2003_v38 }
 0x2c9   : > { %v2099_v7 = vperm.slane %v2034_v45, %v2098_v30 }
 0x2cb   : > { %v1982_v4 = vpop.xlane.xlu2 %1981 }
 0x2cc   : > { %v2027_v2 = vadd.f32 %v4413_v57, %v1982_v4 }
 0x2ce   : > { %v1985_v42 = vpop.xlane.xlu1 %1984  ;;  %v2071_v40 = vperm.slane %v2027_v2, %v2070_v1 }
 0x2cf   : > { %v2028_v47 = vadd.f32 %v4413_v57, %v1985_v42 }
 0x2d0   : > { %v2073_v27 = vsel %vm2072_vm8, %v2071_v40, %v2069_v54 }
 0x2d1   : > { %v2075_v46 = vperm.slane %v2028_v47, %v2074_v3 }
 0x2d3   : > { %v2006_v48 = vpop.xlane.xlu2 %2005  ;;  %v2077_v5 = vsel %vm2076_vm9, %v2075_v46, %v2073_v27 }
 0x2d4   : > { %v2035_v51 = vadd.f32 %v4413_v57, %v2006_v48 }
 0x2d6   : > { %v1991_v60 = vpop.xlane.xlu1 %1990  ;;  %v2103_v4 = vperm.slane %v2035_v51, %v2102_v44 }
 0x2d7   : > { %v2030_v63 = vadd.f32 %v4413_v57, %v1991_v60 }
 0x2d9   : > { %v2083_v9 = vperm.slane %v2030_v63, %v2082_v14 }
 0x2db   : > { %v1988_v10 = vpop.xlane.xlu2 %1987 }
 0x2dc   : > { %v2029_v0 = vadd.f32 %v4413_v57, %v1988_v10  ;;  %v2015_v20 = vpop.xlane.xlu0 %2014 }
 0x2dd   : > { %v2038_v21 = vadd.f32 %v4413_v57, %v2015_v20 }
 0x2de   : > { %v2079_v52 = vperm.slane %v2029_v0, %v2078_v39  ;;  %v2009_v56 = vpop.xlane.xlu1 %2008 }
 0x2df   : > { %v2036_v49 = vadd.f32 %v4413_v57, %v2009_v56  ;;  %v2115_v35 = vperm.slane %v2038_v21, %v2114_v15 }
 0x2e0   : > { %v2081_v32 = vsel %vm2080_vm10, %v2079_v52, %v2077_v5 }
 0x2e1   : > { %v2085_v34 = vsel %vm2084_vm11, %v2083_v9, %v2081_v32  ;;  %v2107_v41 = vperm.slane %v2036_v49, %v2106_v12 }
 0x2e2   : > { %v2089_v37 = vsel %vm2088_vm12, %v2087_v8, %v2085_v34 }
 0x2e3   : > { %v2093_v50 = vsel %vm2092_vm14, %v2091_v19, %v2089_v37  ;;  %v2012_v38 = vpop.xlane.xlu2 %2011 }
 0x2e4   : > { %v2037_v55 = vadd.f32 %v4413_v57, %v2012_v38  ;;  %v2097_v42 = vsel %vm2096_vm15, %v2095_v18, %v2093_v50 }
 0x2e5   : > { %v2101_v59 = vsel %vm2100_vm1, %v2099_v7, %v2097_v42 }
 0x2e6   : > { %v2111_v36 = vperm.slane %v2037_v55, %v2110_v58  ;;  %v2105_v24 = vsel %vm2104_vm2, %v2103_v4, %v2101_v59 }
 0x2e7   : > { %v2109_v48 = vsel %vm2108_vm3, %v2107_v41, %v2105_v24 }
 0x2e8   : > { %v2113_v25 = vsel %vm2112_vm4, %v2111_v36, %v2109_v48 }
 0x2e9   : > { %v2117_v57 = vsel %vm2116_vm0, %v2115_v35, %v2113_v25 }
 0x2ea   : > { %2119 = vst [vmem:[%s273_s19] sm:$0x1] %v2117_v57 }
 0x2eb   : > { %2405 = shalt.err (!%p2402_p3)
}
 0x2ec   : > { %2268 = dma.vmem_to_hbm [thread:$0]  (%p2524_p5), %s2132_s20, 16, %s2134_s6, %s2121_s21  }
 0x2ed PF: > { %p2274_p4 = scmp.ge.s32.totalorder %s2440_s29, 2  ;;  %s2145_s14 = sand.u32 1, %s2428_s26  }
 0x2ee   : > { %s2146_s15 = scalar_lea.sflag [#allocation4], %s2145_s14 }
 0x2ef   : > { %p2271_p7 = pnand %p2274_p4, %p2528_p6 }
 0x2f1   : > { %p2272_p8 = pneg %p2271_p7 }
 0x2f3   : > { %2423 = dma.done.wait (%p2272_p8), %s2146_s15, 16  }
 0x2f4   : > { %2425 = vsyncadd (%p2272_p8), %s2146_s15, 4294967280  ;;  %p19_p9 = scmp.ge.s32.totalorder %s2511_s8, 4   ;;  %s4608_s26 = smov %s2432_s27 }
 0x2f5   : > { %s4609_s27 = smov %s2436_s28  ;;  %s4610_s28 = smov %s2522_s11 }
 0x2f6   : > { %s4611_s29 = smov %s2511_s8  ;;  %21 = sbr.rel (!%p19_p9) target bundleno = 6 (0x6), region = 83 }
 0x2fb   :  { %2151 = vsyncpa [#allocation4], 1 }
 0x2fc   :  { %2153 = vsyncpa [#allocation4 + $0x1], 1 }

// kernel: tpu_custom_call.1
= control target key start
LH: loop header
LB: loop body
LE: loop exit
PB: predicated region body
PF: predicated region fallthrough
CT: control target
= control target key end

     0   :  { %s4494_s0 = inlined_call_operand.vmem [shape: f32[256,32], index: 0, kind: input, shape index: {}]   ;;  %s4495_s1 = inlined_call_operand.vmem [shape: f32[32,32], index: 1, kind: input, shape index: {}]   ;;  %s4496_s2 = inlined_call_operand.vmem [shape: f32[1,32], index: 2, kind: input, shape index: {}]   ;;  %s4497_s3 = inlined_call_operand.vmem [shape: f32[32,16], index: 3, kind: input, shape index: {}]   ;;  %s4498_s4 = inlined_call_operand.vmem [shape: f32[1,16], index: 4, kind: input, shape index: {}]   ;;  %s4499_s5 = inlined_call_operand.vmem [shape: f32[1,16], index: 5, kind: input, shape index: {}]   ;;  %s4500_s6 = inlined_call_operand.<no memory space> [shape: f32[1,1], index: 6, kind: input, shape index: {}]   ;;  %s4501_s7 = inlined_call_operand.hbm [shape: f32[1,256], index: 7, kind: output, shape index: {}]  }
   0x1   :  { %v12_v0 = vstv %s4500_s6 }
   0x2   :  { %13 = vst [vmem:[#allocation2] sm:$0x1] %v12_v0 }
   0x3   :  { %14 = vsyncpa [#allocation4], 0 }
   0x4   :  { %16 = vsyncpa [#allocation4 + $0x1], 0  ;;  %s2486_s26 = smov 0   ;;  %s2488_s27 = smov 0  }
   0x5   :  { %s2490_s28 = smov 0   ;;  %s2492_s29 = smov 0  }
   0x6 LB: > { %s2507_s6 = sadd.s32 4294967295, %s2440_s29   ;;  %s2188_s30 = sadd.s32 4294967294, %s2440_s29   ;;  %s2440_s29 = sphi %s2492_s29, %s4611_s29   ;;  %s2436_s28 = sphi %s2490_s28, %s4610_s28   ;;  %s2432_s27 = sphi %s2488_s27, %s4609_s27   ;;  %s2428_s26 = sphi %s2486_s26, %s4608_s26  }
   0x7   : > { %s2511_s8 = sadd.s32 1, %s2440_s29   ;;  %s181_s9 = sadd.s32 1, %s2436_s28 }
   0x8   : > { %s178_s10 = ssub.s32 %s2440_s29, %s2511_s8  ;;  %p191_p0 = scmp.ne.s32.totalorder %s2436_s28, %s2432_s27 }
   0x9   : > { %p179_p1 = scmp.eq.s32.totalorder %s178_s10, 0  ;;  %p192_p2 = scmp.eq.s32.totalorder %s2507_s6, 1 }
   0xa   : > { %p197_p3 = scmp.ne.s32.totalorder %s2432_s27, %s2428_s26  ;;  %p198_p4 = scmp.eq.s32.totalorder %s2188_s30, 1 }
   0xb   : > { %s2522_s11 = scalar_select %p179_p1, %s2436_s28, %s181_s9  }
   0xc   : > { %p2524_p5 = por %p192_p2, %p191_p0  ;;  %p2528_p6 = por %p198_p4, %p197_p3 }
   0xd   : > { %p2191_p7 = scmp.ge.s32.totalorder %s2440_s29, 1  ;;  %p243_p8 = scmp.lt.s32.totalorder %s2440_s29, 3 }
   0xf   : > { %p244_p9 = pnand %p2191_p7, %p243_p8 }
  0x10   : > { %s2192_s18 = sshll.u32 (!%p244_p9), %s2507_s6, 4  ;;  %s272_s15 = sand.u32 (!%p244_p9), 1, %s2432_s27  }
  0x11   : > { %247 = sbr.rel (%p244_p9) target bundleno = 749 (0x2ed), region = 48  ;;  %p275_p10 = scmp.lt.s32.totalorder (!%p244_p9), %s2192_s18, 31 }
  0x12   : > { %s273_s19 = scalar_lea.vmem (!%p244_p9), [#allocation3], %s272_s15  ;;  %s2121_s21 = scalar_lea.sflag (!%p244_p9), [#allocation4], %s272_s15 }
  0x13   : > { %s2131_s20 = sshll.u32 (!%p244_p9), %s273_s19, 4  ;;  %s2132_s20 = int_to_ptr.vmem [resolvable:$true] %s2131_s20 }
  0x16   : > { %v299_v1 = vld [vmem:[%s4495_s1 + $0x18] sm:$0xff]  ;;  %v298_v2 = vld [vmem:[%s4495_s1 + $0x10] sm:$0xff]  ;;  %v297_v3 = vld [vmem:[%s4495_s1 + $0x8] sm:$0xff]  ;;  %s4613_s18 = smov (!%p275_p10, %s2192_s18), 31  ;;  %vm304_vm0 = vcmask 261120  }
  0x17   : > { %365 = vmatpush.msra.mxu0 %v299_v1  ;;  %2260 = vmatpush.msra.mxu2 %v299_v1  ;;  %v296_v4 = vld [vmem:[%s4495_s1] sm:$0xff]  ;;  %s2193_s23 = sshll.u32 %s4613_s18, 3  ;;  %s2129_s18 = scalar_lea.hbm %s4501_s7, %s2507_s6 }
  0x18   : > { %s2550_s30 = scalar_lea.vmem %s4494_s0, %s2193_s23  ;;  %v2587_v21 = vld [vmem:[%s4496_s2] ss:$0 sm:$0xff]  ;;  %s2133_s6 = sshll.u32 %s2129_s18, 4  ;;  %s2134_s6 = int_to_ptr.hbm [resolvable:$true] %s2133_s6 }
  0x19   : > { %366 = vmatpush.msra.mxu0 %v298_v2  ;;  %2261 = vmatpush.msra.mxu2 %v298_v2  ;;  %v280_v5 = vld [vmem:[%s2550_s30] sm:$0xff]  ;;  %v281_v7 = vld [vmem:[%s2550_s30 + $0x8] sm:$0xff]  ;;  %v282_v9 = vld [vmem:[%s2550_s30 + $0x10] sm:$0xff]  ;;  %s2392_s22 = sshra.s32 %s2134_s6, 4  ;;  %s2393_s22 = int_to_ptr.hbm [resolvable:$true] %s2392_s22 }
  0x1a   : > { %v288_v6 = vld [vmem:[%s2550_s30 + $0x40] sm:$0xff]  ;;  %v289_v8 = vld [vmem:[%s2550_s30 + $0x48] sm:$0xff]  ;;  %v290_v10 = vld [vmem:[%s2550_s30 + $0x50] sm:$0xff]  ;;  %s2394_s23 = scalar_lea.hbm %s2393_s22, 1  ;;  %p2399_p0 = scmp.lt.s32.totalorder %s2393_s22, %s4501_s7 }
  0x1b   : > { %367 = vmatpush.msra.mxu0 %v297_v3  ;;  %2262 = vmatpush.msra.mxu2 %v297_v3  ;;  %v283_v11 = vld [vmem:[%s2550_s30 + $0x18] sm:$0xff]  ;;  %v284_v13 = vld [vmem:[%s2550_s30 + $0x20] sm:$0xff]  ;;  %v285_v15 = vld [vmem:[%s2550_s30 + $0x28] sm:$0xff]  ;;  %p2395_p11 = scmp.ne.s32.totalorder %s2393_s22, %s2394_s23 }
  0x1c   : > { %v291_v12 = vld [vmem:[%s2550_s30 + $0x58] sm:$0xff]  ;;  %v292_v14 = vld [vmem:[%s2550_s30 + $0x60] sm:$0xff]  ;;  %v293_v16 = vld [vmem:[%s2550_s30 + $0x68] sm:$0xff] }
  0x1d   : > { %368 = vmatpush.msra.mxu0 %v296_v4  ;;  %2263 = vmatpush.msra.mxu2 %v296_v4  ;;  %v286_v17 = vld [vmem:[%s2550_s30 + $0x30] sm:$0xff]  ;;  %v287_v19 = vld [vmem:[%s2550_s30 + $0x38] sm:$0xff]  ;;  %p2396_p12 = pnand %p2395_p11, %p2524_p5 }
  0x1e   : > { %2194 = vmatmul.msk.f32.vlgmr.msra.gmra.mxu0 %vm304_vm0, %v280_v5  ;;  %2202 = vmatmul.msk.f32.vlgmr.msra.gmra.mxu2 %vm304_vm0, %v288_v6  ;;  %v294_v18 = vld [vmem:[%s2550_s30 + $0x70] sm:$0xff]  ;;  %v295_v20 = vld [vmem:[%s2550_s30 + $0x78] sm:$0xff]  ;;  %s2398_s30 = scalar_lea.hbm %s4501_s7, 2 }
  0x1f   : > { %p2397_p13 = pneg %p2396_p12  ;;  %p2400_p1 = scmp.lt.s32.totalorder %s2398_s30, %s2394_s23 }
  0x21   : > { %p2401_p2 = por %p2400_p1, %p2399_p0 }
  0x23   : > { %p2402_p3 = pnand %p2401_p2, %p2397_p13 }
  0x26   : > { %2195 = vmatmul.msk.f32.gmra.mxu0 %vm304_vm0, %v281_v7  ;;  %2203 = vmatmul.msk.f32.gmra.mxu2 %vm304_vm0, %v289_v8 }
  0x2e   : > { %2196 = vmatmul.msk.f32.gmra.mxu0 %vm304_vm0, %v282_v9  ;;  %2204 = vmatmul.msk.f32.gmra.mxu2 %vm304_vm0, %v290_v10 }
  0x36   : > { %2197 = vmatmul.msk.f32.gmra.mxu0 %vm304_vm0, %v283_v11  ;;  %2205 = vmatmul.msk.f32.gmra.mxu2 %vm304_vm0, %v291_v12 }
  0x3e   : > { %2198 = vmatmul.msk.f32.gmra.mxu0 %vm304_vm0, %v284_v13  ;;  %2206 = vmatmul.msk.f32.gmra.mxu2 %vm304_vm0, %v292_v14 }
  0x46   : > { %2199 = vmatmul.msk.f32.gmra.mxu0 %vm304_vm0, %v285_v15  ;;  %2207 = vmatmul.msk.f32.gmra.mxu2 %vm304_vm0, %v293_v16 }
  0x4e   : > { %2200 = vmatmul.msk.f32.gmra.mxu0 %vm304_vm0, %v286_v17  ;;  %2208 = vmatmul.msk.f32.gmra.mxu2 %vm304_vm0, %v294_v18 }
  0x56   : > { %2201 = vmatmul.msk.f32.gmra.mxu0 %vm304_vm0, %v287_v19  ;;  %2209 = vmatmul.msk.f32.gmra.mxu2 %vm304_vm0, %v295_v20 }
  0x9b   : > { %v370_v22 = vpop.f32.mrf.mxu0 }
  0x9c   : > { %v2590_v23 = vadd.f32 %v2587_v21, %v370_v22 }
  0x9e   : > { %v2593_v24 = vmul.f32 0.70710677, %v2590_v23 }
  0xa0   : > { %v450_v25 = vmul.f32 %v2593_v24, %v2593_v24 }
  0xa1   : > { %v394_v26 = vpop.f32.mrf.mxu2 }
  0xa2   : > { %v2597_v27 = vmin.f32 %v450_v25, 16.0  ;;  %v2600_v28 = vadd.f32 %v2587_v21, %v394_v26 }
  0xa3   : > { %v373_v29 = vpop.f32.mrf.mxu0 }
  0xa4   : > { %v463_v30 = vmul.f32 3.8918573e-05, %v2597_v27  ;;  %v2604_v31 = vadd.f32 %v2587_v21, %v373_v29  ;;  %v2607_v32 = vmul.f32 0.70710677, %v2600_v28  ;;  %v452_v33 = vmul.f32 2.1237322e-06, %v2597_v27 }
  0xa6   : > { %v464_v34 = vadd.f32 0.001143296, %v463_v30  ;;  %v770_v35 = vmul.f32 %v2607_v32, %v2607_v32  ;;  %v2613_v36 = vmul.f32 0.70710677, %v2604_v31  ;;  %v453_v41 = vadd.f32 0.00028619796, %v452_v33 }
  0xa8   : > { %v465_v37 = vmul.f32 %v464_v34, %v2597_v27  ;;  %v2616_v38 = vmin.f32 %v770_v35, 16.0  ;;  %v490_v39 = vmul.f32 %v2613_v36, %v2613_v36  ;;  %v454_v50 = vmul.f32 %v453_v41, %v2597_v27 }
  0xa9   : > { %v397_v40 = vpop.f32.mrf.mxu2 }
  0xaa   : > { %v466_v42 = vadd.f32 0.014752088, %v465_v37  ;;  %v2621_v43 = vadd.f32 %v2587_v21, %v397_v40  ;;  %v772_v44 = vmul.f32 2.1237322e-06, %v2616_v38  ;;  %v783_v45 = vmul.f32 3.8918573e-05, %v2616_v38 }
  0xab   : > { %v2625_v46 = vmin.f32 %v490_v39, 16.0  ;;  %v455_v61 = vadd.f32 0.0036580483, %v454_v50  ;;  %v376_v63 = vpop.f32.mrf.mxu0 }
  0xac   : > { %v467_v47 = vmul.f32 %v466_v42, %v2597_v27  ;;  %v2629_v48 = vmul.f32 0.70710677, %v2621_v43  ;;  %v784_v49 = vadd.f32 0.001143296, %v783_v45  ;;  %v773_v54 = vadd.f32 0.00028619796, %v772_v44 }
  0xad   : > { %v503_v52 = vmul.f32 3.8918573e-05, %v2625_v46  ;;  %v492_v57 = vmul.f32 2.1237322e-06, %v2625_v46  ;;  %v2645_v8 = vadd.f32 %v2587_v21, %v376_v63  ;;  %v456_v9 = vmul.f32 %v455_v61, %v2597_v27 }
  0xae   : > { %v468_v51 = vadd.f32 0.112945676, %v467_v47  ;;  %v810_v53 = vmul.f32 %v2629_v48, %v2629_v48  ;;  %v785_v55 = vmul.f32 %v784_v49, %v2616_v38  ;;  %v774_v0 = vmul.f32 %v773_v54, %v2616_v38 }
  0xaf   : > { %v504_v58 = vadd.f32 0.001143296, %v503_v52  ;;  %v493_v4 = vadd.f32 0.00028619796, %v492_v57  ;;  %v2654_v16 = vmul.f32 0.70710677, %v2645_v8 }
  0xb0   : > { %v469_v56 = vmul.f32 %v468_v51, %v2597_v27  ;;  %v2638_v59 = vmin.f32 %v810_v53, 16.0  ;;  %v786_v60 = vadd.f32 0.014752088, %v785_v55  ;;  %v775_v11 = vadd.f32 0.0036580483, %v774_v0 }
  0xb1   : > { %v505_v62 = vmul.f32 %v504_v58, %v2625_v46  ;;  %v494_v13 = vmul.f32 %v493_v4, %v2625_v46  ;;  %v457_v17 = vadd.f32 0.05243302, %v456_v9  ;;  %v530_v33 = vmul.f32 %v2654_v16, %v2654_v16  ;;  %v400_v39 = vpop.f32.mrf.mxu2 }
  0xb2   : > { %v787_v1 = vmul.f32 %v786_v60, %v2616_v38  ;;  %v823_v2 = vmul.f32 3.8918573e-05, %v2638_v59  ;;  %v470_v3 = vadd.f32 0.4994258, %v469_v56  ;;  %v776_v19 = vmul.f32 %v775_v11, %v2616_v38 }
  0xb3   : > { %v506_v5 = vadd.f32 0.014752088, %v505_v62  ;;  %v812_v20 = vmul.f32 2.1237322e-06, %v2638_v59  ;;  %v495_v25 = vadd.f32 0.0036580483, %v494_v13  ;;  %v458_v34 = vmul.f32 %v457_v17, %v2597_v27  ;;  %v379_v13 = vpop.f32.mrf.mxu0 }
  0xb4   : > { %v788_v6 = vadd.f32 0.112945676, %v787_v1  ;;  %v824_v7 = vadd.f32 0.001143296, %v823_v2  ;;  %v471_v12 = vmul.f32 %v470_v3, %v2597_v27  ;;  %v777_v35 = vadd.f32 0.05243302, %v776_v19 }
  0xb5   : > { %v507_v10 = vmul.f32 %v506_v5, %v2625_v46  ;;  %v496_v40 = vmul.f32 %v495_v25, %v2625_v46  ;;  %v813_v41 = vadd.f32 0.00028619796, %v812_v20  ;;  %v2668_v45 = vmin.f32 %v530_v33, 16.0 }
  0xb6   : > { %v825_v14 = vmul.f32 %v824_v7, %v2638_v59  ;;  %v789_v15 = vmul.f32 %v788_v6, %v2616_v38  ;;  %v2658_v22 = vadd.f32 1.0, %v471_v12  ;;  %v459_v47 = vadd.f32 0.18741608, %v458_v34 }
  0xb7   : > { %v508_v18 = vadd.f32 0.112945676, %v507_v10  ;;  %v2671_v49 = vadd.f32 %v2587_v21, %v400_v39  ;;  %v778_v50 = vmul.f32 %v777_v35, %v2616_v38  ;;  %v497_v52 = vadd.f32 0.05243302, %v496_v40 }
  0xb8   : > { %v826_v26 = vadd.f32 0.014752088, %v825_v14  ;;  %v790_v29 = vadd.f32 0.4994258, %v789_v15  ;;  %2312 = vrcp.f32 %v2658_v22  ;;  %v814_v53 = vmul.f32 %v813_v41, %v2638_v59 }
  0xb9   : > { %v509_v30 = vmul.f32 %v508_v18, %v2625_v46  ;;  %v543_v56 = vmul.f32 3.8918573e-05, %v2668_v45  ;;  %v460_v58 = vmul.f32 %v459_v47, %v2597_v27  ;;  %v532_v60 = vmul.f32 2.1237322e-06, %v2668_v45  ;;  %v403_v18 = vpop.f32.mrf.mxu2 }
  0xba   : > { %v827_v37 = vmul.f32 %v826_v26, %v2638_v59  ;;  %v791_v42 = vmul.f32 %v790_v29, %v2616_v38  ;;  %v2684_v61 = vmul.f32 0.70710677, %v2671_v49  ;;  %v779_v62 = vadd.f32 0.18741608, %v778_v50 }
  0xbb   : > { %v510_v44 = vadd.f32 0.4994258, %v509_v30  ;;  %v2688_v0 = vmul.f32 0.5, %v2590_v23  ;;  %v498_v1 = vmul.f32 %v497_v52, %v2625_v46  ;;  %v815_v2 = vadd.f32 0.0036580483, %v814_v53 }
  0xbc   : > { %v828_v51 = vadd.f32 0.112945676, %v827_v37  ;;  %v2675_v54 = vadd.f32 1.0, %v791_v42  ;;  %v544_v4 = vadd.f32 0.001143296, %v543_v56  ;;  %v2697_v6 = vmul.f32 0.5, %v2600_v28 }
  0xbd   : > { %v511_v55 = vmul.f32 %v510_v44, %v2625_v46  ;;  %v461_v5 = vadd.f32 1.1283791, %v460_v58  ;;  %v533_v7 = vadd.f32 0.00028619796, %v532_v60  ;;  %v850_v23 = vmul.f32 %v2684_v61, %v2684_v61 }
  0xbe   : > { %v2679_v57 = vpop.eup %2312  ;;  %v829_v63 = vmul.f32 %v828_v51, %v2638_v59  ;;  %2314 = vrcp.f32 %v2675_v54  ;;  %v780_v9 = vmul.f32 %v779_v62, %v2616_v38  ;;  %v2703_v10 = vmul.f32 0.5, %v2604_v31 }
  0xbf   : > { %v474_v3 = vmul.f32 %v2679_v57, %v2658_v22  ;;  %v2694_v27 = vadd.f32 1.0, %v511_v55  ;;  %v545_v12 = vmul.f32 %v544_v4, %v2668_v45  ;;  %v484_v14 = vand.u32 2147483648, %v2658_v22 }
  0xc0   : > { %v830_v11 = vadd.f32 0.4994258, %v829_v63  ;;  %v499_v15 = vadd.f32 0.18741608, %v498_v1  ;;  %v2708_v17 = vmul.f32 0.5, %v2621_v43  ;;  %v816_v28 = vmul.f32 %v815_v2, %v2638_v59 }
  0xc1   : > { %v475_v19 = vsub.f32 1.0, %v474_v3  ;;  %2316 = vrcp.f32 %v2694_v27  ;;  %v2713_v38 = vmul.f32 0.5, %v2645_v8  ;;  %v2715_v31 = vmin.f32 %v850_v23, 16.0 }
  0xc2   : > { %v2718_v20 = vmul.f32 %v461_v5, %v2593_v24  ;;  %v534_v25 = vmul.f32 %v533_v7, %v2668_v45  ;;  %v546_v26 = vadd.f32 0.014752088, %v545_v12  ;;  %v2722_v43 = vadd.f32 %v2587_v21, %v379_v13 }
  0xc3   : > { %v482_v30 = vand.u32 2147483647, %v2658_v22  ;;  %v781_v33 = vadd.f32 1.1283791, %v780_v9  ;;  %v831_v34 = vmul.f32 %v830_v11, %v2638_v59  ;;  %v2729_v8 = vadd.f32 %v2587_v21, %v403_v18 }
  0xc4   : > { %v2724_v29 = vpop.eup %2314  ;;  %v2731_v35 = vor.u32 1.1754944e-38, %v484_v14  ;;  %v500_v24 = vmul.f32 %v499_v15, %v2625_v46  ;;  %v817_v37 = vadd.f32 0.05243302, %v816_v28  ;;  %v547_v39 = vmul.f32 %v546_v26, %v2668_v45  ;;  %v382_v14 = vpop.f32.mrf.mxu0 }
  0xc5   : > { %v476_v40 = vmul.f32 %v2679_v57, %v475_v19  ;;  %vm478_vm1 = vweird.f32 %v2658_v22  ;;  %vm479_vm2 = vweird.f32 %v2679_v57  ;;  %v804_v41 = vand.u32 2147483648, %v2675_v54 }
  0xc6   : > { %v863_v42 = vmul.f32 3.8918573e-05, %v2715_v31  ;;  %v794_v44 = vmul.f32 %v2724_v29, %v2675_v54  ;;  %v535_v47 = vadd.f32 0.0036580483, %v534_v25  ;;  %v548_v50 = vadd.f32 0.112945676, %v547_v39  ;;  %vm2791_vm4 = vmor %vm478_vm1, %vm479_vm2 }
  0xc7   : > { %v2743_v46 = vmul.f32 0.70710677, %v2722_v43  ;;  %v2745_v51 = vpop.eup %2316  ;;  %v2748_v52 = vmul.f32 %v781_v33, %v2607_v32  ;;  %v2750_v53 = vadd.f32 1.0, %v831_v34  ;;  %v2753_v56 = vmul.f32 0.70710677, %v2729_v8 }
  0xc8   : > { %v864_v55 = vadd.f32 0.001143296, %v863_v42  ;;  %v802_v58 = vand.u32 2147483647, %v2675_v54  ;;  %v501_v60 = vadd.f32 1.1283791, %v500_v24  ;;  %v818_v62 = vmul.f32 %v817_v37, %v2638_v59 }
  0xc9   : > { %v852_v63 = vmul.f32 2.1237322e-06, %v2715_v31  ;;  %v477_v1 = vadd.f32 %v2679_v57, %v476_v40  ;;  %vm2759_vm3 = vcmp.eq.f32.partialorder %v482_v30, 8.507059e+37  ;;  %v2763_v32 = vor.u32 1.1754944e-38, %v804_v41 }
  0xca   : > { %v549_v3 = vmul.f32 %v548_v50, %v2668_v45  ;;  %v865_v4 = vmul.f32 %v864_v55, %v2715_v31  ;;  %v795_v5 = vsub.f32 1.0, %v794_v44  ;;  %v514_v7 = vmul.f32 %v2745_v51, %v2694_v27 }
  0xcb   : > { %v536_v23 = vmul.f32 %v535_v47, %v2668_v45  ;;  %v570_v9 = vmul.f32 %v2743_v46, %v2743_v46  ;;  %2318 = vrcp.f32 %v2750_v53  ;;  %v890_v13 = vmul.f32 %v2753_v56, %v2753_v56 }
  0xcc   : > { %v550_v11 = vadd.f32 0.4994258, %v549_v3  ;;  %v866_v12 = vadd.f32 0.014752088, %v865_v4  ;;  %v2776_v15 = vmul.f32 %v501_v60, %v2613_v36  ;;  %v819_v28 = vadd.f32 0.18741608, %v818_v62 }
  0xcd   : > { %v853_v18 = vadd.f32 0.00028619796, %v852_v63  ;;  %v2778_v19 = vmin.f32 %v570_v9, 16.0  ;;  %v522_v25 = vand.u32 2147483647, %v2694_v27  ;;  %v2782_v26 = vmul.f32 0.5, %v2671_v49 }
  0xce   : > { %v867_v30 = vmul.f32 %v866_v12, %v2715_v31  ;;  %v2785_v33 = vmin.f32 %v890_v13, 16.0  ;;  %vm798_vm5 = vweird.f32 %v2675_v54  ;;  %v551_v34 = vmul.f32 %v550_v11, %v2668_v45 }
  0xcf   : > { %v572_v24 = vmul.f32 2.1237322e-06, %v2778_v19  ;;  %v583_v49 = vmul.f32 3.8918573e-05, %v2778_v19  ;;  %v2800_v37 = vadd.f32 %v2587_v21, %v382_v14  ;;  %v481_v39 = vsel %vm2791_vm4, %v2679_v57, %v477_v1 }
  0xd0   : > { %v796_v22 = vmul.f32 %v2724_v29, %v795_v5  ;;  %v515_v40 = vsub.f32 1.0, %v514_v7  ;;  %v537_v41 = vadd.f32 0.05243302, %v536_v23  ;;  %v854_v42 = vmul.f32 %v853_v18, %v2715_v31  ;;  %v1125_v18 = vld [vmem:[%s4497_s3 + $0x18] sm:$0xff] }
  0xd1   : > { %v573_v44 = vadd.f32 0.00028619796, %v572_v24  ;;  %v584_v47 = vadd.f32 0.001143296, %v583_v49  ;;  %v903_v50 = vmul.f32 3.8918573e-05, %v2785_v33  ;;  %v2808_v55 = vpop.eup %2318  ;;  %vm799_vm6 = vweird.f32 %v2724_v29  ;;  %1190 = vmatpush.msra.mxu1 %v1125_v18  ;;  %2264 = vmatpush.msra.mxu3 %v1125_v18  ;;  %v406_v18 = vpop.f32.mrf.mxu2 }
  0xd2   : > { %v524_v60 = vand.u32 2147483648, %v2694_v27  ;;  %v868_v62 = vadd.f32 0.112945676, %v867_v30  ;;  %v892_v63 = vmul.f32 2.1237322e-06, %v2785_v33  ;;  %v486_v57 = vsel %vm2759_vm3, %v2731_v35, %v481_v39  ;;  %vm2850_vm10 = vmor %vm798_vm5, %vm799_vm6  ;;  %v1124_v30 = vld [vmem:[%s4497_s3 + $0x10] sm:$0xff] }
  0xd3   : > { %vm2816_vm7 = vcmp.eq.f32.partialorder %v802_v58, 8.507059e+37  ;;  %vm518_vm8 = vweird.f32 %v2694_v27  ;;  %v820_v3 = vmul.f32 %v819_v28, %v2638_v59  ;;  %v2822_v4 = vadd.f32 1.0, %v551_v34  ;;  %1191 = vmatpush.msra.mxu1 %v1124_v30  ;;  %2265 = vmatpush.msra.mxu3 %v1124_v30 }
  0xd4   : > { %v2825_v5 = vmul.f32 0.70710677, %v2800_v37  ;;  %v797_v7 = vadd.f32 %v2724_v29, %v796_v22  ;;  %v538_v23 = vmul.f32 %v537_v41, %v2668_v45  ;;  %v574_v2 = vmul.f32 %v573_v44, %v2778_v19 }
  0xd5   : > { %v585_v35 = vmul.f32 %v584_v47, %v2778_v19  ;;  %v516_v58 = vmul.f32 %v2745_v51, %v515_v40  ;;  %v834_v9 = vmul.f32 %v2808_v55, %v2750_v53  ;;  %v855_v11 = vadd.f32 0.0036580483, %v854_v42 }
  0xd6   : > { %v904_v59 = vadd.f32 0.001143296, %v903_v50  ;;  %v525_v12 = vor.u32 1.1754944e-38, %v524_v60  ;;  %v869_v13 = vmul.f32 %v868_v62, %v2715_v31  ;;  %v893_v28 = vadd.f32 0.00028619796, %v892_v63 }
  0xd7   : > { %v586_v14 = vadd.f32 0.014752088, %v585_v35  ;;  %vm2838_vm9 = vcmp.eq.f32.partialorder %v522_v25, 8.507059e+37  ;;  %v821_v36 = vadd.f32 1.1283791, %v820_v3  ;;  %2320 = vrcp.f32 %v2822_v4 }
  0xd8   : > { %v905_v34 = vmul.f32 %v904_v59, %v2785_v33  ;;  %v610_v24 = vmul.f32 %v2825_v5, %v2825_v5  ;;  %vm519_vm11 = vweird.f32 %v2745_v51  ;;  %v844_v25 = vand.u32 2147483648, %v2750_v53 }
  0xd9   : > { %v575_v39 = vadd.f32 0.0036580483, %v574_v2  ;;  %v587_v22 = vmul.f32 %v586_v14, %v2778_v19  ;;  %v801_v40 = vsel %vm2850_vm10, %v2724_v29, %v797_v7  ;;  %v517_v41 = vadd.f32 %v2745_v51, %v516_v58  ;;  %vm2876_vm12 = vmor %vm518_vm8, %vm519_vm11 }
  0xda   : > { %v835_v42 = vsub.f32 1.0, %v834_v9  ;;  %v539_v44 = vadd.f32 0.18741608, %v538_v23  ;;  %v856_v54 = vmul.f32 %v855_v11, %v2715_v31  ;;  %v870_v47 = vadd.f32 0.4994258, %v869_v13 }
  0xdb   : > { %v894_v50 = vmul.f32 %v893_v28, %v2785_v33  ;;  %v906_v60 = vadd.f32 0.014752088, %v905_v34  ;;  %v2864_v62 = vmul.f32 %v486_v57, %v2718_v20  ;;  %v842_v63 = vand.u32 2147483647, %v2750_v53 }
  0xdc   : > { %v588_v3 = vadd.f32 0.112945676, %v587_v22  ;;  %v2867_v2 = vmin.f32 %v610_v24, 16.0  ;;  %v806_v29 = vsel %vm2816_vm7, %v2763_v32, %v801_v40  ;;  %v2881_v20 = vmul.f32 %v821_v36, %v2629_v48 }
  0xdd   : > { %vm838_vm13 = vweird.f32 %v2750_v53  ;;  %v576_v57 = vmul.f32 %v575_v39, %v2778_v19  ;;  %v2885_v23 = vpop.eup %2320  ;;  %v521_v32 = vsel %vm2876_vm12, %v2745_v51, %v517_v41  ;;  %v836_v1 = vmul.f32 %v2808_v55, %v835_v42 }
  0xde   : > { %v845_v27 = vor.u32 1.1754944e-38, %v844_v25  ;;  %v907_v35 = vmul.f32 %v906_v60, %v2785_v33  ;;  %v540_v58 = vmul.f32 %v539_v44, %v2668_v45  ;;  %v857_v9 = vadd.f32 0.05243302, %v856_v54 }
  0xdf   : > { %v871_v48 = vmul.f32 %v870_v47, %v2715_v31  ;;  %v895_v11 = vadd.f32 0.0036580483, %v894_v50  ;;  %v2895_v59 = vmul.f32 %v806_v29, %v2748_v52  ;;  %vm2897_vm14 = vcmp.eq.f32.partialorder %v842_v63, 8.507059e+37  ;;  %v1123_v63 = vld [vmem:[%s4497_s3 + $0x8] sm:$0xff] }
  0xe0   : > { %v589_v51 = vmul.f32 %v588_v3, %v2778_v19  ;;  %v908_v14 = vadd.f32 0.112945676, %v907_v35  ;;  %v623_v28 = vmul.f32 3.8918573e-05, %v2867_v2  ;;  %v526_v45 = vsel %vm2838_vm9, %v525_v12, %v521_v32  ;;  %1192 = vmatpush.msra.mxu1 %v1123_v63  ;;  %2266 = vmatpush.msra.mxu3 %v1123_v63 }
  0xe1   : > { %vm839_vm15 = vweird.f32 %v2808_v55  ;;  %v554_v36 = vmul.f32 %v2885_v23, %v2822_v4  ;;  %v577_v52 = vadd.f32 0.05243302, %v576_v57  ;;  %v837_v34 = vadd.f32 %v2808_v55, %v836_v1  ;;  %v1122_v1 = vld [vmem:[%s4497_s3] sm:$0xff] }
  0xe2   : > { %v909_v24 = vmul.f32 %v908_v14, %v2785_v33  ;;  %v612_v49 = vmul.f32 2.1237322e-06, %v2867_v2  ;;  %v624_v25 = vadd.f32 0.001143296, %v623_v28  ;;  %v541_v39 = vadd.f32 1.1283791, %v540_v58  ;;  %vm2934_vm1 = vmor %vm838_vm13, %vm839_vm15  ;;  %1193 = vmatpush.msra.mxu1 %v1122_v1  ;;  %2267 = vmatpush.msra.mxu3 %v1122_v1 }
  0xe3   : > { %v858_v22 = vmul.f32 %v857_v9, %v2715_v31  ;;  %v2912_v40 = vadd.f32 1.0, %v871_v48  ;;  %v896_v12 = vmul.f32 %v895_v11, %v2785_v33  ;;  %v2919_v41 = vmul.f32 0.5, %v2722_v43  ;;  %v385_v48 = vpop.f32.mrf.mxu0 }
  0xe4   : > { %v590_v42 = vadd.f32 0.4994258, %v589_v51  ;;  %v2922_v44 = vmul.f32 0.5, %v2729_v8  ;;  %v2925_v54 = vadd.f32 %v2587_v21, %v406_v18  ;;  %v2928_v47 = vmul.f32 %v526_v45, %v2776_v15 }
  0xe5   : > { %v555_v43 = vsub.f32 1.0, %v554_v36  ;;  %v578_v8 = vmul.f32 %v577_v52, %v2778_v19  ;;  %v625_v60 = vmul.f32 %v624_v25, %v2867_v2  ;;  %v841_v15 = vsel %vm2934_vm1, %v2808_v55, %v837_v34  ;;  %v409_v52 = vpop.f32.mrf.mxu2 }
  0xe6   : > { %v562_v3 = vand.u32 2147483647, %v2822_v4  ;;  %v910_v53 = vadd.f32 0.4994258, %v909_v24  ;;  %v613_v29 = vadd.f32 0.00028619796, %v612_v49  ;;  %v2948_v7 = vmul.f32 %v541_v39, %v2654_v16 }
  0xe7   : > { %v859_v57 = vadd.f32 0.18741608, %v858_v22  ;;  %2322 = vrcp.f32 %v2912_v40  ;;  %v897_v32 = vadd.f32 0.05243302, %v896_v12  ;;  %v564_v35 = vand.u32 2147483648, %v2822_v4 }
  0xe8   : > { %v591_v55 = vmul.f32 %v590_v42, %v2778_v19  ;;  %v626_v58 = vadd.f32 0.014752088, %v625_v60  ;;  %v2957_v9 = vmul.f32 0.70710677, %v2925_v54  ;;  %v846_v16 = vsel %vm2897_vm14, %v845_v27, %v841_v15 }
  0xe9   : > { %v556_v11 = vmul.f32 %v2885_v23, %v555_v43  ;;  %v579_v51 = vadd.f32 0.18741608, %v578_v8  ;;  %v2963_v14 = vmul.f32 0.5, %v2800_v37  ;;  %v911_v28 = vmul.f32 %v910_v53, %v2785_v33 }
  0xea   : > { %v614_v18 = vmul.f32 %v613_v29, %v2867_v2  ;;  %v627_v45 = vmul.f32 %v626_v58, %v2867_v2  ;;  %v930_v36 = vmul.f32 %v2957_v9, %v2957_v9  ;;  %vm558_vm2 = vweird.f32 %v2822_v4 }
  0xeb   : > { %v860_v27 = vmul.f32 %v859_v57, %v2715_v31  ;;  %v898_v13 = vmul.f32 %v897_v32, %v2785_v33  ;;  %v2974_v34 = vadd.f32 %v2587_v21, %v385_v48  ;;  %vm2976_vm3 = vcmp.eq.f32.partialorder %v562_v3, 8.507059e+37 }
  0xec   : > { %v565_v24 = vor.u32 1.1754944e-38, %v564_v35  ;;  %v2980_v49 = vadd.f32 1.0, %v591_v55  ;;  %v628_v25 = vadd.f32 0.112945676, %v627_v45  ;;  %v557_v22 = vadd.f32 %v2885_v23, %v556_v11 }
  0xed   : > { %v2982_v39 = vpop.eup %2322  ;;  %vm559_vm4 = vweird.f32 %v2885_v23  ;;  %v580_v31 = vmul.f32 %v579_v51, %v2778_v19  ;;  %v2988_v12 = vadd.f32 %v2587_v21, %v409_v52  ;;  %v2990_v30 = vadd.f32 1.0, %v911_v28  ;;  %v388_v19 = vpop.f32.mrf.mxu0 }
  0xee   : > { %v615_v42 = vadd.f32 0.0036580483, %v614_v18  ;;  %v629_v50 = vmul.f32 %v628_v25, %v2867_v2  ;;  %v2993_v43 = vmin.f32 %v930_v36, 16.0  ;;  %v2996_v8 = vmul.f32 %v846_v16, %v2881_v20  ;;  %vm3003_vm5 = vmor %vm558_vm2, %vm559_vm4 }
  0xef   : > { %v861_v60 = vadd.f32 1.1283791, %v860_v27  ;;  %v899_v63 = vadd.f32 0.18741608, %v898_v13  ;;  %v2999_v15 = vmul.f32 0.70710677, %v2974_v34  ;;  %v874_v3 = vmul.f32 %v2982_v39, %v2912_v40 }
  0xf0   : > { %2324 = vrcp.f32 %v2980_v49  ;;  %v630_v53 = vadd.f32 0.4994258, %v629_v50  ;;  %v932_v20 = vmul.f32 2.1237322e-06, %v2993_v43  ;;  %v561_v29 = vsel %vm3003_vm5, %v2885_v23, %v557_v22 }
  0xf1   : > { %v943_v57 = vmul.f32 3.8918573e-05, %v2993_v43  ;;  %v650_v4 = vmul.f32 %v2999_v15, %v2999_v15  ;;  %v3018_v32 = vmul.f32 0.70710677, %v2988_v12  ;;  %v884_v1 = vand.u32 2147483648, %v2912_v40 }
  0xf2   : > { %v581_v35 = vadd.f32 1.1283791, %v580_v31  ;;  %2326 = vrcp.f32 %v2990_v30  ;;  %v616_v55 = vmul.f32 %v615_v42, %v2867_v2  ;;  %v631_v58 = vmul.f32 %v630_v53, %v2867_v2 }
  0xf3   : > { %v933_v48 = vadd.f32 0.00028619796, %v932_v20  ;;  %v944_v16 = vadd.f32 0.001143296, %v943_v57  ;;  %v3024_v23 = vmin.f32 %v650_v4, 16.0  ;;  %v566_v11 = vsel %vm2976_vm3, %v565_v24, %v561_v29 }
  0xf4   : > { %v3029_v51 = vmul.f32 %v861_v60, %v2684_v61  ;;  %v875_v28 = vsub.f32 1.0, %v874_v3  ;;  %v882_v18 = vand.u32 2147483647, %v2912_v40  ;;  %v900_v45 = vmul.f32 %v899_v63, %v2785_v33 }
  0xf5   : > { %v945_v36 = vmul.f32 %v944_v16, %v2993_v43  ;;  %v652_v52 = vmul.f32 2.1237322e-06, %v3024_v23  ;;  %v970_v27 = vmul.f32 %v3018_v32, %v3018_v32  ;;  %v3039_v25 = vor.u32 1.1754944e-38, %v884_v1 }
  0xf6   : > { %v3037_v13 = vpop.eup %2324  ;;  %v617_v37 = vadd.f32 0.05243302, %v616_v55  ;;  %v3042_v61 = vmul.f32 0.5, %v2925_v54  ;;  %v934_v24 = vmul.f32 %v933_v48, %v2993_v43  ;;  %v3046_v22 = vmul.f32 %v566_v11, %v2948_v7 }
  0xf7   : > { %vm879_vm6 = vweird.f32 %v2982_v39  ;;  %v3050_v33 = vmul.f32 %v581_v35, %v2743_v46  ;;  %v3052_v31 = vadd.f32 1.0, %v631_v58  ;;  %v876_v50 = vmul.f32 %v2982_v39, %v875_v28 }
  0xf8   : > { %v3054_v42 = vpop.eup %2326  ;;  %v604_v60 = vand.u32 2147483648, %v2980_v49  ;;  %v946_v54 = vadd.f32 0.014752088, %v945_v36  ;;  %v663_v63 = vmul.f32 3.8918573e-05, %v3024_v23  ;;  %vm878_vm7 = vweird.f32 %v2912_v40 }
  0xf9   : > { %v594_v7 = vmul.f32 %v3037_v13, %v2980_v49  ;;  %v901_v3 = vadd.f32 1.1283791, %v900_v45  ;;  %v653_v46 = vadd.f32 0.00028619796, %v652_v52  ;;  %v3062_v53 = vmin.f32 %v970_v27, 16.0  ;;  %vm3105_vm10 = vmor %vm878_vm7, %vm879_vm6 }
  0xfa   : > { %v618_v20 = vmul.f32 %v617_v37, %v2867_v2  ;;  %v935_v29 = vadd.f32 0.0036580483, %v934_v24  ;;  %v947_v57 = vmul.f32 %v946_v54, %v2993_v43  ;;  %v664_v4 = vadd.f32 0.001143296, %v663_v63 }
  0xfb   : > { %2328 = vrcp.f32 %v3052_v31  ;;  %v972_v1 = vmul.f32 2.1237322e-06, %v3062_v53  ;;  %v983_v35 = vmul.f32 3.8918573e-05, %v3062_v53  ;;  %v3070_v55 = vadd.f32 %v2587_v21, %v388_v19 }
  0xfc   : > { %v602_v58 = vand.u32 2147483647, %v2980_v49  ;;  %v914_v48 = vmul.f32 %v3054_v42, %v2990_v30  ;;  %v948_v16 = vadd.f32 0.112945676, %v947_v57  ;;  %v665_v11 = vmul.f32 %v664_v4, %v3024_v23 }
  0xfd   : > { %v595_v28 = vsub.f32 1.0, %v594_v7  ;;  %v3076_v45 = vor.u32 1.1754944e-38, %v604_v60  ;;  %v654_v36 = vmul.f32 %v653_v46, %v3024_v23  ;;  %v973_v52 = vadd.f32 0.00028619796, %v972_v1 }
  0xfe   : > { %vm3079_vm8 = vcmp.eq.f32.partialorder %v882_v18, 8.507059e+37  ;;  %v936_v37 = vmul.f32 %v935_v29, %v2993_v43  ;;  %v949_v24 = vmul.f32 %v948_v16, %v2993_v43  ;;  %v666_v54 = vadd.f32 0.014752088, %v665_v11 }
  0xff   : > { %v984_v63 = vadd.f32 0.001143296, %v983_v35  ;;  %v877_v19 = vadd.f32 %v2982_v39, %v876_v50  ;;  %v3087_v57 = vmul.f32 %v901_v3, %v2753_v56  ;;  %v619_v60 = vadd.f32 0.18741608, %v618_v20 }
 0x100   : > { %v3090_v7 = vmul.f32 0.70710677, %v3070_v55  ;;  %vm598_vm9 = vweird.f32 %v2980_v49  ;;  %v915_v18 = vsub.f32 1.0, %v914_v48  ;;  %v950_v46 = vadd.f32 0.4994258, %v949_v24 }
 0x101   : > { %v667_v4 = vmul.f32 %v666_v54, %v3024_v23  ;;  %v985_v29 = vmul.f32 %v984_v63, %v3062_v53  ;;  %v3095_v1 = vpop.eup %2328  ;;  %v596_v35 = vmul.f32 %v3037_v13, %v595_v28  ;;  %v655_v50 = vadd.f32 0.0036580483, %v654_v36 }
 0x102   : > { %v974_v56 = vmul.f32 %v973_v52, %v3062_v53  ;;  %v690_v3 = vmul.f32 %v3090_v7, %v3090_v7  ;;  %v937_v48 = vadd.f32 0.05243302, %v936_v37  ;;  %v951_v16 = vmul.f32 %v950_v46, %v2993_v43 }
 0x103   : > { %v668_v11 = vadd.f32 0.112945676, %v667_v4  ;;  %v986_v24 = vadd.f32 0.014752088, %v985_v29  ;;  %v881_v28 = vsel %vm3105_vm10, %v2982_v39, %v877_v19  ;;  %vm918_vm11 = vweird.f32 %v2990_v30 }
 0x104   : > { %v620_v36 = vmul.f32 %v619_v60, %v2867_v2  ;;  %v3115_v52 = vmin.f32 %v690_v3, 16.0  ;;  %vm3117_vm12 = vcmp.eq.f32.partialorder %v602_v58, 8.507059e+37  ;;  %v916_v37 = vmul.f32 %v3054_v42, %v915_v18 }
 0x105   : > { %v634_v54 = vmul.f32 %v3095_v1, %v3052_v31  ;;  %v669_v63 = vmul.f32 %v668_v11, %v3024_v23  ;;  %v987_v46 = vmul.f32 %v986_v24, %v3062_v53  ;;  %v922_v39 = vand.u32 2147483647, %v2990_v30 }
 0x106   : > { %v3127_v19 = vadd.f32 1.0, %v951_v16  ;;  %v656_v2 = vmul.f32 %v655_v50, %v3024_v23  ;;  %v975_v60 = vadd.f32 0.0036580483, %v974_v56  ;;  %v597_v58 = vadd.f32 %v3037_v13, %v596_v35  ;;  %v412_v56 = vpop.f32.mrf.mxu2 }
 0x107   : > { %vm599_vm13 = vweird.f32 %v3037_v13  ;;  %v938_v18 = vmul.f32 %v937_v48, %v2993_v43  ;;  %v692_v4 = vmul.f32 2.1237322e-06, %v3115_v52  ;;  %v886_v29 = vsel %vm3079_vm8, %v3039_v25, %v881_v28 }
 0x108   : > { %v924_v3 = vand.u32 2147483648, %v2990_v30  ;;  %v621_v20 = vadd.f32 1.1283791, %v620_v36  ;;  %v670_v16 = vadd.f32 0.4994258, %v669_v63  ;;  %v917_v11 = vadd.f32 %v3054_v42, %v916_v37  ;;  %vm3142_vm15 = vmor %vm598_vm9, %vm599_vm13 }
 0x109   : > { %vm919_vm14 = vweird.f32 %v3054_v42  ;;  %v635_v50 = vsub.f32 1.0, %v634_v54  ;;  %v988_v35 = vadd.f32 0.112945676, %v987_v46  ;;  %2330 = vrcp.f32 %v3127_v19 }
 0x10a   : > { %v657_v25 = vadd.f32 0.05243302, %v656_v2  ;;  %v976_v27 = vmul.f32 %v975_v60, %v3062_v53  ;;  %v703_v24 = vmul.f32 3.8918573e-05, %v3115_v52  ;;  %v3150_v28 = vmul.f32 %v886_v29, %v3029_v51  ;;  %vm3164_vm1 = vmor %vm918_vm11, %vm919_vm14 }
 0x10b   : > { %v601_v36 = vsel %vm3142_vm15, %v3037_v13, %v597_v58  ;;  %v939_v37 = vadd.f32 0.18741608, %v938_v18  ;;  %v693_v49 = vadd.f32 0.00028619796, %v692_v4  ;;  %v671_v54 = vmul.f32 %v670_v16, %v3024_v23 }
 0x10c   : > { %v989_v63 = vmul.f32 %v988_v35, %v3062_v53  ;;  %v704_v46 = vadd.f32 0.001143296, %v703_v24  ;;  %v3158_v2 = vadd.f32 %v2587_v21, %v412_v56  ;;  %vm3168_vm2 = vcmp.eq.f32.partialorder %v922_v39, 8.507059e+37 }
 0x10d   : > { %v925_v60 = vor.u32 1.1754944e-38, %v924_v3  ;;  %v3173_v58 = vmul.f32 %v621_v20, %v2825_v5  ;;  %v636_v18 = vmul.f32 %v3095_v1, %v635_v50  ;;  %v606_v4 = vsel %vm3117_vm12, %v3076_v45, %v601_v36 }
 0x10e   : > { %v921_v30 = vsel %vm3164_vm1, %v3054_v42, %v917_v11  ;;  %v658_v29 = vmul.f32 %v657_v25, %v3024_v23  ;;  %v977_v39 = vadd.f32 0.05243302, %v976_v27  ;;  %vm638_vm3 = vweird.f32 %v3052_v31 }
 0x10f   : > { %v642_v3 = vand.u32 2147483647, %v3052_v31  ;;  %v940_v5 = vmul.f32 %v939_v37, %v2993_v43  ;;  %v694_v20 = vmul.f32 %v693_v49, %v3115_v52  ;;  %v3187_v16 = vpop.eup %2330  ;;  %v3189_v50 = vadd.f32 1.0, %v671_v54 }
 0x110   : > { %v990_v45 = vadd.f32 0.4994258, %v989_v63  ;;  %v705_v40 = vmul.f32 %v704_v46, %v3115_v52  ;;  %v3193_v42 = vmul.f32 0.70710677, %v3158_v2  ;;  %v926_v11 = vsel %vm3168_vm2, %v925_v60, %v921_v30 }
 0x111   : > { %v637_v35 = vadd.f32 %v3095_v1, %v636_v18  ;;  %vm639_vm4 = vweird.f32 %v3095_v1  ;;  %v644_v43 = vand.u32 2147483648, %v3052_v31  ;;  %v659_v56 = vadd.f32 0.18741608, %v658_v29 }
 0x112   : > { %v978_v48 = vmul.f32 %v977_v39, %v3062_v53  ;;  %v706_v25 = vadd.f32 0.014752088, %v705_v40  ;;  %v1010_v27 = vmul.f32 %v3193_v42, %v3193_v42  ;;  %v941_v24 = vadd.f32 1.1283791, %v940_v5  ;;  %vm3221_vm5 = vmor %vm638_vm3, %vm639_vm4 }
 0x113   : > { %v954_v36 = vmul.f32 %v3187_v16, %v3127_v19  ;;  %v695_v37 = vadd.f32 0.0036580483, %v694_v20  ;;  %v2210_v49 = vclamps-f32 %v2864_v62, 1.0  ;;  %2332 = vrcp.f32 %v3189_v50 }
 0x114   : > { %v991_v54 = vmul.f32 %v990_v45, %v3062_v53  ;;  %v707_v63 = vmul.f32 %v706_v25, %v3115_v52  ;;  %v3209_v46 = vmin.f32 %v1010_v27, 16.0  ;;  %v3212_v51 = vmul.f32 %v606_v4, %v3050_v33 }
 0x115   : > { %v3215_v13 = vmul.f32 %v926_v11, %v3087_v57  ;;  %vm643_vm6 = vcmp.eq.f32.partialorder %v642_v3, 8.507059e+37  ;;  %v645_v60 = vor.u32 1.1754944e-38, %v644_v43  ;;  %v641_v18 = vsel %vm3221_vm5, %v3095_v1, %v637_v35  ;;  %v391_v57 = vpop.f32.mrf.mxu0 }
 0x116   : > { %v660_v33 = vmul.f32 %v659_v56, %v3024_v23  ;;  %v979_v4 = vadd.f32 0.18741608, %v978_v48  ;;  %v708_v30 = vadd.f32 0.112945676, %v707_v63  ;;  %v955_v29 = vsub.f32 1.0, %v954_v36 }
 0x117   : > { %v1012_v39 = vmul.f32 2.1237322e-06, %v3209_v46  ;;  %v1023_v31 = vmul.f32 3.8918573e-05, %v3209_v46  ;;  %v1090_v5 = vadd.f32 1.0, %v2210_v49  ;;  %v3232_v20 = vmul.f32 %v941_v24, %v2957_v9 }
 0x118   : > { %v3234_v3 = vadd.f32 1.0, %v991_v54  ;;  %v696_v45 = vmul.f32 %v695_v37, %v3115_v52  ;;  %v709_v1 = vmul.f32 %v708_v30, %v3115_v52  ;;  %v646_v40 = vsel %vm643_vm6, %v645_v60, %v641_v18 }
 0x119   : > { %v1024_v23 = vadd.f32 0.001143296, %v1023_v31  ;;  %v1106_v11 = vmul.f32 %v1090_v5, %v2688_v0  ;;  %v3240_v35 = vadd.f32 %v2587_v21, %v391_v57  ;;  %v3242_v43 = vpop.eup %2332  ;;  %vm958_vm7 = vweird.f32 %v3127_v19  ;;  %v415_v31 = vpop.f32.mrf.mxu2 }
 0x11a   : > { %v962_v9 = vand.u32 2147483647, %v3127_v19  ;;  %v964_v56 = vand.u32 2147483648, %v3127_v19  ;;  %v980_v48 = vmul.f32 %v979_v4, %v3062_v53  ;;  %v710_v25 = vadd.f32 0.4994258, %v709_v1 }
 0x11b   : > { %v956_v27 = vmul.f32 %v3187_v16, %v955_v29  ;;  %v661_v24 = vadd.f32 1.1283791, %v660_v33  ;;  %v1013_v36 = vadd.f32 0.00028619796, %v1012_v39  ;;  %v1025_v0 = vmul.f32 %v1024_v23, %v3209_v46  ;;  %2226 = vmatmul.msk.f32.vlgmr.msra.gmra.mxu1 %vm304_vm0, %v1106_v11 }
 0x11c   : > { %2334 = vrcp.f32 %v3234_v3  ;;  %v697_v21 = vadd.f32 0.05243302, %v696_v45  ;;  %v711_v37 = vmul.f32 %v710_v25, %v3115_v52  ;;  %v3254_v49 = vmul.f32 0.70710677, %v3240_v35 }
 0x11d   : > { %v3257_v54 = vmul.f32 %v646_v40, %v3173_v58  ;;  %v674_v53 = vmul.f32 %v3242_v43, %v3189_v50  ;;  %v1026_v63 = vadd.f32 0.014752088, %v1025_v0  ;;  %v2218_v62 = vclamps-f32 %v2895_v59, 1.0 }
 0x11e   : > { %vm3262_vm8 = vcmp.eq.f32.partialorder %v962_v9, 8.507059e+37  ;;  %v965_v18 = vor.u32 1.1754944e-38, %v964_v56  ;;  %v684_v33 = vand.u32 2147483648, %v3189_v50  ;;  %v981_v4 = vadd.f32 1.1283791, %v980_v48 }
 0x11f   : > { %v730_v30 = vmul.f32 %v3254_v49, %v3254_v49  ;;  %v3269_v57 = vadd.f32 1.0, %v711_v37  ;;  %v1014_v58 = vmul.f32 %v1013_v36, %v3209_v46  ;;  %v1027_v29 = vmul.f32 %v1026_v63, %v3209_v46 }
 0x120   : > { %v1098_v39 = vadd.f32 1.0, %v2218_v62  ;;  %v957_v59 = vadd.f32 %v3187_v16, %v956_v27  ;;  %vm959_vm9 = vweird.f32 %v3187_v16  ;;  %v3276_v5 = vmul.f32 %v661_v24, %v2999_v15  ;;  %v2376_v15 = vld [vmem:[%s4496_s2] ss:$0 sm:$0xff] }
 0x121   : > { %v698_v45 = vmul.f32 %v697_v21, %v3115_v52  ;;  %v675_v1 = vsub.f32 1.0, %v674_v53  ;;  %v682_v40 = vand.u32 2147483647, %v3189_v50  ;;  %v1028_v23 = vadd.f32 0.112945676, %v1027_v29  ;;  %vm3297_vm10 = vmor %vm958_vm7, %vm959_vm9 }
 0x122   : > { %v3280_v11 = vmin.f32 %v730_v30, 16.0  ;;  %v3282_v9 = vpop.eup %2334  ;;  %v3284_v56 = vor.u32 1.1754944e-38, %v684_v33  ;;  %v3287_v48 = vmul.f32 %v981_v4, %v3018_v32  ;;  %v1114_v25 = vmul.f32 %v1098_v39, %v2697_v6 }
 0x123   : > { %v3293_v27 = vadd.f32 %v2376_v15, %v415_v31  ;;  %v1004_v36 = vand.u32 2147483648, %v3234_v3  ;;  %2336 = vrcp.f32 %v3269_v57  ;;  %v1015_v32 = vadd.f32 0.0036580483, %v1014_v58 }
 0x124   : > { %v1029_v0 = vmul.f32 %v1028_v23, %v3209_v46  ;;  %v961_v6 = vsel %vm3297_vm10, %v3187_v16, %v957_v59  ;;  %vm678_vm11 = vweird.f32 %v3189_v50  ;;  %v699_v21 = vadd.f32 0.18741608, %v698_v45  ;;  %2234 = vmatmul.msk.f32.vlgmr.msra.gmra.mxu3 %vm304_vm0, %v1114_v25 }
 0x125   : > { %v732_v19 = vmul.f32 2.1237322e-06, %v3280_v11  ;;  %v743_v37 = vmul.f32 3.8918573e-05, %v3280_v11  ;;  %v676_v53 = vmul.f32 %v3242_v43, %v675_v1  ;;  %v994_v63 = vmul.f32 %v3282_v9, %v3234_v3 }
 0x126   : > { %v1030_v62 = vadd.f32 0.4994258, %v1029_v0  ;;  %v3315_v33 = vmul.f32 0.70710677, %v3293_v27  ;;  %v2211_v30 = vclamps-f32 %v2928_v47, 1.0  ;;  %v2219_v58 = vclamps-f32 %v2996_v8, 1.0 }
 0x127   : > { %v733_v4 = vadd.f32 0.00028619796, %v732_v19  ;;  %v744_v16 = vadd.f32 0.001143296, %v743_v37  ;;  %v966_v29 = vsel %vm3262_vm8, %v965_v18, %v961_v6  ;;  %vm679_vm12 = vweird.f32 %v3242_v43 }
 0x128   : > { %v1016_v39 = vmul.f32 %v1015_v32, %v3209_v46  ;;  %v1031_v31 = vmul.f32 %v1030_v62, %v3209_v46  ;;  %vm3324_vm13 = vcmp.eq.f32.partialorder %v682_v40, 8.507059e+37  ;;  %v700_v45 = vmul.f32 %v699_v21, %v3115_v52  ;;  %vm3356_vm14 = vmor %vm678_vm11, %vm679_vm12 }
 0x129   : > { %v745_v1 = vmul.f32 %v744_v16, %v3280_v11  ;;  %v1050_v47 = vmul.f32 %v3315_v33, %v3315_v33  ;;  %v1091_v8 = vadd.f32 1.0, %v2211_v30  ;;  %v3332_v60 = vpop.eup %2336  ;;  %v677_v18 = vadd.f32 %v3242_v43, %v676_v53 }
 0x12a   : > { %v995_v23 = vsub.f32 1.0, %v994_v63  ;;  %v3335_v25 = vadd.f32 1.0, %v1031_v31  ;;  %v1099_v15 = vadd.f32 1.0, %v2219_v58  ;;  %v734_v40 = vmul.f32 %v733_v4, %v3280_v11 }
 0x12b   : > { %v746_v24 = vadd.f32 0.014752088, %v745_v1  ;;  %v3338_v32 = vmin.f32 %v1050_v47, 16.0  ;;  %v1107_v52 = vmul.f32 %v1091_v8, %v2703_v10  ;;  %v1002_v0 = vand.u32 2147483647, %v3234_v3 }
 0x12c   : > { %v3342_v6 = vor.u32 1.1754944e-38, %v1004_v36  ;;  %v1017_v21 = vadd.f32 0.05243302, %v1016_v39  ;;  %2338 = vrcp.f32 %v3335_v25  ;;  %v3346_v19 = vmul.f32 %v966_v29, %v3232_v20 }
 0x12d   : > { %v701_v37 = vadd.f32 1.1283791, %v700_v45  ;;  %v714_v53 = vmul.f32 %v3332_v60, %v3269_v57  ;;  %v747_v63 = vmul.f32 %v746_v24, %v3280_v11  ;;  %2227 = vmatmul.msk.f32.gmra.mxu1 %vm304_vm0, %v1107_v52  ;;  %vm999_vm15 = vweird.f32 %v3282_v9 }
 0x12e   : > { %v1052_v20 = vmul.f32 2.1237322e-06, %v3338_v32  ;;  %v1063_v36 = vmul.f32 3.8918573e-05, %v3338_v32  ;;  %v1115_v62 = vmul.f32 %v1099_v15, %v2708_v17  ;;  %v681_v4 = vsel %vm3356_vm14, %v3242_v43, %v677_v18 }
 0x12f   : > { %v996_v16 = vmul.f32 %v3282_v9, %v995_v23  ;;  %vm998_vm1 = vweird.f32 %v3234_v3  ;;  %v735_v50 = vadd.f32 0.0036580483, %v734_v40  ;;  %v748_v30 = vadd.f32 0.112945676, %v747_v63 }
 0x130   : > { %v1018_v58 = vmul.f32 %v1017_v21, %v3209_v46  ;;  %v1053_v29 = vadd.f32 0.00028619796, %v1052_v20  ;;  %v1064_v39 = vadd.f32 0.001143296, %v1063_v36  ;;  %2235 = vmatmul.msk.f32.gmra.mxu3 %vm304_vm0, %v1115_v62  ;;  %v2212_v31 = vclamps-f32 %v3046_v22, 1.0  ;;  %vm3407_vm3 = vmor %vm998_vm1, %vm999_vm15 }
 0x131   : > { %v3373_v17 = vmul.f32 %v701_v37, %v3090_v7  ;;  %v715_v45 = vsub.f32 1.0, %v714_v53  ;;  %v749_v43 = vmul.f32 %v748_v30, %v3280_v11  ;;  %v2220_v1 = vclamps-f32 %v3150_v28, 1.0 }
 0x132   : > { %v3377_v47 = vpop.eup %2338  ;;  %v686_v8 = vsel %vm3324_vm13, %v3284_v56, %v681_v4  ;;  %v1054_v18 = vmul.f32 %v1053_v29, %v3338_v32  ;;  %v1065_v23 = vmul.f32 %v1064_v39, %v3338_v32  ;;  %v1092_v15 = vadd.f32 1.0, %v2212_v31 }
 0x133   : > { %v997_v22 = vadd.f32 %v3282_v9, %v996_v16  ;;  %vm3385_vm2 = vcmp.eq.f32.partialorder %v1002_v0, 8.507059e+37  ;;  %v1034_v28 = vmul.f32 %v3377_v47, %v3335_v25  ;;  %v736_v40 = vmul.f32 %v735_v50, %v3280_v11 }
 0x134   : > { %v750_v24 = vadd.f32 0.4994258, %v749_v43  ;;  %v1019_v52 = vadd.f32 0.18741608, %v1018_v58  ;;  %v1066_v59 = vadd.f32 0.014752088, %v1065_v23  ;;  %v1108_v56 = vmul.f32 %v1092_v15, %v2713_v38 }
 0x135   : > { %v1100_v21 = vadd.f32 1.0, %v2220_v1  ;;  %v716_v37 = vmul.f32 %v3332_v60, %v715_v45  ;;  %v1055_v63 = vadd.f32 0.0036580483, %v1054_v18  ;;  %v2213_v0 = vclamps-f32 %v3212_v51, 1.0 }
 0x136   : > { %v751_v53 = vmul.f32 %v750_v24, %v3280_v11  ;;  %v1035_v10 = vsub.f32 1.0, %v1034_v28  ;;  %v1067_v20 = vmul.f32 %v1066_v59, %v3338_v32  ;;  %2228 = vmatmul.msk.f32.gmra.mxu1 %vm304_vm0, %v1108_v56  ;;  %v2221_v62 = vclamps-f32 %v3215_v13, 1.0 }
 0x137   : > { %v1116_v36 = vmul.f32 %v1100_v21, %v2782_v26  ;;  %v722_v4 = vand.u32 2147483647, %v3269_v57  ;;  %v737_v38 = vadd.f32 0.05243302, %v736_v40  ;;  %v1093_v50 = vadd.f32 1.0, %v2213_v0 }
 0x138   : > { %v3401_v16 = vadd.f32 1.0, %v751_v53  ;;  %v724_v30 = vand.u32 2147483648, %v3269_v57  ;;  %v1020_v26 = vmul.f32 %v1019_v52, %v3209_v46  ;;  %v1068_v58 = vadd.f32 0.112945676, %v1067_v20  ;;  %v2016_v53 = vld [vmem:[#allocation2] sm:$0x1] }
 0x139   : > { %2236 = vmatmul.msk.f32.gmra.mxu3 %vm304_vm0, %v1116_v36  ;;  %v1101_v13 = vadd.f32 1.0, %v2221_v62  ;;  %v1001_v29 = vsel %vm3407_vm3, %v3282_v9, %v997_v22  ;;  %vm719_vm4 = vweird.f32 %v3332_v60  ;;  %v1056_v3 = vmul.f32 %v1055_v63, %v3338_v32 }
 0x13a   : > { %2340 = vrcp.f32 %v3401_v16  ;;  %v717_v39 = vadd.f32 %v3332_v60, %v716_v37  ;;  %v1036_v31 = vmul.f32 %v3377_v47, %v1035_v10  ;;  %v1069_v46 = vmul.f32 %v1068_v58, %v3338_v32 }
 0x13b   : > { %v2214_v45 = vclamps-f32 %v3257_v54, 1.0  ;;  %v687_v43 = vmul.f32 %v686_v8, %v3276_v5  ;;  %vm718_vm5 = vweird.f32 %v3269_v57  ;;  %v738_v9 = vmul.f32 %v737_v38, %v3280_v11 }
 0x13c   : > { %v1109_v1 = vmul.f32 %v1093_v50, %v2919_v41  ;;  %v1006_v18 = vsel %vm3385_vm2, %v3342_v6, %v1001_v29  ;;  %vm3431_vm6 = vcmp.eq.f32.partialorder %v722_v4, 8.507059e+37  ;;  %v1021_v15 = vadd.f32 1.1283791, %v1020_v26  ;;  %vm3438_vm7 = vmor %vm718_vm5, %vm719_vm4 }
 0x13d   : > { %v1117_v22 = vmul.f32 %v1101_v13, %v2922_v44  ;;  %v725_v57 = vor.u32 1.1754944e-38, %v724_v30  ;;  %v1057_v5 = vadd.f32 0.05243302, %v1056_v3  ;;  %v1070_v41 = vadd.f32 0.4994258, %v1069_v46 }
 0x13e   : > { %v2222_v8 = vclamps-f32 %v3346_v19, 1.0  ;;  %v721_v6 = vsel %vm3438_vm7, %v3332_v60, %v717_v39  ;;  %v1037_v7 = vadd.f32 %v3377_v47, %v1036_v31  ;;  %vm1039_vm8 = vweird.f32 %v3377_v47  ;;  %2229 = vmatmul.msk.f32.gmra.mxu1 %vm304_vm0, %v1109_v1 }
 0x13f   : > { %v1094_v44 = vadd.f32 1.0, %v2214_v45  ;;  %v1042_v40 = vand.u32 2147483647, %v3335_v25  ;;  %v1044_v24 = vand.u32 2147483648, %v3335_v25  ;;  %v739_v52 = vadd.f32 0.18741608, %v738_v9 }
 0x140   : > { %v2341_v28 = vpop.eup %2340  ;;  %v1071_v59 = vmul.f32 %v1070_v41, %v3338_v32  ;;  %v1007_v19 = vmul.f32 %v1006_v18, %v3287_v48  ;;  %vm1038_vm9 = vweird.f32 %v3335_v25  ;;  %v1102_v56 = vadd.f32 1.0, %v2222_v8 }
 0x141   : > { %v754_v60 = vmul.f32 %v2341_v28, %v3401_v16  ;;  %2237 = vmatmul.msk.f32.gmra.mxu3 %vm304_vm0, %v1117_v22  ;;  %v726_v21 = vsel %vm3431_vm6, %v725_v57, %v721_v6  ;;  %v1022_v37 = vmul.f32 %v1021_v15, %v3193_v42  ;;  %vm3461_vm10 = vmor %vm1038_vm9, %vm1039_vm8  ;;  %v1058_v48 = vmul.f32 %v1057_v5, %v3338_v32 }
 0x142   : > { %v1072_v63 = vadd.f32 1.0, %v1071_v59  ;;  %v1041_v25 = vsel %vm3461_vm10, %v3377_v47, %v1037_v7  ;;  %v1110_v10 = vmul.f32 %v1094_v44, %v2963_v14  ;;  %v2215_v20 = vclamps-f32 %v687_v43, 1.0 }
 0x143   : > { %v755_v0 = vsub.f32 1.0, %v754_v60  ;;  %vm1043_vm11 = vcmp.eq.f32.partialorder %v1042_v40, 8.507059e+37  ;;  %v1045_v36 = vor.u32 1.1754944e-38, %v1044_v24  ;;  %v740_v42 = vmul.f32 %v739_v52, %v3280_v11 }
 0x144   : > { %2342 = vrcp.f32 %v1072_v63  ;;  %vm759_vm12 = vweird.f32 %v2341_v28  ;;  %v1118_v4 = vmul.f32 %v1102_v56, %v3042_v61  ;;  %v2223_v38 = vclamps-f32 %v1007_v19, 1.0 }
 0x145   : > { %v756_v62 = vmul.f32 %v2341_v28, %v755_v0  ;;  %v727_v50 = vmul.f32 %v726_v21, %v3373_v17  ;;  %v1046_v51 = vsel %vm1043_vm11, %v1045_v36, %v1041_v25  ;;  %v764_v30 = vand.u32 2147483648, %v3401_v16 }
 0x146   : > { %v1059_v47 = vadd.f32 0.18741608, %v1058_v48  ;;  %vm758_vm13 = vweird.f32 %v3401_v16  ;;  %v762_v14 = vand.u32 2147483647, %v3401_v16  ;;  %2230 = vmatmul.msk.f32.gmra.mxu1 %vm304_vm0, %v1110_v10  ;;  %v1095_v11 = vadd.f32 1.0, %v2215_v20 }
 0x147   : > { %v757_v26 = vadd.f32 %v2341_v28, %v756_v62  ;;  %v423_v58 = vmul.f32 0.5, %v2974_v34  ;;  %vm760_vm14 = vmor %vm758_vm13, %vm759_vm12  ;;  %v1047_v13 = vmul.f32 %v1046_v51, %v1022_v37  ;;  %v741_v61 = vadd.f32 1.1283791, %v740_v42  ;;  %v3496_v48 = vld [vmem:[%s4498_s4] ss:$0 sm:$0xff] }
 0x148   : > { %v1103_v17 = vadd.f32 1.0, %v2223_v38  ;;  %v765_v39 = vor.u32 1.1754944e-38, %v764_v30  ;;  %v1060_v31 = vmul.f32 %v1059_v47, %v3338_v32  ;;  %v2216_v46 = vclamps-f32 %v727_v50, 1.0 }
 0x149   : > { %v761_v29 = vsel %vm760_vm14, %v2341_v28, %v757_v26  ;;  %2238 = vmatmul.msk.f32.gmra.mxu3 %vm304_vm0, %v1118_v4  ;;  %v431_v45 = vmul.f32 0.5, %v2988_v12  ;;  %vm763_vm15 = vcmp.eq.f32.partialorder %v762_v14, 8.507059e+37  ;;  %v1111_v43 = vmul.f32 %v1095_v11, %v423_v58 }
 0x14a   : > { %v2343_v3 = vpop.eup %2342  ;;  %v766_v9 = vsel %vm763_vm15, %v765_v39, %v761_v29  ;;  %v742_v34 = vmul.f32 %v741_v61, %v3254_v49  ;;  %v2224_v23 = vclamps-f32 %v1047_v13, 1.0  ;;  %v1061_v15 = vadd.f32 1.1283791, %v1060_v31 }
 0x14b   : > { %v1074_v16 = vmul.f32 %v2343_v3, %v1072_v63  ;;  %v1119_v18 = vmul.f32 %v1103_v17, %v431_v45  ;;  %v1084_v22 = vand.u32 2147483648, %v1072_v63  ;;  %v1096_v54 = vadd.f32 1.0, %v2216_v46 }
 0x14c   : > { %v767_v57 = vmul.f32 %v766_v9, %v742_v34  ;;  %vm1079_vm1 = vweird.f32 %v2343_v3  ;;  %v1082_v41 = vand.u32 2147483647, %v1072_v63  ;;  %v424_v12 = vmul.f32 0.5, %v3070_v55 }
 0x14d   : > { %v1075_v1 = vsub.f32 1.0, %v1074_v16  ;;  %vm1078_vm2 = vweird.f32 %v1072_v63  ;;  %v1104_v8 = vadd.f32 1.0, %v2224_v23  ;;  %v432_v49 = vmul.f32 0.5, %v3158_v2 }
 0x14e   : > { %2231 = vmatmul.msk.f32.gmra.mxu1 %vm304_vm0, %v1111_v43  ;;  %v1062_v6 = vmul.f32 %v1061_v15, %v3315_v33  ;;  %vm1080_vm3 = vmor %vm1078_vm2, %vm1079_vm1  ;;  %v1085_v7 = vor.u32 1.1754944e-38, %v1084_v22  ;;  %vm1083_vm4 = vcmp.eq.f32.partialorder %v1082_v41, 8.507059e+37  ;;  %v1112_v28 = vmul.f32 %v1096_v54, %v424_v12 }
 0x14f   : > { %v1076_v5 = vmul.f32 %v2343_v3, %v1075_v1  ;;  %v2217_v40 = vclamps-f32 %v767_v57, 1.0  ;;  %v1120_v59 = vmul.f32 %v1104_v8, %v432_v49  ;;  %v425_v60 = vmul.f32 0.5, %v3240_v35 }
 0x150   : > { %v433_v33 = vmul.f32 0.5, %v3293_v27  ;;  %v2442_v37 = vmov 0  }
 0x151   : > { %v1077_v32 = vadd.f32 %v2343_v3, %v1076_v5  ;;  %2239 = vmatmul.msk.f32.gmra.mxu3 %vm304_vm0, %v1119_v18  ;;  %v1097_v55 = vadd.f32 1.0, %v2217_v40  ;;  %2308 = vset.pattern.permute.xlu0 %v2442_v37 }
 0x152   : > { %2019 = vperm.xlu0 %2308, %v2016_v53  }
 0x153   : > { %v1081_v44 = vsel %vm1080_vm3, %v2343_v3, %v1077_v32  ;;  %v1113_v56 = vmul.f32 %v1097_v55, %v425_v60 }
 0x154   : > { %v1086_v24 = vsel %vm1083_vm4, %v1085_v7, %v1081_v44 }
 0x155   : > { %v1087_v52 = vmul.f32 %v1086_v24, %v1062_v6 }
 0x156   : > { %2232 = vmatmul.msk.f32.gmra.mxu1 %vm304_vm0, %v1112_v28 }
 0x157   : > { %v2225_v19 = vclamps-f32 %v1087_v52, 1.0 }
 0x159   : > { %2240 = vmatmul.msk.f32.gmra.mxu3 %vm304_vm0, %v1120_v59  ;;  %v1105_v2 = vadd.f32 1.0, %v2225_v19 }
 0x15b   : > { %v1121_v21 = vmul.f32 %v1105_v2, %v433_v33 }
 0x15e   : > { %2233 = vmatmul.msk.f32.gmra.mxu1 %vm304_vm0, %v1113_v56 }
 0x161   : > { %2241 = vmatmul.msk.f32.gmra.mxu3 %vm304_vm0, %v1121_v21 }
 0x198   : > { %v1195_v35 = vpop.f32.mrf.mxu1 }
 0x199   : > { %v3499_v63 = vadd.f32 %v3496_v48, %v1195_v35 }
 0x19b   : > { %v3502_v27 = vmul.f32 0.70710677, %v3499_v63 }
 0x19d   : > { %v1275_v25 = vmul.f32 %v3502_v27, %v3502_v27 }
 0x19f   : > { %v3506_v0 = vmin.f32 %v1275_v25, 16.0 }
 0x1a1   : > { %v1288_v10 = vmul.f32 3.8918573e-05, %v3506_v0  ;;  %v1277_v36 = vmul.f32 2.1237322e-06, %v3506_v0 }
 0x1a3   : > { %v1289_v20 = vadd.f32 0.001143296, %v1288_v10  ;;  %v1278_v50 = vadd.f32 0.00028619796, %v1277_v36 }
 0x1a5   : > { %v1290_v42 = vmul.f32 %v1289_v20, %v3506_v0  ;;  %v1279_v13 = vmul.f32 %v1278_v50, %v3506_v0 }
 0x1a7   : > { %v1291_v62 = vadd.f32 0.014752088, %v1290_v42  ;;  %v1219_v4 = vpop.f32.mrf.mxu3  ;;  %v1280_v45 = vadd.f32 0.0036580483, %v1279_v13 }
 0x1a8   : > { %v3512_v38 = vadd.f32 %v3496_v48, %v1219_v4 }
 0x1a9   : > { %v1292_v51 = vmul.f32 %v1291_v62, %v3506_v0  ;;  %v1281_v41 = vmul.f32 %v1280_v45, %v3506_v0 }
 0x1aa   : > { %v1198_v30 = vpop.f32.mrf.mxu1  ;;  %v3519_v26 = vmul.f32 0.70710677, %v3512_v38 }
 0x1ab   : > { %v3516_v47 = vadd.f32 %v3496_v48, %v1198_v30  ;;  %v1293_v14 = vadd.f32 0.112945676, %v1292_v51  ;;  %v1282_v28 = vadd.f32 0.05243302, %v1281_v41 }
 0x1ac   : > { %v1595_v58 = vmul.f32 %v3519_v26, %v3519_v26 }
 0x1ad   : > { %v3522_v11 = vmul.f32 0.70710677, %v3516_v47  ;;  %v1294_v61 = vmul.f32 %v1293_v14, %v3506_v0  ;;  %v1283_v37 = vmul.f32 %v1282_v28, %v3506_v0 }
 0x1ae   : > { %v3530_v17 = vmin.f32 %v1595_v58, 16.0 }
 0x1af   : > { %v1315_v29 = vmul.f32 %v3522_v11, %v3522_v11  ;;  %v1295_v3 = vadd.f32 0.4994258, %v1294_v61  ;;  %v1284_v14 = vadd.f32 0.18741608, %v1283_v37 }
 0x1b0   : > { %v1597_v31 = vmul.f32 2.1237322e-06, %v3530_v17  ;;  %v1608_v46 = vmul.f32 3.8918573e-05, %v3530_v17 }
 0x1b1   : > { %v3532_v39 = vmin.f32 %v1315_v29, 16.0  ;;  %v1296_v16 = vmul.f32 %v1295_v3, %v3506_v0 }
 0x1b2   : > { %v1598_v34 = vadd.f32 0.00028619796, %v1597_v31  ;;  %v1609_v15 = vadd.f32 0.001143296, %v1608_v46 }
 0x1b3   : > { %v1317_v43 = vmul.f32 2.1237322e-06, %v3532_v39  ;;  %v1328_v9 = vmul.f32 3.8918573e-05, %v3532_v39  ;;  %v1201_v1 = vpop.f32.mrf.mxu1  ;;  %v1222_v18 = vpop.f32.mrf.mxu3  ;;  %v3539_v23 = vadd.f32 1.0, %v1296_v16 }
 0x1b4   : > { %v3542_v22 = vadd.f32 %v3496_v48, %v1201_v1  ;;  %v1599_v5 = vmul.f32 %v1598_v34, %v3530_v17  ;;  %v3547_v12 = vadd.f32 %v3496_v48, %v1222_v18  ;;  %v1610_v49 = vmul.f32 %v1609_v15, %v3530_v17 }
 0x1b5   : > { %v1318_v54 = vadd.f32 0.00028619796, %v1317_v43  ;;  %v1329_v57 = vadd.f32 0.001143296, %v1328_v9  ;;  %2344 = vrcp.f32 %v3539_v23  ;;  %v1285_v9 = vmul.f32 %v1284_v14, %v3506_v0 }
 0x1b6   : > { %v3554_v6 = vmul.f32 0.70710677, %v3542_v22  ;;  %v1600_v44 = vadd.f32 0.0036580483, %v1599_v5  ;;  %v1611_v40 = vadd.f32 0.014752088, %v1610_v49  ;;  %vm1303_vm5 = vweird.f32 %v3539_v23 }
 0x1b7   : > { %v1319_v32 = vmul.f32 %v1318_v54, %v3532_v39  ;;  %v1330_v8 = vmul.f32 %v1329_v57, %v3532_v39  ;;  %v3559_v52 = vmul.f32 0.70710677, %v3547_v12  ;;  %v1286_v0 = vadd.f32 1.1283791, %v1285_v9 }
 0x1b8   : > { %v1355_v24 = vmul.f32 %v3554_v6, %v3554_v6  ;;  %v1612_v19 = vmul.f32 %v1611_v40, %v3530_v17  ;;  %v1601_v56 = vmul.f32 %v1600_v44, %v3530_v17 }
 0x1b9   : > { %v1331_v7 = vadd.f32 0.014752088, %v1330_v8  ;;  %v1320_v59 = vadd.f32 0.0036580483, %v1319_v32  ;;  %v1635_v2 = vmul.f32 %v3559_v52, %v3559_v52  ;;  %v3596_v8 = vmul.f32 0.5, %v3499_v63 }
 0x1ba   : > { %v3563_v60 = vmin.f32 %v1355_v24, 16.0  ;;  %v1613_v53 = vadd.f32 0.112945676, %v1612_v19  ;;  %v1602_v30 = vadd.f32 0.05243302, %v1601_v56  ;;  %v3614_v56 = vmul.f32 0.5, %v3512_v38 }
 0x1bb   : > { %v1332_v55 = vmul.f32 %v1331_v7, %v3532_v39  ;;  %v3568_v21 = vpop.eup %2344  ;;  %v1321_v10 = vmul.f32 %v1320_v59, %v3532_v39  ;;  %v3575_v36 = vmin.f32 %v1635_v2, 16.0  ;;  %v1204_v43 = vpop.f32.mrf.mxu1 }
 0x1bc   : > { %v1357_v35 = vmul.f32 2.1237322e-06, %v3563_v60  ;;  %v1368_v25 = vmul.f32 3.8918573e-05, %v3563_v60  ;;  %v1614_v42 = vmul.f32 %v1613_v53, %v3530_v17  ;;  %v1299_v50 = vmul.f32 %v3568_v21, %v3539_v23 }
 0x1bd   : > { %v1333_v33 = vadd.f32 0.112945676, %v1332_v55  ;;  %v1322_v13 = vadd.f32 0.05243302, %v1321_v10  ;;  %v1637_v61 = vmul.f32 2.1237322e-06, %v3575_v36  ;;  %v1603_v45 = vmul.f32 %v1602_v30, %v3530_v17 }
 0x1be   : > { %v1358_v62 = vadd.f32 0.00028619796, %v1357_v35  ;;  %v1369_v4 = vadd.f32 0.001143296, %v1368_v25  ;;  %v1615_v29 = vadd.f32 0.4994258, %v1614_v42  ;;  %v3589_v54 = vadd.f32 %v3496_v48, %v1204_v43 }
 0x1bf   : > { %v1334_v20 = vmul.f32 %v1333_v33, %v3532_v39  ;;  %v1300_v31 = vsub.f32 1.0, %v1299_v50  ;;  %v1323_v34 = vmul.f32 %v1322_v13, %v3532_v39  ;;  %v1638_v1 = vadd.f32 0.00028619796, %v1637_v61 }
 0x1c0   : > { %v1370_v58 = vmul.f32 %v1369_v4, %v3563_v60  ;;  %v1359_v3 = vmul.f32 %v1358_v62, %v3563_v60  ;;  %v1616_v18 = vmul.f32 %v1615_v29, %v3530_v17  ;;  %v1604_v41 = vadd.f32 0.18741608, %v1603_v45 }
 0x1c1   : > { %v1335_v51 = vadd.f32 0.4994258, %v1334_v20  ;;  %v1301_v57 = vmul.f32 %v3568_v21, %v1300_v31  ;;  %v1648_v49 = vmul.f32 3.8918573e-05, %v3575_v36  ;;  %vm1304_vm0 = vweird.f32 %v3568_v21  ;;  %v1225_v20 = vpop.f32.mrf.mxu3 }
 0x1c2   : > { %v1371_v16 = vadd.f32 0.014752088, %v1370_v58  ;;  %v1360_v15 = vadd.f32 0.0036580483, %v1359_v3  ;;  %v1324_v7 = vadd.f32 0.18741608, %v1323_v34  ;;  %v1639_v28 = vmul.f32 %v1638_v1, %v3575_v36  ;;  %vm3621_vm6 = vmor %vm1303_vm5, %vm1304_vm0 }
 0x1c3   : > { %v1336_v46 = vmul.f32 %v1335_v51, %v3532_v39  ;;  %v3601_v40 = vadd.f32 1.0, %v1616_v18  ;;  %v1649_v59 = vadd.f32 0.001143296, %v1648_v49  ;;  %v3605_v55 = vmul.f32 0.70710677, %v3589_v54  ;;  %v1207_v61 = vpop.f32.mrf.mxu1 }
 0x1c4   : > { %v1372_v32 = vmul.f32 %v1371_v16, %v3563_v60  ;;  %v1361_v24 = vmul.f32 %v1360_v15, %v3563_v60  ;;  %v1302_v63 = vadd.f32 %v3568_v21, %v1301_v57  ;;  %v1605_v19 = vmul.f32 %v1604_v41, %v3530_v17 }
 0x1c5   : > { %v3592_v5 = vadd.f32 1.0, %v1336_v46  ;;  %v1309_v33 = vand.u32 2147483648, %v3539_v23  ;;  %v1650_v37 = vmul.f32 %v1649_v59, %v3575_v36  ;;  %v1307_v53 = vand.u32 2147483647, %v3539_v23 }
 0x1c6   : > { %v1373_v44 = vadd.f32 0.112945676, %v1372_v32  ;;  %v1325_v35 = vmul.f32 %v1324_v7, %v3532_v39  ;;  %v1640_v10 = vadd.f32 0.0036580483, %v1639_v28  ;;  %v1362_v42 = vadd.f32 0.05243302, %v1361_v24 }
 0x1c7   : > { %2346 = vrcp.f32 %v3592_v5  ;;  %v1651_v38 = vadd.f32 0.014752088, %v1650_v37  ;;  %v1395_v62 = vmul.f32 %v3605_v55, %v3605_v55  ;;  %v1287_v23 = vmul.f32 %v1286_v0, %v3502_v27 }
 0x1c8   : > { %v1374_v2 = vmul.f32 %v1373_v44, %v3563_v60  ;;  %2348 = vrcp.f32 %v3601_v40  ;;  %v1306_v39 = vsel %vm3621_vm6, %v3568_v21, %v1302_v63  ;;  %v3633_v4 = vmul.f32 0.5, %v3516_v47 }
 0x1c9   : > { %v1606_v50 = vadd.f32 1.1283791, %v1605_v19  ;;  %v1310_v51 = vor.u32 1.1754944e-38, %v1309_v33  ;;  %v1652_v30 = vmul.f32 %v1651_v38, %v3575_v36  ;;  %v3636_v14 = vmin.f32 %v1395_v62, 16.0 }
 0x1ca   : > { %v1375_v25 = vadd.f32 0.4994258, %v1374_v2  ;;  %v3639_v58 = vadd.f32 %v3496_v48, %v1225_v20  ;;  %vm1308_vm7 = vcmp.eq.f32.partialorder %v1307_v53, 8.507059e+37  ;;  %v3644_v27 = vmul.f32 0.5, %v3542_v22 }
 0x1cb   : > { %v1641_v47 = vmul.f32 %v1640_v10, %v3575_v36  ;;  %v1311_v29 = vsel %vm1308_vm7, %v1310_v51, %v1306_v39  ;;  %v1326_v3 = vadd.f32 1.1283791, %v1325_v35  ;;  %v1363_v31 = vmul.f32 %v1362_v42, %v3563_v60 }
 0x1cc   : > { %v1376_v21 = vmul.f32 %v1375_v25, %v3563_v60  ;;  %v1653_v46 = vadd.f32 0.112945676, %v1652_v30  ;;  %v1349_v45 = vand.u32 2147483648, %v3592_v5  ;;  %v3651_v16 = vmul.f32 %v1606_v50, %v3519_v26 }
 0x1cd   : > { %v3641_v13 = vpop.eup %2346  ;;  %v3654_v43 = vmul.f32 0.5, %v3547_v12  ;;  %v1397_v22 = vmul.f32 2.1237322e-06, %v3636_v14  ;;  %v3663_v18 = vmul.f32 0.70710677, %v3639_v58  ;;  %v3666_v15 = vadd.f32 %v3496_v48, %v1207_v61 }
 0x1ce   : > { %v3657_v9 = vpop.eup %2348  ;;  %v1339_v34 = vmul.f32 %v3641_v13, %v3592_v5  ;;  %v1654_v1 = vmul.f32 %v1653_v46, %v3575_v36  ;;  %v3668_v26 = vmul.f32 %v1311_v29, %v1287_v23  ;;  %v1347_v12 = vand.u32 2147483647, %v3592_v5  ;;  %v1228_v23 = vpop.f32.mrf.mxu3 }
 0x1cf   : > { %v3671_v57 = vadd.f32 1.0, %v1376_v21  ;;  %v1642_v41 = vadd.f32 0.05243302, %v1641_v47  ;;  %v3674_v32 = vmul.f32 %v1326_v3, %v3522_v11  ;;  %v1627_v0 = vand.u32 2147483647, %v3601_v40 }
 0x1d0   : > { %v1629_v49 = vand.u32 2147483648, %v3601_v40  ;;  %v1364_v7 = vadd.f32 0.18741608, %v1363_v31  ;;  %v1619_v44 = vmul.f32 %v3657_v9, %v3601_v40  ;;  %v1655_v28 = vadd.f32 0.4994258, %v1654_v1 }
 0x1d1   : > { %v1398_v24 = vadd.f32 0.00028619796, %v1397_v22  ;;  %v1408_v59 = vmul.f32 3.8918573e-05, %v3636_v14  ;;  %v1340_v63 = vsub.f32 1.0, %v1339_v34  ;;  %v3681_v19 = vor.u32 1.1754944e-38, %v1349_v45 }
 0x1d2   : > { %v1675_v2 = vmul.f32 %v3663_v18, %v3663_v18  ;;  %v3686_v11 = vmul.f32 0.70710677, %v3666_v15  ;;  %2350 = vrcp.f32 %v3671_v57  ;;  %v1643_v33 = vmul.f32 %v1642_v41, %v3575_v36 }
 0x1d3   : > { %v1656_v37 = vmul.f32 %v1655_v28, %v3575_v36  ;;  %v1409_v53 = vadd.f32 0.001143296, %v1408_v59  ;;  %vm1343_vm8 = vweird.f32 %v3592_v5  ;;  %v3692_v35 = vor.u32 1.1754944e-38, %v1629_v49 }
 0x1d4   : > { %v1365_v25 = vmul.f32 %v1364_v7, %v3563_v60  ;;  %v3695_v10 = vmin.f32 %v1675_v2, 16.0  ;;  %v1435_v20 = vmul.f32 %v3686_v11, %v3686_v11  ;;  %v1620_v17 = vsub.f32 1.0, %v1619_v44 }
 0x1d5   : > { %v3699_v42 = vadd.f32 1.0, %v1656_v37  ;;  %v1399_v38 = vmul.f32 %v1398_v24, %v3636_v14  ;;  %v1410_v62 = vmul.f32 %v1409_v53, %v3636_v14  ;;  %v1341_v39 = vmul.f32 %v3641_v13, %v1340_v63 }
 0x1d6   : > { %v1677_v50 = vmul.f32 2.1237322e-06, %v3695_v10  ;;  %v1688_v51 = vmul.f32 3.8918573e-05, %v3695_v10  ;;  %v3706_v60 = vmin.f32 %v1435_v20, 16.0  ;;  %vm1344_vm9 = vweird.f32 %v3641_v13 }
 0x1d7   : > { %v1644_v30 = vadd.f32 0.18741608, %v1643_v33  ;;  %2352 = vrcp.f32 %v3699_v42  ;;  %v3711_v21 = vmul.f32 0.5, %v3589_v54  ;;  %vm1624_vm10 = vweird.f32 %v3657_v9  ;;  %vm3745_vm12 = vmor %vm1343_vm8, %vm1344_vm9 }
 0x1d8   : > { %v1411_v47 = vadd.f32 0.014752088, %v1410_v62  ;;  %v1678_v61 = vadd.f32 0.00028619796, %v1677_v50  ;;  %v3715_v29 = vadd.f32 %v3496_v48, %v1228_v23  ;;  %v3717_v3 = vpop.eup %2350  ;;  %v1621_v31 = vmul.f32 %v3657_v9, %v1620_v17 }
 0x1d9   : > { %v1400_v46 = vadd.f32 0.0036580483, %v1399_v38  ;;  %v1689_v45 = vadd.f32 0.001143296, %v1688_v51  ;;  %v1437_v22 = vmul.f32 2.1237322e-06, %v3706_v60  ;;  %v1342_v34 = vadd.f32 %v3641_v13, %v1341_v39 }
 0x1da   : > { %vm3722_vm11 = vcmp.eq.f32.partialorder %v1347_v12, 8.507059e+37  ;;  %v1366_v1 = vadd.f32 1.1283791, %v1365_v25  ;;  %v1412_v41 = vmul.f32 %v1411_v47, %v3636_v14  ;;  %v1679_v49 = vmul.f32 %v1678_v61, %v3695_v10 }
 0x1db   : > { %v1645_v7 = vmul.f32 %v1644_v30, %v3575_v36  ;;  %v1690_v44 = vmul.f32 %v1689_v45, %v3695_v10  ;;  %v1438_v28 = vadd.f32 0.00028619796, %v1437_v22  ;;  %v1448_v24 = vmul.f32 3.8918573e-05, %v3706_v60 }
 0x1dc   : > { %v1379_v59 = vmul.f32 %v3717_v3, %v3671_v57  ;;  %v1413_v63 = vadd.f32 0.112945676, %v1412_v41  ;;  %v3734_v12 = vmul.f32 0.5, %v3639_v58  ;;  %v3737_v2 = vmul.f32 0.70710677, %v3715_v29 }
 0x1dd   : > { %v3739_v33 = vpop.eup %2352  ;;  %v1622_v37 = vadd.f32 %v3657_v9, %v1621_v31  ;;  %v1401_v53 = vmul.f32 %v1400_v46, %v3636_v14  ;;  %v1691_v25 = vadd.f32 0.014752088, %v1690_v44  ;;  %v1449_v58 = vadd.f32 0.001143296, %v1448_v24 }
 0x1de   : > { %v1346_v20 = vsel %vm3745_vm12, %v3641_v13, %v1342_v34  ;;  %vm3756_vm13 = vcmp.eq.f32.partialorder %v1627_v0, 8.507059e+37  ;;  %v1387_v5 = vand.u32 2147483647, %v3671_v57  ;;  %v1680_v38 = vadd.f32 0.0036580483, %v1679_v49 }
 0x1df   : > { %v1439_v62 = vmul.f32 %v1438_v28, %v3706_v60  ;;  %v1389_v23 = vand.u32 2147483648, %v3671_v57  ;;  %v1646_v39 = vadd.f32 1.1283791, %v1645_v7  ;;  %v1414_v50 = vmul.f32 %v1413_v63, %v3636_v14 }
 0x1e0   : > { %v1692_v51 = vmul.f32 %v1691_v25, %v3695_v10  ;;  %v1380_v30 = vsub.f32 1.0, %v1379_v59  ;;  %v1659_v13 = vmul.f32 %v3739_v33, %v3699_v42  ;;  %v1450_v0 = vmul.f32 %v1449_v58, %v3706_v60 }
 0x1e1   : > { %v1715_v47 = vmul.f32 %v3737_v2, %v3737_v2  ;;  %vm1623_vm14 = vweird.f32 %v3601_v40  ;;  %v1402_v61 = vadd.f32 0.05243302, %v1401_v53  ;;  %v1415_v31 = vadd.f32 0.4994258, %v1414_v50 }
 0x1e2   : > { %v1693_v46 = vadd.f32 0.112945676, %v1692_v51  ;;  %vm3773_vm15 = vmor %vm1623_vm14, %vm1624_vm10  ;;  %v1681_v22 = vmul.f32 %v1680_v38, %v3695_v10  ;;  %v1440_v34 = vadd.f32 0.0036580483, %v1439_v62  ;;  %v1451_v41 = vadd.f32 0.014752088, %v1450_v0  ;;  %v1210_v0 = vpop.f32.mrf.mxu1 }
 0x1e3   : > { %v3778_v49 = vmin.f32 %v1715_v47, 16.0  ;;  %v1351_v7 = vsel %vm3722_vm11, %v3681_v19, %v1346_v20  ;;  %v1626_v40 = vsel %vm3773_vm15, %v3657_v9, %v1622_v37  ;;  %v1416_v44 = vmul.f32 %v1415_v31, %v3636_v14 }
 0x1e4   : > { %v1694_v28 = vmul.f32 %v1693_v46, %v3695_v10  ;;  %v1660_v24 = vsub.f32 1.0, %v1659_v13  ;;  %v1452_v59 = vmul.f32 %v1451_v41, %v3706_v60  ;;  %v3792_v53 = vmul.f32 %v1366_v1, %v3554_v6 }
 0x1e5   : > { %v1717_v63 = vmul.f32 2.1237322e-06, %v3778_v49  ;;  %v1728_v36 = vmul.f32 3.8918573e-05, %v3778_v49  ;;  %v1381_v19 = vmul.f32 %v3717_v3, %v1380_v30  ;;  %v1403_v54 = vmul.f32 %v1402_v61, %v3636_v14 }
 0x1e6   : > { %v1695_v25 = vadd.f32 0.4994258, %v1694_v28  ;;  %v1682_v9 = vadd.f32 0.05243302, %v1681_v22  ;;  %v1441_v37 = vmul.f32 %v1440_v34, %v3706_v60  ;;  %v1453_v58 = vadd.f32 0.112945676, %v1452_v59  ;;  %v1231_v59 = vpop.f32.mrf.mxu3 }
 0x1e7   : > { %v1729_v20 = vadd.f32 0.001143296, %v1728_v36  ;;  %v3798_v38 = vmul.f32 %v1351_v7, %v3674_v32  ;;  %v1631_v62 = vsel %vm3756_vm13, %v3692_v35, %v1626_v40  ;;  %vm1383_vm1 = vweird.f32 %v3671_v57 }
 0x1e8   : > { %v3804_v6 = vadd.f32 1.0, %v1416_v44  ;;  %vm3806_vm2 = vcmp.eq.f32.partialorder %v1387_v5, 8.507059e+37  ;;  %v1390_v50 = vor.u32 1.1754944e-38, %v1389_v23  ;;  %v3811_v51 = vmul.f32 %v1646_v39, %v3559_v52 }
 0x1e9   : > { %v1661_v30 = vmul.f32 %v3739_v33, %v1660_v24  ;;  %v1718_v32 = vadd.f32 0.00028619796, %v1717_v63  ;;  %vm1384_vm3 = vweird.f32 %v3717_v3  ;;  %v1404_v13 = vadd.f32 0.18741608, %v1403_v54 }
 0x1ea   : > { %v1696_v35 = vmul.f32 %v1695_v25, %v3695_v10  ;;  %v1454_v17 = vmul.f32 %v1453_v58, %v3706_v60  ;;  %v1382_v5 = vadd.f32 %v3717_v3, %v1381_v19  ;;  %v1683_v47 = vmul.f32 %v1682_v9, %v3695_v10  ;;  %vm3834_vm0 = vmor %vm1383_vm1, %vm1384_vm3 }
 0x1eb   : > { %v1442_v61 = vadd.f32 0.05243302, %v1441_v37  ;;  %v1730_v23 = vmul.f32 %v1729_v20, %v3778_v49  ;;  %v1667_v52 = vand.u32 2147483647, %v3699_v42  ;;  %v1669_v39 = vand.u32 2147483648, %v3699_v42 }
 0x1ec   : > { %2354 = vrcp.f32 %v3804_v6  ;;  %v1455_v31 = vadd.f32 0.4994258, %v1454_v17  ;;  %v1662_v46 = vadd.f32 %v3739_v33, %v1661_v30  ;;  %vm1664_vm4 = vweird.f32 %v3739_v33 }
 0x1ed   : > { %v1719_v45 = vmul.f32 %v1718_v32, %v3778_v49  ;;  %v1211_v22 = vadd.f32 %v3496_v48, %v1210_v0  ;;  %v3828_v34 = vmul.f32 %v1631_v62, %v3651_v16  ;;  %vm1663_vm5 = vweird.f32 %v3699_v42 }
 0x1ee   : > { %v1405_v7 = vmul.f32 %v1404_v13, %v3636_v14  ;;  %v3840_v40 = vadd.f32 1.0, %v1696_v35  ;;  %v1386_v44 = vsel %vm3834_vm0, %v3717_v3, %v1382_v5  ;;  %v1684_v16 = vadd.f32 0.18741608, %v1683_v47  ;;  %vm3846_vm6 = vmor %vm1663_vm5, %vm1664_vm4 }
 0x1ef   : > { %v1443_v28 = vmul.f32 %v1442_v61, %v3706_v60  ;;  %v1731_v24 = vadd.f32 0.014752088, %v1730_v23  ;;  %vm3850_vm7 = vcmp.eq.f32.partialorder %v1667_v52, 8.507059e+37  ;;  %v1670_v14 = vor.u32 1.1754944e-38, %v1669_v39 }
 0x1f0   : > { %v3855_v42 = vmul.f32 0.5, %v3666_v15  ;;  %v1456_v36 = vmul.f32 %v1455_v31, %v3706_v60  ;;  %v1666_v3 = vsel %vm3846_vm6, %v3739_v33, %v1662_v46  ;;  %v1720_v19 = vadd.f32 0.0036580483, %v1719_v45 }
 0x1f1   : > { %v1732_v54 = vmul.f32 %v1731_v24, %v3778_v49  ;;  %v3862_v25 = vmul.f32 0.70710677, %v1211_v22  ;;  %v1391_v37 = vsel %vm3806_vm2, %v1390_v50, %v1386_v44  ;;  %v1406_v58 = vadd.f32 1.1283791, %v1405_v7 }
 0x1f2   : > { %v3864_v9 = vpop.eup %2354  ;;  %2356 = vrcp.f32 %v3840_v40  ;;  %v3870_v15 = vadd.f32 %v3496_v48, %v1231_v59  ;;  %v1685_v20 = vmul.f32 %v1684_v16, %v3695_v10  ;;  %v1444_v62 = vadd.f32 0.18741608, %v1443_v28 }
 0x1f3   : > { %v1733_v33 = vadd.f32 0.112945676, %v1732_v54  ;;  %v1475_v30 = vmul.f32 %v3862_v25, %v3862_v25  ;;  %v1671_v32 = vsel %vm3850_vm7, %v1670_v14, %v1666_v3  ;;  %v1429_v13 = vand.u32 2147483648, %v3804_v6 }
 0x1f4   : > { %v3878_v1 = vadd.f32 1.0, %v1456_v36  ;;  %v3881_v50 = vmul.f32 0.5, %v3715_v29  ;;  %v1419_v35 = vmul.f32 %v3864_v9, %v3804_v6  ;;  %v1721_v10 = vmul.f32 %v1720_v19, %v3778_v49  ;;  %v1213_v36 = vpop.f32.mrf.mxu1 }
 0x1f5   : > { %v1734_v17 = vmul.f32 %v1733_v33, %v3778_v49  ;;  %v3887_v0 = vmin.f32 %v1475_v30, 16.0  ;;  %v3890_v5 = vmul.f32 %v1391_v37, %v3792_v53  ;;  %v3893_v47 = vmul.f32 %v1406_v58, %v3605_v55 }
 0x1f6   : > { %v1427_v61 = vand.u32 2147483647, %v3804_v6  ;;  %v3897_v29 = vmul.f32 0.70710677, %v3870_v15  ;;  %v1686_v23 = vadd.f32 1.1283791, %v1685_v20  ;;  %v1445_v52 = vmul.f32 %v1444_v62, %v3706_v60  ;;  %v1234_v62 = vpop.f32.mrf.mxu3 }
 0x1f7   : > { %v1735_v39 = vadd.f32 0.4994258, %v1734_v17  ;;  %v1477_v31 = vmul.f32 2.1237322e-06, %v3887_v0  ;;  %v3904_v45 = vmul.f32 %v1671_v32, %v3811_v51  ;;  %2358 = vrcp.f32 %v3878_v1 }
 0x1f8   : > { %v3901_v46 = vpop.eup %2356  ;;  %v1488_v55 = vmul.f32 3.8918573e-05, %v3887_v0  ;;  %v1755_v53 = vmul.f32 %v3897_v29, %v3897_v29  ;;  %v1420_v41 = vsub.f32 1.0, %v1419_v35  ;;  %v3910_v7 = vor.u32 1.1754944e-38, %v1429_v13 }
 0x1f9   : > { %v1722_v44 = vadd.f32 0.05243302, %v1721_v10  ;;  %v3912_v60 = vmul.f32 0.5, %v1211_v22  ;;  %v1709_v16 = vand.u32 2147483648, %v3840_v40  ;;  %v1736_v28 = vmul.f32 %v1735_v39, %v3778_v49 }
 0x1fa   : > { %v1478_v24 = vadd.f32 0.00028619796, %v1477_v31  ;;  %v1489_v51 = vadd.f32 0.001143296, %v1488_v55  ;;  %vm1423_vm8 = vweird.f32 %v3804_v6  ;;  %v3918_v59 = vmul.f32 %v1686_v23, %v3663_v18 }
 0x1fb   : > { %v1699_v57 = vmul.f32 %v3901_v46, %v3840_v40  ;;  %v1446_v63 = vadd.f32 1.1283791, %v1445_v52  ;;  %v3922_v14 = vmin.f32 %v1755_v53, 16.0  ;;  %v1707_v22 = vand.u32 2147483647, %v3840_v40 }
 0x1fc   : > { %v3925_v3 = vadd.f32 1.0, %v1736_v28  ;;  %v1479_v19 = vmul.f32 %v1478_v24, %v3887_v0  ;;  %v1490_v54 = vmul.f32 %v1489_v51, %v3887_v0  ;;  %v1421_v37 = vmul.f32 %v3864_v9, %v1420_v41 }
 0x1fd   : > { %v1723_v18 = vmul.f32 %v1722_v44, %v3778_v49  ;;  %v1757_v58 = vmul.f32 2.1237322e-06, %v3922_v14  ;;  %v1768_v20 = vmul.f32 3.8918573e-05, %v3922_v14  ;;  %v3933_v33 = vpop.eup %2358  ;;  %vm1424_vm9 = vweird.f32 %v3864_v9 }
 0x1fe   : > { %v3936_v30 = vor.u32 1.1754944e-38, %v1709_v16  ;;  %2360 = vrcp.f32 %v3925_v3  ;;  %v3940_v32 = vadd.f32 %v3496_v48, %v1213_v36  ;;  %vm3942_vm10 = vcmp.eq.f32.partialorder %v1427_v61, 8.507059e+37  ;;  %vm3973_vm13 = vmor %vm1423_vm8, %vm1424_vm9 }
 0x1ff   : > { %v1700_v35 = vsub.f32 1.0, %v1699_v57  ;;  %v3947_v10 = vmul.f32 %v1446_v63, %v3686_v11  ;;  %v1480_v17 = vadd.f32 0.0036580483, %v1479_v19  ;;  %v1491_v23 = vadd.f32 0.014752088, %v1490_v54 }
 0x200   : > { %v1467_v52 = vand.u32 2147483647, %v3878_v1  ;;  %v1758_v39 = vadd.f32 0.00028619796, %v1757_v58  ;;  %v1769_v31 = vadd.f32 0.001143296, %v1768_v20  ;;  %v3951_v55 = vadd.f32 %v3496_v48, %v1234_v62 }
 0x201   : > { %v1422_v53 = vadd.f32 %v3864_v9, %v1421_v37  ;;  %vm1703_vm11 = vweird.f32 %v3840_v40  ;;  %v1459_v61 = vmul.f32 %v3933_v33, %v3878_v1  ;;  %v1724_v41 = vadd.f32 0.18741608, %v1723_v18 }
 0x202   : > { %v1492_v11 = vmul.f32 %v1491_v23, %v3887_v0  ;;  %v1481_v44 = vmul.f32 %v1480_v17, %v3887_v0  ;;  %v1759_v16 = vmul.f32 %v1758_v39, %v3922_v14  ;;  %v1770_v28 = vmul.f32 %v1769_v31, %v3922_v14 }
 0x203   : > { %v3962_v24 = vmul.f32 0.70710677, %v3940_v32  ;;  %v1701_v51 = vmul.f32 %v3901_v46, %v1700_v35  ;;  %vm1704_vm12 = vweird.f32 %v3901_v46  ;;  %v1469_v57 = vand.u32 2147483648, %v3878_v1 }
 0x204   : > { %v1493_v63 = vadd.f32 0.112945676, %v1492_v11  ;;  %v3967_v36 = vpop.eup %2360  ;;  %v1760_v54 = vadd.f32 0.0036580483, %v1759_v16  ;;  %v1771_v37 = vadd.f32 0.014752088, %v1770_v28  ;;  %v1426_v20 = vsel %vm3973_vm13, %v3864_v9, %v1422_v53  ;;  %vm4012_vm1 = vmor %vm1703_vm11, %vm1704_vm12 }
 0x205   : > { %v1515_v18 = vmul.f32 %v3962_v24, %v3962_v24  ;;  %v3980_v58 = vmul.f32 0.70710677, %v3951_v55  ;;  %v1460_v62 = vsub.f32 1.0, %v1459_v61  ;;  %v1725_v35 = vmul.f32 %v1724_v41, %v3778_v49 }
 0x206   : > { %v1494_v6 = vmul.f32 %v1493_v63, %v3887_v0  ;;  %vm3987_vm14 = vcmp.eq.f32.partialorder %v1707_v22, 8.507059e+37  ;;  %v1482_v23 = vadd.f32 0.05243302, %v1481_v44  ;;  %v1772_v39 = vmul.f32 %v1771_v37, %v3922_v14 }
 0x207   : > { %v3992_v31 = vmin.f32 %v1515_v18, 16.0  ;;  %v1795_v11 = vmul.f32 %v3980_v58, %v3980_v58  ;;  %v1702_v16 = vadd.f32 %v3901_v46, %v1701_v51  ;;  %vm1463_vm15 = vweird.f32 %v3878_v1 }
 0x208   : > { %v1470_v9 = vor.u32 1.1754944e-38, %v1469_v57  ;;  %v1739_v49 = vmul.f32 %v3967_v36, %v3925_v3  ;;  %v1495_v22 = vadd.f32 0.4994258, %v1494_v6  ;;  %v1431_v53 = vsel %vm3942_vm10, %v3910_v7, %v1426_v20  ;;  %v1216_v6 = vpop.f32.mrf.mxu1 }
 0x209   : > { %v1761_v61 = vmul.f32 %v1760_v54, %v3922_v14  ;;  %v1773_v41 = vadd.f32 0.112945676, %v1772_v39  ;;  %v1517_v44 = vmul.f32 2.1237322e-06, %v3992_v31  ;;  %v1461_v28 = vmul.f32 %v3933_v33, %v1460_v62 }
 0x20a   : > { %v1726_v63 = vadd.f32 1.1283791, %v1725_v35  ;;  %v1496_v51 = vmul.f32 %v1495_v22, %v3887_v0  ;;  %v1528_v57 = vmul.f32 3.8918573e-05, %v3992_v31  ;;  %v1483_v7 = vmul.f32 %v1482_v23, %v3887_v0 }
 0x20b   : > { %v1774_v13 = vmul.f32 %v1773_v41, %v3922_v14  ;;  %v1518_v54 = vadd.f32 0.00028619796, %v1517_v44  ;;  %v4018_v37 = vmin.f32 %v1795_v11, 16.0  ;;  %v1706_v18 = vsel %vm4012_vm1, %v3901_v46, %v1702_v16 }
 0x20c   : > { %vm4023_vm2 = vcmp.eq.f32.partialorder %v1467_v52, 8.507059e+37  ;;  %v1740_v40 = vsub.f32 1.0, %v1739_v49  ;;  %v4027_v62 = vadd.f32 1.0, %v1496_v51  ;;  %v1529_v35 = vadd.f32 0.001143296, %v1528_v57 }
 0x20d   : > { %v1762_v39 = vadd.f32 0.05243302, %v1761_v61  ;;  %v1775_v23 = vadd.f32 0.4994258, %v1774_v13  ;;  %v1519_v22 = vmul.f32 %v1518_v54, %v3992_v31  ;;  %v1797_v11 = vmul.f32 2.1237322e-06, %v4018_v37 }
 0x20e   : > { %v1462_v41 = vadd.f32 %v3933_v33, %v1461_v28  ;;  %vm1464_vm3 = vweird.f32 %v3933_v33  ;;  %2362 = vrcp.f32 %v4027_v62  ;;  %v4035_v46 = vmul.f32 0.5, %v3870_v15 }
 0x20f   : > { %v4038_v52 = vmul.f32 %v1431_v53, %v3893_v47  ;;  %v4041_v16 = vmul.f32 %v1726_v63, %v3737_v2  ;;  %v1484_v49 = vadd.f32 0.18741608, %v1483_v7  ;;  %v4044_v61 = vadd.f32 %v3496_v48, %v1216_v6  ;;  %vm4054_vm4 = vmor %vm1463_vm15, %vm1464_vm3 }
 0x210   : > { %v1711_v44 = vsel %vm3987_vm14, %v3936_v30, %v1706_v18  ;;  %v1741_v28 = vmul.f32 %v3967_v36, %v1740_v40  ;;  %v1776_v51 = vmul.f32 %v1775_v23, %v3922_v14  ;;  %v1530_v15 = vmul.f32 %v1529_v35, %v3992_v31 }
 0x211   : > { %v1747_v2 = vand.u32 2147483647, %v3925_v3  ;;  %v1763_v48 = vmul.f32 %v1762_v39, %v3922_v14  ;;  %v1520_v53 = vadd.f32 0.0036580483, %v1519_v22  ;;  %v1798_v63 = vadd.f32 0.00028619796, %v1797_v11 }
 0x212   : > { %v1466_v30 = vsel %vm4054_vm4, %v3933_v33, %v1462_v41  ;;  %v4063_v17 = vadd.f32 1.0, %v1776_v51  ;;  %v1531_v57 = vadd.f32 0.014752088, %v1530_v15  ;;  %v1808_v19 = vmul.f32 3.8918573e-05, %v4018_v37 }
 0x213   : > { %v4067_v1 = vmul.f32 %v1711_v44, %v3918_v59  ;;  %v1485_v7 = vmul.f32 %v1484_v49, %v3887_v0  ;;  %v1799_v13 = vmul.f32 %v1798_v63, %v4018_v37  ;;  %v4072_v54 = vmul.f32 0.70710677, %v4044_v61 }
 0x214   : > { %v4074_v18 = vpop.eup %2362  ;;  %v1742_v40 = vadd.f32 %v3967_v36, %v1741_v28  ;;  %vm1744_vm0 = vweird.f32 %v3967_v36  ;;  %v1749_v33 = vand.u32 2147483648, %v3925_v3  ;;  %2364 = vrcp.f32 %v4063_v17 }
 0x215   : > { %v1471_v59 = vsel %vm4023_vm2, %v1470_v9, %v1466_v30  ;;  %v1499_v0 = vmul.f32 %v4074_v18, %v4027_v62  ;;  %v1764_v35 = vadd.f32 0.18741608, %v1763_v48  ;;  %v1532_v6 = vmul.f32 %v1531_v57, %v3992_v31 }
 0x216   : > { %vm1743_vm5 = vweird.f32 %v3925_v3  ;;  %vm4086_vm6 = vcmp.eq.f32.partialorder %v1747_v2, 8.507059e+37  ;;  %v1521_v23 = vmul.f32 %v1520_v53, %v3992_v31  ;;  %v1809_v22 = vadd.f32 0.001143296, %v1808_v19 }
 0x217   : > { %vm4091_vm7 = vmor %vm1743_vm5, %vm1744_vm0  ;;  %v1486_v9 = vadd.f32 1.1283791, %v1485_v7  ;;  %v1533_v20 = vadd.f32 0.112945676, %v1532_v6  ;;  %v1800_v41 = vadd.f32 0.0036580483, %v1799_v13  ;;  %v1555_v49 = vmul.f32 %v4072_v54, %v4072_v54 }
 0x218   : > { %v4098_v44 = vmul.f32 %v1471_v59, %v3947_v10  ;;  %v1746_v3 = vsel %vm4091_vm7, %v3967_v36, %v1742_v40  ;;  %v1750_v28 = vor.u32 1.1754944e-38, %v1749_v33  ;;  %v1810_v51 = vmul.f32 %v1809_v22, %v4018_v37 }
 0x219   : > { %v1500_v15 = vsub.f32 1.0, %v1499_v0  ;;  %v1765_v47 = vmul.f32 %v1764_v35, %v3922_v14  ;;  %v1534_v2 = vmul.f32 %v1533_v20, %v3992_v31  ;;  %v4106_v48 = vmin.f32 %v1555_v49, 16.0  ;;  %v1237_v35 = vpop.f32.mrf.mxu3 }
 0x21a   : > { %v4108_v53 = vpop.eup %2364  ;;  %v1522_v63 = vadd.f32 0.05243302, %v1521_v23  ;;  %v4111_v10 = vmul.f32 0.5, %v3951_v55  ;;  %v1811_v30 = vadd.f32 0.014752088, %v1810_v51  ;;  %v2242_v57 = vclamps-f32 %v3668_v26, 1.0 }
 0x21b   : > { %v1751_v36 = vsel %vm4086_vm6, %v1750_v28, %v1746_v3  ;;  %v4117_v19 = vmul.f32 %v1486_v9, %v3862_v25  ;;  %v1507_v14 = vand.u32 2147483647, %v4027_v62  ;;  %v1801_v7 = vmul.f32 %v1800_v41, %v4018_v37 }
 0x21c   : > { %v1509_v13 = vand.u32 2147483648, %v4027_v62  ;;  %v1535_v40 = vadd.f32 0.4994258, %v1534_v2  ;;  %v1812_v33 = vmul.f32 %v1811_v30, %v4018_v37  ;;  %v1557_v55 = vmul.f32 2.1237322e-06, %v4106_v48 }
 0x21d   : > { %v1501_v59 = vmul.f32 %v4074_v18, %v1500_v15  ;;  %v1766_v26 = vadd.f32 1.1283791, %v1765_v47  ;;  %v1779_v0 = vmul.f32 %v4108_v53, %v4063_v17  ;;  %v1568_v25 = vmul.f32 3.8918573e-05, %v4106_v48 }
 0x21e   : > { %v1523_v6 = vmul.f32 %v1522_v63, %v3992_v31  ;;  %v1536_v39 = vmul.f32 %v1535_v40, %v3992_v31  ;;  %v1813_v23 = vadd.f32 0.112945676, %v1812_v33  ;;  %v1915_v22 = vadd.f32 1.0, %v2242_v57  ;;  %v4151_v57 = vld [vmem:[%s4499_s5] ss:$0 sm:$0xff] }
 0x21f   : > { %v4131_v11 = vmul.f32 %v1751_v36, %v4041_v16  ;;  %vm1503_vm8 = vweird.f32 %v4027_v62  ;;  %v1802_v9 = vadd.f32 0.05243302, %v1801_v7  ;;  %v1558_v20 = vadd.f32 0.00028619796, %v1557_v55  ;;  %v2377_v36 = vld [vmem:[%s4498_s4] ss:$0 sm:$0xff] }
 0x220   : > { %vm4134_vm9 = vcmp.eq.f32.partialorder %v1507_v14, 8.507059e+37  ;;  %v1510_v49 = vor.u32 1.1754944e-38, %v1509_v13  ;;  %v4138_v3 = vadd.f32 1.0, %v1536_v39  ;;  %v1814_v28 = vmul.f32 %v1813_v23, %v4018_v37 }
 0x221   : > { %v1569_v51 = vadd.f32 0.001143296, %v1568_v25  ;;  %v1502_v15 = vadd.f32 %v4074_v18, %v1501_v59  ;;  %vm1504_vm10 = vweird.f32 %v4074_v18  ;;  %v1780_v16 = vsub.f32 1.0, %v1779_v0 }
 0x222   : > { %v1559_v47 = vmul.f32 %v1558_v20, %v4106_v48  ;;  %v4145_v2 = vmul.f32 %v1766_v26, %v3897_v29  ;;  %v1524_v63 = vadd.f32 0.18741608, %v1523_v6  ;;  %v1931_v30 = vmul.f32 %v1915_v22, %v3596_v8  ;;  %vm4162_vm11 = vmor %vm1503_vm8, %vm1504_vm10 }
 0x223   : > { %v4156_v14 = vadd.f32 %v2377_v36, %v1237_v35  ;;  %2366 = vrcp.f32 %v4138_v3  ;;  %v1803_v7 = vmul.f32 %v1802_v9, %v4018_v37  ;;  %v1815_v29 = vadd.f32 0.4994258, %v1814_v28  ;;  %v1240_v9 = vpop.f32.mrf.mxu3 }
 0x224   : > { %v1560_v13 = vadd.f32 0.0036580483, %v1559_v47  ;;  %vm1783_vm12 = vweird.f32 %v4063_v17  ;;  %v1787_v40 = vand.u32 2147483647, %v4063_v17  ;;  %v1570_v33 = vmul.f32 %v1569_v51, %v4106_v48 }
 0x225   : > { %vm1967_vm13 = vcmask 130048   ;;  %v1506_v55 = vsel %vm4162_vm11, %v4074_v18, %v1502_v15  ;;  %v1781_v59 = vmul.f32 %v4108_v53, %v1780_v16  ;;  %v1816_v26 = vmul.f32 %v1815_v29, %v4018_v37 }
 0x226   : > { %v1561_v62 = vmul.f32 %v1560_v13, %v4106_v48  ;;  %v1571_v0 = vadd.f32 0.014752088, %v1570_v33  ;;  %v1951_v25 = vmul.f32 %v4151_v57, %v1931_v30  ;;  %v4177_v35 = vmul.f32 0.70710677, %v4156_v14 }
 0x227   : > { %v2243_v6 = vclamps-f32 %v3798_v38, 1.0  ;;  %v1789_v39 = vand.u32 2147483648, %v4063_v17  ;;  %v1525_v23 = vmul.f32 %v1524_v63, %v3992_v31  ;;  %v1804_v22 = vadd.f32 0.18741608, %v1803_v7 }
 0x228   : > { %v4182_v18 = vadd.f32 1.0, %v1816_v26  ;;  %v1572_v20 = vmul.f32 %v1571_v0, %v4106_v48  ;;  %v1968_v28 = vsel %vm1967_vm13, %v1951_v25, 0.0  ;;  %v1835_v51 = vmul.f32 %v4177_v35, %v4177_v35 }
 0x229   : > { %v1916_v15 = vadd.f32 1.0, %v2243_v6  ;;  %v4188_v16 = vpop.eup %2366  ;;  %v1511_v38 = vsel %vm4134_vm9, %v1510_v49, %v1506_v55  ;;  %v1782_v47 = vadd.f32 %v4108_v53, %v1781_v59  ;;  %vm1784_vm14 = vweird.f32 %v4108_v53  ;;  %1969 = vadd.xlane.f32.xlu0 %v1968_v28 }
 0x22a   : > { %2368 = vrcp.f32 %v4182_v18  ;;  %vm4195_vm15 = vcmp.eq.f32.partialorder %v1787_v40, 8.507059e+37  ;;  %v1562_v63 = vadd.f32 0.05243302, %v1561_v62  ;;  %v1573_v30 = vadd.f32 0.112945676, %v1572_v20  ;;  %vm4209_vm1 = vmor %vm1783_vm12, %vm1784_vm14 }
 0x22b   : > { %v4199_v7 = vadd.f32 %v2377_v36, %v1240_v9  ;;  %v1790_v29 = vor.u32 1.1754944e-38, %v1789_v39  ;;  %v1526_v13 = vadd.f32 1.1283791, %v1525_v23  ;;  %v4201_v8 = vmin.f32 %v1835_v51, 16.0 }
 0x22c   : > { %v1932_v41 = vmul.f32 %v1916_v15, %v3633_v4  ;;  %v4205_v49 = vmul.f32 %v1511_v38, %v4117_v19  ;;  %v1539_v33 = vmul.f32 %v4188_v16, %v4138_v3  ;;  %v1805_v36 = vmul.f32 %v1804_v22, %v4018_v37 }
 0x22d   : > { %v1574_v55 = vmul.f32 %v1573_v30, %v4106_v48  ;;  %v1786_v4 = vsel %vm4209_vm1, %v4108_v53, %v1782_v47  ;;  %v1837_v19 = vmul.f32 2.1237322e-06, %v4201_v8  ;;  %v1848_v59 = vmul.f32 3.8918573e-05, %v4201_v8 }
 0x22e   : > { %v1952_v17 = vmul.f32 %v4151_v57, %v1932_v41  ;;  %v1563_v26 = vmul.f32 %v1562_v63, %v4106_v48  ;;  %v4225_v0 = vmul.f32 0.70710677, %v4199_v7  ;;  %v2250_v37 = vclamps-f32 %v3828_v34, 1.0 }
 0x22f   : > { %v1575_v62 = vadd.f32 0.4994258, %v1574_v55  ;;  %v1549_v6 = vand.u32 2147483648, %v4138_v3  ;;  %v1838_v39 = vadd.f32 0.00028619796, %v1837_v19  ;;  %v1791_v22 = vsel %vm4195_vm15, %v1790_v29, %v1786_v4 }
 0x230   : > { %v4228_v25 = vpop.eup %2368  ;;  %v1849_v53 = vadd.f32 0.001143296, %v1848_v59  ;;  %v1971_v23 = vsel %vm1967_vm13, %v1952_v17, 0.0  ;;  %v1540_v9 = vsub.f32 1.0, %v1539_v33  ;;  %v1806_v20 = vadd.f32 1.1283791, %v1805_v36 }
 0x231   : > { %v1576_v28 = vmul.f32 %v1575_v62, %v4106_v48  ;;  %1972 = vadd.xlane.f32.xlu1 %v1971_v23  ;;  %v1819_v51 = vmul.f32 %v4228_v25, %v4182_v18  ;;  %v1839_v34 = vmul.f32 %v1838_v39, %v4201_v8  ;;  %v1875_v38 = vmul.f32 %v4225_v0, %v4225_v0 }
 0x232   : > { %v1850_v15 = vmul.f32 %v1849_v53, %v4201_v8  ;;  %v1547_v47 = vand.u32 2147483647, %v4138_v3  ;;  %v1564_v63 = vadd.f32 0.18741608, %v1563_v26  ;;  %v1923_v30 = vadd.f32 1.0, %v2250_v37 }
 0x233   : > { %v4242_v31 = vadd.f32 1.0, %v1576_v28  ;;  %v4245_v29 = vmul.f32 %v1526_v13, %v3962_v24  ;;  %v1840_v41 = vadd.f32 0.0036580483, %v1839_v34  ;;  %v4247_v33 = vmin.f32 %v1875_v38, 16.0 }
 0x234   : > { %v1851_v40 = vadd.f32 0.014752088, %v1850_v15  ;;  %v4250_v36 = vmul.f32 %v1791_v22, %v4145_v2  ;;  %v1541_v55 = vmul.f32 %v4188_v16, %v1540_v9  ;;  %v4253_v4 = vor.u32 1.1754944e-38, %v1549_v6 }
 0x235   : > { %2370 = vrcp.f32 %v4242_v31  ;;  %v4257_v19 = vmul.f32 %v1806_v20, %v3980_v58  ;;  %v1820_v59 = vsub.f32 1.0, %v1819_v51  ;;  %v1877_v13 = vmul.f32 2.1237322e-06, %v4247_v33 }
 0x236   : > { %v1852_v24 = vmul.f32 %v1851_v40, %v4201_v8  ;;  %v1827_v17 = vand.u32 2147483647, %v4182_v18  ;;  %v1841_v26 = vmul.f32 %v1840_v41, %v4201_v8  ;;  %v1888_v2 = vmul.f32 3.8918573e-05, %v4247_v33 }
 0x237   : > { %v1939_v62 = vmul.f32 %v1923_v30, %v3614_v56  ;;  %vm1544_vm2 = vweird.f32 %v4188_v16  ;;  %v1829_v37 = vand.u32 2147483648, %v4182_v18  ;;  %v1565_v58 = vmul.f32 %v1564_v63, %v4106_v48 }
 0x238   : > { %v1853_v6 = vadd.f32 0.112945676, %v1852_v24  ;;  %v2244_v39 = vclamps-f32 %v3890_v5, 1.0  ;;  %v4270_v53 = vadd.f32 %v4188_v16, %v1541_v55  ;;  %vm1823_vm3 = vweird.f32 %v4182_v18 }
 0x239   : > { %v1878_v23 = vadd.f32 0.00028619796, %v1877_v13  ;;  %v1889_v22 = vadd.f32 0.001143296, %v1888_v2  ;;  %v1959_v9 = vmul.f32 %v4151_v57, %v1939_v62  ;;  %vm1543_vm4 = vweird.f32 %v4138_v3 }
 0x23a   : > { %v1821_v56 = vmul.f32 %v4228_v25, %v1820_v59  ;;  %vm1824_vm0 = vweird.f32 %v4228_v25  ;;  %v1854_v48 = vmul.f32 %v1853_v6, %v4201_v8  ;;  %v1917_v20 = vadd.f32 1.0, %v2244_v39  ;;  %vm4320_vm8 = vmor %vm1543_vm4, %vm1544_vm2 }
 0x23b   : > { %v4278_v28 = vpop.eup %2370  ;;  %v1842_v5 = vadd.f32 0.05243302, %v1841_v26  ;;  %v1879_v51 = vmul.f32 %v1878_v23, %v4247_v33  ;;  %v1890_v34 = vmul.f32 %v1889_v22, %v4247_v33  ;;  %v1992_v15 = vsel %vm1967_vm13, %v1959_v9, 0.0  ;;  %vm4310_vm7 = vmor %vm1823_vm3, %vm1824_vm0 }
 0x23c   : > { %v1579_v38 = vmul.f32 %v4278_v28, %v4242_v31  ;;  %v1587_v63 = vand.u32 2147483647, %v4242_v31  ;;  %v1589_v30 = vand.u32 2147483648, %v4242_v31  ;;  %v1855_v41 = vadd.f32 0.4994258, %v1854_v48  ;;  %1993 = vadd.xlane.f32.xlu2 %v1992_v15 }
 0x23d   : > { %vm4287_vm5 = vcmp.eq.f32.partialorder %v1827_v17, 8.507059e+37  ;;  %v1880_v55 = vadd.f32 0.0036580483, %v1879_v51  ;;  %v1891_v59 = vadd.f32 0.014752088, %v1890_v34  ;;  %v1933_v24 = vmul.f32 %v1917_v20, %v3644_v27 }
 0x23e   : > { %v2245_v13 = vclamps-f32 %v4038_v52, 1.0  ;;  %v1822_v26 = vadd.f32 %v4228_v25, %v1821_v56  ;;  %v1580_v2 = vsub.f32 1.0, %v1579_v38  ;;  %v1856_v62 = vmul.f32 %v1855_v41, %v4201_v8 }
 0x23f   : > { %v2251_v6 = vclamps-f32 %v3904_v45, 1.0  ;;  %v1843_v39 = vmul.f32 %v1842_v5, %v4201_v8  ;;  %v1892_v17 = vmul.f32 %v1891_v59, %v4247_v33  ;;  %v1953_v23 = vmul.f32 %v4151_v57, %v1933_v24 }
 0x240   : > { %v1918_v22 = vadd.f32 1.0, %v2245_v13  ;;  %v1581_v9 = vmul.f32 %v4278_v28, %v1580_v2  ;;  %v4300_v48 = vadd.f32 1.0, %v1856_v62  ;;  %v1881_v27 = vmul.f32 %v1880_v55, %v4247_v33 }
 0x241   : > { %v1924_v52 = vadd.f32 1.0, %v2251_v6  ;;  %vm1584_vm6 = vweird.f32 %v4278_v28  ;;  %v1893_v56 = vadd.f32 0.112945676, %v1892_v17  ;;  %v1974_v20 = vsel %vm1967_vm13, %v1953_v23, 0.0 }
 0x242   : > { %v1934_v45 = vmul.f32 %v1918_v22, %v3711_v21  ;;  %v1830_v51 = vor.u32 1.1754944e-38, %v1829_v37  ;;  %v1566_v34 = vadd.f32 1.1283791, %v1565_v58  ;;  %v1582_v15 = vadd.f32 %v4278_v28, %v1581_v9  ;;  %1975 = vadd.xlane.f32.xlu1 %v1974_v20 }
 0x243   : > { %2372 = vrcp.f32 %v4300_v48  ;;  %v1826_v18 = vsel %vm4310_vm7, %v4228_v25, %v1822_v26  ;;  %vm1583_vm9 = vweird.f32 %v4242_v31  ;;  %v1844_v37 = vadd.f32 0.18741608, %v1843_v39 }
 0x244   : > { %v1894_v58 = vmul.f32 %v1893_v56, %v4247_v33  ;;  %vm4331_vm10 = vmor %vm1583_vm9, %vm1584_vm6  ;;  %v1882_v41 = vadd.f32 0.05243302, %v1881_v27  ;;  %v1954_v55 = vmul.f32 %v4151_v57, %v1934_v45  ;;  %v1940_v59 = vmul.f32 %v1924_v52, %v3654_v43 }
 0x245   : > { %v2252_v24 = vclamps-f32 %v4067_v1, 1.0  ;;  %v1546_v25 = vsel %vm4320_vm8, %v4188_v16, %v4270_v53  ;;  %vm4344_vm11 = vcmp.eq.f32.partialorder %v1547_v47, 8.507059e+37  ;;  %v1586_v13 = vsel %vm4331_vm10, %v4278_v28, %v1582_v15 }
 0x246   : > { %vm1588_vm12 = vcmp.eq.f32.partialorder %v1587_v63, 8.507059e+37  ;;  %v1590_v26 = vor.u32 1.1754944e-38, %v1589_v30  ;;  %v1831_v43 = vsel %vm4287_vm5, %v1830_v51, %v1826_v18  ;;  %v1895_v1 = vadd.f32 0.4994258, %v1894_v58 }
 0x247   : > { %v1977_v2 = vsel %vm1967_vm13, %v1954_v55, 0.0  ;;  %v1960_v16 = vmul.f32 %v4151_v57, %v1940_v59  ;;  %v1845_v3 = vmul.f32 %v1844_v37, %v4201_v8  ;;  %v1925_v47 = vadd.f32 1.0, %v2252_v24 }
 0x248   : > { %1978 = vadd.xlane.f32.xlu2 %v1977_v2  ;;  %v2253_v53 = vclamps-f32 %v4131_v11, 1.0  ;;  %v2246_v62 = vclamps-f32 %v4098_v44, 1.0  ;;  %v1567_v28 = vmul.f32 %v1566_v34, %v4072_v54  ;;  %v1591_v63 = vsel %vm1588_vm12, %v1590_v26, %v1586_v13 }
 0x249   : > { %v2373_v6 = vpop.eup %2372  ;;  %v1883_v30 = vmul.f32 %v1882_v41, %v4247_v33  ;;  %v1896_v40 = vmul.f32 %v1895_v1, %v4247_v33  ;;  %v1995_v17 = vsel %vm1967_vm13, %v1960_v16, 0.0  ;;  %v1941_v8 = vmul.f32 %v1925_v47, %v3734_v12 }
 0x24a   : > { %v1859_v39 = vmul.f32 %v2373_v6, %v4300_v48  ;;  %v2247_v23 = vclamps-f32 %v4205_v49, 1.0  ;;  %v1832_v11 = vmul.f32 %v1831_v43, %v4257_v19  ;;  %1996 = vadd.xlane.f32.xlu1 %v1995_v17  ;;  %v1926_v44 = vadd.f32 1.0, %v2253_v53 }
 0x24b   : > { %v4366_v22 = vadd.f32 1.0, %v1896_v40  ;;  %v1919_v54 = vadd.f32 1.0, %v2246_v62  ;;  %v1846_v9 = vadd.f32 1.1283791, %v1845_v3  ;;  %v1867_v52 = vand.u32 2147483647, %v4300_v48 }
 0x24c   : > { %v1860_v27 = vsub.f32 1.0, %v1859_v39  ;;  %v1961_v56 = vmul.f32 %v4151_v57, %v1941_v8  ;;  %v1592_v20 = vmul.f32 %v1591_v63, %v1567_v28  ;;  %v1869_v45 = vand.u32 2147483648, %v4300_v48 }
 0x24d   : > { %v1884_v5 = vadd.f32 0.18741608, %v1883_v30  ;;  %2374 = vrcp.f32 %v4366_v22  ;;  %vm1864_vm14 = vweird.f32 %v2373_v6  ;;  %v1942_v49 = vmul.f32 %v1926_v44, %v3881_v50 }
 0x24e   : > { %v1861_v12 = vmul.f32 %v2373_v6, %v1860_v27  ;;  %v1920_v19 = vadd.f32 1.0, %v2247_v23  ;;  %v1551_v51 = vsel %vm4344_vm11, %v4253_v4, %v1546_v25  ;;  %v1998_v34 = vsel %vm1967_vm13, %v1961_v56, 0.0 }
 0x24f   : > { %v1935_v15 = vmul.f32 %v1919_v54, %v3855_v42  ;;  %v2254_v21 = vclamps-f32 %v4250_v36, 1.0  ;;  %v1847_v18 = vmul.f32 %v1846_v9, %v4177_v35  ;;  %vm1863_vm15 = vweird.f32 %v4300_v48 }
 0x250   : > { %v1862_v37 = vadd.f32 %v2373_v6, %v1861_v12  ;;  %1999 = vadd.xlane.f32.xlu2 %v1998_v34  ;;  %v1962_v58 = vmul.f32 %v4151_v57, %v1942_v49  ;;  %vm1865_vm1 = vmor %vm1863_vm15, %vm1864_vm14  ;;  %v1870_v50 = vor.u32 1.1754944e-38, %v1869_v45  ;;  %v1885_v38 = vmul.f32 %v1884_v5, %v4247_v33 }
 0x251   : > { %v2249_v41 = vclamps-f32 %v1592_v20, 1.0  ;;  %v2255_v4 = vclamps-f32 %v1832_v11, 1.0  ;;  %vm1868_vm2 = vcmp.eq.f32.partialorder %v1867_v52, 8.507059e+37  ;;  %v1936_v36 = vmul.f32 %v1920_v19, %v3912_v60 }
 0x252   : > { %v1866_v55 = vsel %vm1865_vm1, %v2373_v6, %v1862_v37  ;;  %v2001_v42 = vsel %vm1967_vm13, %v1962_v58, 0.0  ;;  %v1552_v35 = vmul.f32 %v1551_v51, %v4245_v29  ;;  %v1955_v48 = vmul.f32 %v4151_v57, %v1935_v15 }
 0x253   : > { %v2375_v59 = vpop.eup %2374  ;;  %v1871_v24 = vsel %vm1868_vm2, %v1870_v50, %v1866_v55  ;;  %2002 = vadd.xlane.f32.xlu1 %v2001_v42  ;;  %v1927_v25 = vadd.f32 1.0, %v2254_v21  ;;  %v1250_v31 = vmul.f32 0.5, %v4044_v61  ;;  %v1922_v26 = vadd.f32 1.0, %v2249_v41  ;;  %v2020_v41 = vpop.permute.xlu0 %2019 }
 0x254   : > { %v1872_v13 = vmul.f32 %v1871_v24, %v1847_v18  ;;  %v1899_v33 = vmul.f32 %v2375_v59, %v4366_v22  ;;  %v1257_v43 = vmul.f32 0.5, %v4156_v14  ;;  %v1886_v1 = vadd.f32 1.1283791, %v1885_v38 }
 0x255   : > { %v1907_v2 = vand.u32 2147483647, %v4366_v22  ;;  %v1928_v60 = vadd.f32 1.0, %v2255_v4  ;;  %v1909_v29 = vand.u32 2147483648, %v4366_v22  ;;  %v1956_v3 = vmul.f32 %v4151_v57, %v1936_v36 }
 0x256   : > { %v1900_v16 = vsub.f32 1.0, %v1899_v33  ;;  %v2256_v47 = vclamps-f32 %v1872_v13, 1.0  ;;  %v1980_v53 = vsel %vm1967_vm13, %v1955_v48, 0.0  ;;  %v1943_v61 = vmul.f32 %v1927_v25, %v4035_v46 }
 0x257   : > { %v2248_v62 = vclamps-f32 %v1552_v35, 1.0  ;;  %v1944_v6 = vmul.f32 %v1928_v60, %v4111_v10  ;;  %vm1904_vm3 = vweird.f32 %v2375_v59  ;;  %v1938_v14 = vmul.f32 %v1922_v26, %v1250_v31 }
 0x258   : > { %v1901_v28 = vmul.f32 %v2375_v59, %v1900_v16  ;;  %1981 = vadd.xlane.f32.xlu2 %v1980_v53  ;;  %v1929_v63 = vadd.f32 1.0, %v2256_v47  ;;  %v1887_v30 = vmul.f32 %v1886_v1, %v4225_v0  ;;  %vm1903_vm4 = vweird.f32 %v4366_v22 }
 0x259   : > { %v1964_v40 = vmul.f32 %v4151_v57, %v1944_v6  ;;  %v1983_v17 = vsel %vm1967_vm13, %v1956_v3, 0.0  ;;  %vm1905_vm0 = vmor %vm1903_vm4, %vm1904_vm3  ;;  %v1910_v46 = vor.u32 1.1754944e-38, %v1909_v29  ;;  %v1963_v10 = vmul.f32 %v4151_v57, %v1943_v61 }
 0x25a   : > { %v1902_v39 = vadd.f32 %v2375_v59, %v1901_v28  ;;  %v1945_v8 = vmul.f32 %v1929_v63, %v1257_v43  ;;  %v1921_v23 = vadd.f32 1.0, %v2248_v62  ;;  %vm1908_vm5 = vcmp.eq.f32.partialorder %v1907_v2, 8.507059e+37 }
 0x25b   : > { %1984 = vadd.xlane.f32.xlu1 %v1983_v17  ;;  %v2007_v11 = vsel %vm1967_vm13, %v1964_v40, 0.0  ;;  %v1958_v0 = vmul.f32 %v4151_v57, %v1938_v14  ;;  %v1249_v9 = vmul.f32 0.5, %v3940_v32  ;;  %v2004_v56 = vsel %vm1967_vm13, %v1963_v10, 0.0 }
 0x25c   : > { %v1906_v44 = vsel %vm1905_vm0, %v2375_v59, %v1902_v39  ;;  %v1965_v54 = vmul.f32 %v4151_v57, %v1945_v8  ;;  %v1258_v12 = vmul.f32 0.5, %v4199_v7  ;;  %v2055_v55 = vlaneseq }
 0x25d   : > { %v1911_v22 = vsel %vm1908_vm5, %v1910_v46, %v1906_v44  ;;  %v1937_v20 = vmul.f32 %v1921_v23, %v1249_v9  ;;  %v1989_v45 = vsel %vm1967_vm13, %v1958_v0, 0.0  ;;  %vm2064_vm6 = vcmask 195712  }
 0x25e   : > { %v1912_v27 = vmul.f32 %v1911_v22, %v1887_v30  ;;  %v2010_v52 = vsel %vm1967_vm13, %v1965_v54, 0.0  ;;  %v4415_v36 = vand.u32 127, %v2055_v55  ;;  %vm2068_vm7 = vcmask 261312  }
 0x25f   : > { %v1957_v19 = vmul.f32 %v4151_v57, %v1937_v20  ;;  %vm2072_vm8 = vcmask 326912   ;;  %vm2076_vm9 = vcmask 392512   ;;  %vm2080_vm10 = vcmask 458112  }
 0x260   : > { %2005 = vadd.xlane.f32.xlu2 %v2004_v56  ;;  %v2257_v5 = vclamps-f32 %v1912_v27, 1.0  ;;  %v2058_v35 = vadd.s32 4294967288, %v4415_v36  ;;  %v2062_v31 = vadd.s32 4294967280, %v4415_v36  ;;  %v2066_v33 = vadd.s32 4294967272, %v4415_v36 }
 0x261   : > { %v1986_v34 = vsel %vm1967_vm13, %v1957_v19, 0.0  ;;  %v2086_v43 = vadd.s32 4294967232, %v4415_v36  ;;  %v2070_v1 = vadd.s32 4294967264, %v4415_v36  ;;  %v2074_v3 = vadd.s32 4294967256, %v4415_v36 }
 0x262   : > { %v1930_v49 = vadd.f32 1.0, %v2257_v5  ;;  %v2090_v62 = vadd.s32 4294967224, %v4415_v36  ;;  %v2094_v28 = vadd.s32 4294967216, %v4415_v36  ;;  %v2082_v14 = vadd.s32 4294967240, %v4415_v36 }
 0x263   : > { %1990 = vadd.xlane.f32.xlu1 %v1989_v45  ;;  %v2098_v30 = vadd.s32 4294967208, %v4415_v36  ;;  %v2078_v39 = vadd.s32 4294967248, %v4415_v36  ;;  %v2102_v44 = vadd.s32 4294967200, %v4415_v36  ;;  %vm2084_vm11 = vcmask 523712  }
 0x264   : > { %v1946_v51 = vmul.f32 %v1930_v49, %v1258_v12  ;;  %vm2088_vm12 = vcmask 589312   ;;  %v2106_v12 = vadd.s32 4294967192, %v4415_v36  ;;  %vm2092_vm14 = vcmask 654912  }
 0x265   : > { %vm2096_vm15 = vcmask 720512   ;;  %vm2100_vm1 = vcmask 786112   ;;  %vm2104_vm2 = vcmask 851712   ;;  %vm2108_vm3 = vcmask 917312  }
 0x266   : > { %v1966_v32 = vmul.f32 %v4151_v57, %v1946_v51  ;;  %v4413_v57 = vperm.slane %v2020_v41, 0  ;;  %vm2112_vm4 = vcmask 982912   ;;  %vm2116_vm0 = vcmask 1048512  }
 0x268   : > { %1987 = vadd.xlane.f32.xlu2 %v1986_v34  ;;  %v2013_v15 = vsel %vm1967_vm13, %v1966_v32, 0.0  ;;  %vm2060_vm13 = vcmask 130112  }
 0x269   : > { %2014 = vadd.xlane.f32.xlu0 %v2013_v15  ;;  %v2114_v15 = vadd.s32 4294967176, %v4415_v36 }
 0x26b   : > { %2008 = vadd.xlane.f32.xlu1 %v2007_v11 }
 0x270   : > { %2011 = vadd.xlane.f32.xlu2 %v2010_v52 }
 0x29c   : > { %v1970_v59 = vpop.xlane.xlu0 %1969 }
 0x29d   : > { %v2023_v25 = vadd.f32 %v4413_v57, %v1970_v59 }
 0x29f   : > { %v2057_v53 = vperm.slane %v2023_v25, %v4415_v36 }
 0x2a4   : > { %v1973_v21 = vpop.xlane.xlu1 %1972 }
 0x2a5   : > { %v2024_v24 = vadd.f32 %v4413_v57, %v1973_v21 }
 0x2a7   : > { %v2059_v16 = vperm.slane %v2024_v24, %v2058_v35 }
 0x2a9   : > { %v2061_v17 = vsel %vm2060_vm13, %v2059_v16, %v2057_v53 }
 0x2af   : > { %v1994_v18 = vpop.xlane.xlu2 %1993 }
 0x2b0   : > { %v2031_v29 = vadd.f32 %v4413_v57, %v1994_v18 }
 0x2b2   : > { %v2087_v8 = vperm.slane %v2031_v29, %v2086_v43 }
 0x2b5   : > { %v1976_v37 = vpop.xlane.xlu1 %1975 }
 0x2b6   : > { %v2025_v13 = vadd.f32 %v4413_v57, %v1976_v37 }
 0x2b8   : > { %v2063_v61 = vperm.slane %v2025_v13, %v2062_v31 }
 0x2ba   : > { %v2065_v23 = vsel %vm2064_vm6, %v2063_v61, %v2061_v17 }
 0x2bb   : > { %v1979_v58 = vpop.xlane.xlu2 %1978 }
 0x2bc   : > { %v2026_v26 = vadd.f32 %v4413_v57, %v1979_v58  ;;  %v2110_v58 = vadd.s32 4294967184, %v4415_v36 }
 0x2bd   : > { %v1997_v7 = vpop.xlane.xlu1 %1996 }
 0x2be   : > { %v2067_v6 = vperm.slane %v2026_v26, %v2066_v33  ;;  %v2032_v11 = vadd.f32 %v4413_v57, %v1997_v7 }
 0x2c0   : > { %v2069_v54 = vsel %vm2068_vm7, %v2067_v6, %v2065_v23  ;;  %v2091_v19 = vperm.slane %v2032_v11, %v2090_v62 }
 0x2c3   : > { %v2000_v50 = vpop.xlane.xlu2 %1999 }
 0x2c4   : > { %v2033_v22 = vadd.f32 %v4413_v57, %v2000_v50 }
 0x2c6   : > { %v2003_v38 = vpop.xlane.xlu1 %2002  ;;  %v2095_v18 = vperm.slane %v2033_v22, %v2094_v28 }
 0x2c7   : > { %v2034_v45 = vadd.f32 %v4413_v57, %v2003_v38 }
 0x2c9   : > { %v2099_v7 = vperm.slane %v2034_v45, %v2098_v30 }
 0x2cb   : > { %v1982_v4 = vpop.xlane.xlu2 %1981 }
 0x2cc   : > { %v2027_v2 = vadd.f32 %v4413_v57, %v1982_v4 }
 0x2ce   : > { %v1985_v42 = vpop.xlane.xlu1 %1984  ;;  %v2071_v40 = vperm.slane %v2027_v2, %v2070_v1 }
 0x2cf   : > { %v2028_v47 = vadd.f32 %v4413_v57, %v1985_v42 }
 0x2d0   : > { %v2073_v27 = vsel %vm2072_vm8, %v2071_v40, %v2069_v54 }
 0x2d1   : > { %v2075_v46 = vperm.slane %v2028_v47, %v2074_v3 }
 0x2d3   : > { %v2006_v48 = vpop.xlane.xlu2 %2005  ;;  %v2077_v5 = vsel %vm2076_vm9, %v2075_v46, %v2073_v27 }
 0x2d4   : > { %v2035_v51 = vadd.f32 %v4413_v57, %v2006_v48 }
 0x2d6   : > { %v1991_v60 = vpop.xlane.xlu1 %1990  ;;  %v2103_v4 = vperm.slane %v2035_v51, %v2102_v44 }
 0x2d7   : > { %v2030_v63 = vadd.f32 %v4413_v57, %v1991_v60 }
 0x2d9   : > { %v2083_v9 = vperm.slane %v2030_v63, %v2082_v14 }
 0x2db   : > { %v1988_v10 = vpop.xlane.xlu2 %1987 }
 0x2dc   : > { %v2029_v0 = vadd.f32 %v4413_v57, %v1988_v10  ;;  %v2015_v20 = vpop.xlane.xlu0 %2014 }
 0x2dd   : > { %v2038_v21 = vadd.f32 %v4413_v57, %v2015_v20 }
 0x2de   : > { %v2079_v52 = vperm.slane %v2029_v0, %v2078_v39  ;;  %v2009_v56 = vpop.xlane.xlu1 %2008 }
 0x2df   : > { %v2036_v49 = vadd.f32 %v4413_v57, %v2009_v56  ;;  %v2115_v35 = vperm.slane %v2038_v21, %v2114_v15 }
 0x2e0   : > { %v2081_v32 = vsel %vm2080_vm10, %v2079_v52, %v2077_v5 }
 0x2e1   : > { %v2085_v34 = vsel %vm2084_vm11, %v2083_v9, %v2081_v32  ;;  %v2107_v41 = vperm.slane %v2036_v49, %v2106_v12 }
 0x2e2   : > { %v2089_v37 = vsel %vm2088_vm12, %v2087_v8, %v2085_v34 }
 0x2e3   : > { %v2093_v50 = vsel %vm2092_vm14, %v2091_v19, %v2089_v37  ;;  %v2012_v38 = vpop.xlane.xlu2 %2011 }
 0x2e4   : > { %v2037_v55 = vadd.f32 %v4413_v57, %v2012_v38  ;;  %v2097_v42 = vsel %vm2096_vm15, %v2095_v18, %v2093_v50 }
 0x2e5   : > { %v2101_v59 = vsel %vm2100_vm1, %v2099_v7, %v2097_v42 }
 0x2e6   : > { %v2111_v36 = vperm.slane %v2037_v55, %v2110_v58  ;;  %v2105_v24 = vsel %vm2104_vm2, %v2103_v4, %v2101_v59 }
 0x2e7   : > { %v2109_v48 = vsel %vm2108_vm3, %v2107_v41, %v2105_v24 }
 0x2e8   : > { %v2113_v25 = vsel %vm2112_vm4, %v2111_v36, %v2109_v48 }
 0x2e9   : > { %v2117_v57 = vsel %vm2116_vm0, %v2115_v35, %v2113_v25 }
 0x2ea   : > { %2119 = vst [vmem:[%s273_s19] sm:$0x1] %v2117_v57 }
 0x2eb   : > { %2405 = shalt.err (!%p2402_p3)
}
 0x2ec   : > { %2268 = dma.vmem_to_hbm [thread:$0]  (%p2524_p5), %s2132_s20, 16, %s2134_s6, %s2121_s21  }
 0x2ed PF: > { %p2274_p4 = scmp.ge.s32.totalorder %s2440_s29, 2  ;;  %s2145_s14 = sand.u32 1, %s2428_s26  }
 0x2ee   : > { %s2146_s15 = scalar_lea.sflag [#allocation4], %s2145_s14 }
 0x2ef   : > { %p2271_p7 = pnand %p2274_p4, %p2528_p6 }
 0x2f1   : > { %p2272_p8 = pneg %p2271_p7 }
 0x2f3   : > { %2423 = dma.done.wait (%p2272_p8), %s2146_s15, 16  }
 0x2f4   : > { %2425 = vsyncadd (%p2272_p8), %s2146_s15, 4294967280  ;;  %p19_p9 = scmp.ge.s32.totalorder %s2511_s8, 4   ;;  %s4608_s26 = smov %s2432_s27 }
 0x2f5   : > { %s4609_s27 = smov %s2436_s28  ;;  %s4610_s28 = smov %s2522_s11 }
 0x2f6   : > { %s4611_s29 = smov %s2511_s8  ;;  %21 = sbr.rel (!%p19_p9) target bundleno = 6 (0x6), region = 83 }
 0x2fb   :  { %2151 = vsyncpa [#allocation4], 1 }
 0x2fc   :  { %2153 = vsyncpa [#allocation4 + $0x1], 1 }

</bundles_post_ra>
